<compile_context>
chip_gen: v7x
topology: tpu7x:2x2x1
jax: 0.10.0
libtpu: 0.0.40
codegen_flags: <defaults>
</compile_context>

<pallas_src>
import jax
import jax.numpy as jnp
from jax import lax
from jax.experimental import pallas as pl
from jax.experimental.pallas import tpu as pltpu


def _round_up(x, m):
    return (x + m - 1) // m * m


def _alstm_kernel(x_ref, wih_ref, whh_ref, b_ref, aw_ref, ab_ref, fw_ref, fb_ref,
                  out_ref,
                  ih_ref, outs_ref, logit_ref):
    """Refs (all padded / lane-aligned shapes):
      x_ref:     (T, TB, I)     f32  time-major input tile
      wih_ref:   (I, 4*Hp)      bf16 input->gates weight, gate-blocked, transposed
      whh_ref:   (Hp, 4*Hp)     bf16 hidden->gates weight, gate-blocked, transposed
      b_ref:     (1, 4*Hp)      f32  b_ih + b_hh, gate-blocked
      aw_ref:    (1, Hp)        f32  attention weight row
      ab_ref:    (1, 1)         f32  attention bias
      fw_ref:    (Hp, Op)       bf16 fc weight (transposed, padded)
      fb_ref:    (1, Op)        f32  fc bias (padded)
      out_ref:   (TB, Op)       f32  output tile
      ih_ref:    (T, TB, 4*Hp)  bf16 scratch: hoisted input projection (+ bias)
      outs_ref:  (T, TB, Hp)    bf16 scratch: all LSTM hidden states
      logit_ref: (T, TB, 1)     f32  scratch: per-step attention logits
    """
    T, TB, I = x_ref.shape
    Hp = outs_ref.shape[-1]
    f32, bf16 = jnp.float32, jnp.bfloat16

    # ---- Hoisted input projection: one big bf16 matmul, f32 acc, bias folded
    x2d = x_ref[...].reshape(T * TB, I).astype(bf16)
    ih = jnp.dot(x2d, wih_ref[...], preferred_element_type=f32) + b_ref[...]
    ih_ref[...] = ih.reshape(T, TB, 4 * Hp).astype(ih_ref.dtype)

    # ---- Recurrence: only h @ W_hh on the serial chain; h/c live in vregs ---
    def step(t, carry):
        h_prev, c_prev = carry
        gates = ih_ref[t].astype(f32) + jnp.dot(
            h_prev.astype(bf16), whh_ref[...], preferred_element_type=f32)
        # 128-lane-aligned gate slices (Hp is a multiple of 128); f32 VPU/EUP math.
        i_g = jax.nn.sigmoid(gates[:, 0 * Hp:1 * Hp])
        f_g = jax.nn.sigmoid(gates[:, 1 * Hp:2 * Hp])
        g_g = jnp.tanh(gates[:, 2 * Hp:3 * Hp])
        o_g = jax.nn.sigmoid(gates[:, 3 * Hp:4 * Hp])
        c_new = f_g * c_prev + i_g * g_g
        h_new = o_g * jnp.tanh(c_new)
        outs_ref[t] = h_new.astype(outs_ref.dtype)
        # Attention logit computed here: the multiply + lane-reduce rides the
        # otherwise-idle VPU/XLU slots under the step's MXU/EUP latency.
        logit_ref[t] = (jnp.sum(h_new * aw_ref[...], axis=-1, keepdims=True)
                        + ab_ref[...])
        return (h_new, c_new)

    zeros = jnp.zeros((TB, Hp), f32)
    unroll = T if T <= 16 else 8          # bounded unroll for long sequences
    lax.fori_loop(0, T, step, (zeros, zeros), unroll=unroll)

    # ---- Softmax over time + context + head --------------------------------
    logits = logit_ref[...]                                          # (T, TB, 1)
    m = jnp.max(logits, axis=0, keepdims=True)
    e = jnp.exp(logits - m)
    w = e * pl.reciprocal(jnp.sum(e, axis=0, keepdims=True), approx=True)
    outs = outs_ref[...].astype(f32)                                 # (T, TB, Hp)
    context = jnp.sum(outs * w, axis=0)                              # (TB, Hp)

    out_ref[...] = (
        jnp.dot(context.astype(bf16), fw_ref[...], preferred_element_type=f32)
        + fb_ref[...]
    )


def _vmem_bytes_estimate(T, TB, Ip, Hp, Op):
    """Rough VMEM footprint (bytes) for one batch tile (lane-padded shapes)."""
    x_tile = T * TB * Ip * 4 * 2                              # f32 in, double-buffered
    weights = (Ip * 4 * Hp + Hp * 4 * Hp + Hp * Op) * 2       # bf16, single-buffered
    smalls = (4 * Hp + Hp + 128 + Op) * 4 * 2                 # f32 biases / attn
    out_tile = TB * Op * 4 * 2
    ih = T * TB * 4 * Hp * 2                                  # bf16 scratch
    outs = T * TB * Hp * 2                                    # bf16 scratch
    logit = T * TB * 128 * 4                                  # (T,TB,1) f32, lane-padded
    return x_tile + weights + smalls + out_tile + ih + outs + logit


def _vmem_budget_bytes():
    try:
        cap = int(pltpu.get_tpu_info().vmem_capacity_bytes)
    except Exception:
        cap = 64 * 1024 * 1024     # conservative fallback (v7x physical per-TC)
    # Leave headroom below physical capacity (~96 MiB on v5e/v6e, ~48 MiB v7x).
    return max(32 * 1024 * 1024, cap * 3 // 4)


def alstm_forward(x, params):
    """x: (B, T, I) float32. Returns (B, O) float32."""
    B, T, I = x.shape
    H = params["w_hh"].shape[1]
    O = params["fc_w"].shape[0]

    f32, bf16 = jnp.float32, jnp.bfloat16
    Hp = _round_up(max(H, 1), 128)            # each gate gets a full lane block
    Op = _round_up(max(O, 1), 128)            # lane-dense output store
    Ip = _round_up(max(I, 1), 128)            # for the VMEM estimate only

    budget = _vmem_budget_bytes()

    # Batch tile: multiple of 16 (bf16 sublane tile), up to 256 to fill the MXU,
    # shrunk to fit the VMEM budget.
    Bp16 = _round_up(B, 16)
    TB = min(Bp16, 256)
    while TB > 16 and _vmem_bytes_estimate(T, TB, Ip, Hp, Op) > budget:
        TB -= 16
    # Prefer >=2 grid tiles (parallel batch axis can shard across the two v7x
    # TensorCores) once each tile still keeps >=64 rows for the MXU.
    if Bp16 >= 128 and TB * 2 > Bp16:
        TB = max(64, _round_up(Bp16 // 2, 16))
    Bp = _round_up(B, TB)

    # Time-major input, batch padded.
    x_t = jnp.transpose(x.astype(f32), (1, 0, 2))                     # (T, B, I)
    x_t = jnp.pad(x_t, ((0, 0), (0, Bp - B), (0, 0)))                 # (T, Bp, I)

    # Per-gate padding so gate g occupies columns [g*Hp, (g+1)*Hp).
    w_ih = params["w_ih"].astype(f32).reshape(4, H, I)
    w_hh = params["w_hh"].astype(f32).reshape(4, H, H)
    bias = (params["b_ih"] + params["b_hh"]).astype(f32).reshape(4, H)

    w_ih_p = jnp.pad(w_ih, ((0, 0), (0, Hp - H), (0, 0)))             # (4, Hp, I)
    w_hh_p = jnp.pad(w_hh, ((0, 0), (0, Hp - H), (0, Hp - H)))        # (4, Hp, Hp)
    bias_p = jnp.pad(bias, ((0, 0), (0, Hp - H)))                     # (4, Hp)

    # bf16 MXU operands (f32 accumulation inside the kernel).
    wih = jnp.transpose(w_ih_p, (2, 0, 1)).reshape(I, 4 * Hp).astype(bf16)
    whh = jnp.transpose(w_hh_p, (2, 0, 1)).reshape(Hp, 4 * Hp).astype(bf16)
    b = bias_p.reshape(1, 4 * Hp)

    aw = jnp.pad(params["attn_w"].astype(f32), ((0, 0), (0, Hp - H)))            # (1, Hp)
    ab = params["attn_b"].astype(f32).reshape(1, 1)                              # (1, 1)
    fw = jnp.pad(params["fc_w"].astype(f32).T,
                 ((0, Hp - H), (0, Op - O))).astype(bf16)                        # (Hp, Op)
    fb = jnp.pad(params["fc_b"].astype(f32).reshape(1, O), ((0, 0), (0, Op - O)))  # (1, Op)

    single = pl.Buffered(buffer_count=1)      # grid-invariant inputs: no double-buffer
    grid = (Bp // TB,)
    out = pl.pallas_call(
        _alstm_kernel,
        out_shape=jax.ShapeDtypeStruct((Bp, Op), f32),
        grid=grid,
        in_specs=[
            pl.BlockSpec((T, TB, I), lambda bi: (0, bi, 0)),     # x tile per batch block
            pl.BlockSpec((I, 4 * Hp), lambda bi: (0, 0), pipeline_mode=single),
            pl.BlockSpec((Hp, 4 * Hp), lambda bi: (0, 0), pipeline_mode=single),
            pl.BlockSpec((1, 4 * Hp), lambda bi: (0, 0), pipeline_mode=single),
            pl.BlockSpec((1, Hp), lambda bi: (0, 0), pipeline_mode=single),
            pl.BlockSpec((1, 1), lambda bi: (0, 0), pipeline_mode=single),
            pl.BlockSpec((Hp, Op), lambda bi: (0, 0), pipeline_mode=single),
            pl.BlockSpec((1, Op), lambda bi: (0, 0), pipeline_mode=single),
        ],
        out_specs=pl.BlockSpec((TB, Op), lambda bi: (bi, 0)),
        scratch_shapes=[
            pltpu.VMEM((T, TB, 4 * Hp), bf16),   # hoisted input projection
            pltpu.VMEM((T, TB, Hp), bf16),       # all hidden states
            pltpu.VMEM((T, TB, 1), f32),         # per-step attention logits
        ],
        compiler_params=pltpu.CompilerParams(
            dimension_semantics=("parallel",),
            vmem_limit_bytes=int(budget),
        ),
    )(x_t, wih, whh, b, aw, ab, fw, fb)

    return out[:B, :O]


def alstm_reference(x, params):
    """Pure-JAX reference reproducing the PyTorch forward (f32 throughout)."""
    B, T, I = x.shape
    H = params["w_hh"].shape[1]

    def step(carry, xt):
        h, c = carry
        gates = xt @ params["w_ih"].T + h @ params["w_hh"].T + params["b_ih"] + params["b_hh"]
        i_g = jax.nn.sigmoid(gates[:, 0 * H:1 * H])
        f_g = jax.nn.sigmoid(gates[:, 1 * H:2 * H])
        g_g = jnp.tanh(gates[:, 2 * H:3 * H])
        o_g = jax.nn.sigmoid(gates[:, 3 * H:4 * H])
        c_new = f_g * c + i_g * g_g
        h_new = o_g * jnp.tanh(c_new)
        return (h_new, c_new), h_new

    h0 = jnp.zeros((B, H), jnp.float32)
    c0 = jnp.zeros((B, H), jnp.float32)
    (_, _), outs = lax.scan(step, (h0, c0), jnp.transpose(x, (1, 0, 2)))
    outs = jnp.transpose(outs, (1, 0, 2))                                   # (B, T, H)
    logits = outs @ params["attn_w"].T + params["attn_b"]                   # (B, T, 1)
    w = jax.nn.softmax(logits[..., 0], axis=1)                              # (B, T)
    context = jnp.sum(outs * w[..., None], axis=1)                          # (B, H)
    return context @ params["fc_w"].T + params["fc_b"]


def init_params(key, input_size=5, hidden_size=64, output_size=1):
    ks = jax.random.split(key, 8)
    s = 1.0 / jnp.sqrt(hidden_size)
    return {
        "w_ih": jax.random.uniform(ks[0], (4 * hidden_size, input_size), jnp.float32, -s, s),
        "w_hh": jax.random.uniform(ks[1], (4 * hidden_size, hidden_size), jnp.float32, -s, s),
        "b_ih": jax.random.uniform(ks[2], (4 * hidden_size,), jnp.float32, -s, s),
        "b_hh": jax.random.uniform(ks[3], (4 * hidden_size,), jnp.float32, -s, s),
        "attn_w": jax.random.uniform(ks[4], (1, hidden_size), jnp.float32, -s, s),
        "attn_b": jax.random.uniform(ks[5], (1,), jnp.float32, -s, s),
        "fc_w": jax.random.uniform(ks[6], (output_size, hidden_size), jnp.float32, -s, s),
        "fc_b": jax.random.uniform(ks[7], (output_size,), jnp.float32, -s, s),
    }


if __name__ == "__main__":
    B, T, I, H, O = 4, 8, 5, 64, 1
    key = jax.random.PRNGKey(0)
    k_x, k_p = jax.random.split(key)
    x = jax.random.normal(k_x, (B, T, I), jnp.float32)
    params = init_params(k_p, input_size=I, hidden_size=H, output_size=O)

    out = jax.block_until_ready(alstm_forward(x, params))
    ref = jax.block_until_ready(alstm_reference(x, params))

    assert out.shape == (B, O), out.shape
    import numpy as np
    # bf16 MXU operands / bf16 scratch storage + approx softmax reciprocal:
    # tolerance loosened accordingly vs. the f32 reference.
    np.testing.assert_allclose(np.asarray(out), np.asarray(ref), rtol=2e-2, atol=2e-2)
    print("KERNEL_OK")
</pallas_src>

<mosaic_0001>
module attributes {stable_mosaic.version = 11 : i64} {
  func.func @_alstm_kernel(%arg0: i32, %arg1: memref<8x16x5xf32, #tpu.memory_space<vmem>>, %arg2: memref<5x512xbf16, #tpu.memory_space<vmem>>, %arg3: memref<128x512xbf16, #tpu.memory_space<vmem>>, %arg4: memref<1x512xf32, #tpu.memory_space<vmem>>, %arg5: memref<1x128xf32, #tpu.memory_space<vmem>>, %arg6: memref<1x1xf32, #tpu.memory_space<vmem>>, %arg7: memref<128x128xbf16, #tpu.memory_space<vmem>>, %arg8: memref<1x128xf32, #tpu.memory_space<vmem>>, %arg9: memref<16x128xf32, #tpu.memory_space<vmem>>, %arg10: memref<8x16x512xbf16, #tpu.memory_space<vmem>>, %arg11: memref<8x16x128xbf16, #tpu.memory_space<vmem>>, %arg12: memref<8x16x1xf32, #tpu.memory_space<vmem>>) attributes {dimension_semantics = [#tpu.dimension_semantics<parallel>], iteration_bounds = array<i64: 1>, scalar_prefetch = 0 : i64, scratch_operands = 3 : i64, tpu.core_type = #tpu.core_type<tc>, window_params = [{transform_indices = @transform_0, window_bounds = array<i64: 8, 16, 5>}, {pipeline_mode = #tpu.pipeline_mode<synchronous>, transform_indices = @transform_1, window_bounds = array<i64: 5, 512>}, {pipeline_mode = #tpu.pipeline_mode<synchronous>, transform_indices = @transform_2, window_bounds = array<i64: 128, 512>}, {pipeline_mode = #tpu.pipeline_mode<synchronous>, transform_indices = @transform_3, window_bounds = array<i64: 1, 512>}, {pipeline_mode = #tpu.pipeline_mode<synchronous>, transform_indices = @transform_4, window_bounds = array<i64: 1, 128>}, {pipeline_mode = #tpu.pipeline_mode<synchronous>, transform_indices = @transform_5, window_bounds = array<i64: 1, 1>}, {pipeline_mode = #tpu.pipeline_mode<synchronous>, transform_indices = @transform_6, window_bounds = array<i64: 128, 128>}, {pipeline_mode = #tpu.pipeline_mode<synchronous>, transform_indices = @transform_7, window_bounds = array<i64: 1, 128>}, {transform_indices = @transform_8, window_bounds = array<i64: 16, 128>}]} {
    %c0 = arith.constant 0 : index
    %c0_0 = arith.constant 0 : index
    %c0_1 = arith.constant 0 : index
    %0 = vector.load %arg1[%c0, %c0_0, %c0_1] : memref<8x16x5xf32, #tpu.memory_space<vmem>>, vector<8x16x5xf32>
    %1 = vector.shape_cast %0 : vector<8x16x5xf32> to vector<128x5xf32>
    %2 = arith.truncf %1 : vector<128x5xf32> to vector<128x5xbf16>
    %c0_2 = arith.constant 0 : index
    %c0_3 = arith.constant 0 : index
    %3 = vector.load %arg2[%c0_2, %c0_3] : memref<5x512xbf16, #tpu.memory_space<vmem>>, vector<5x512xbf16>
    %cst = arith.constant dense<0.000000e+00> : vector<128x512xf32>
    %4 = tpu.matmul %2, %3, %cst {dimension_numbers = #tpu.dot_dimension_numbers<[1], [0], [0], [1], [0, 0, 1, 1], [], []>} : vector<128x5xbf16>, vector<5x512xbf16>, vector<128x512xf32> -> vector<128x512xf32>
    %c0_4 = arith.constant 0 : index
    %c0_5 = arith.constant 0 : index
    %5 = vector.load %arg4[%c0_4, %c0_5] : memref<1x512xf32, #tpu.memory_space<vmem>>, vector<1x512xf32>
    %6 = vector.broadcast %5 : vector<1x512xf32> to vector<128x512xf32>
    %7 = arith.addf %4, %6 : vector<128x512xf32>
    %8 = vector.shape_cast %7 : vector<128x512xf32> to vector<8x16x512xf32>
    %9 = arith.truncf %8 : vector<8x16x512xf32> to vector<8x16x512xbf16>
    %c0_6 = arith.constant 0 : index
    %c0_7 = arith.constant 0 : index
    %c0_8 = arith.constant 0 : index
    %10 = vector.load %arg10[%c0_6, %c0_7, %c0_8] : memref<8x16x512xbf16, #tpu.memory_space<vmem>>, vector<8x16x512xbf16>
    tpu.vector_store %arg10[%c0_6, %c0_7, %c0_8], %9 {strides = array<i32>} : memref<8x16x512xbf16, #tpu.memory_space<vmem>>, vector<8x16x512xbf16>,
    %cst_9 = arith.constant 0.000000e+00 : f32
    %11 = vector.broadcast %cst_9 : f32 to vector<16x128xf32>
    %c0_i32 = arith.constant 0 : i32
    %12 = arith.index_cast %c0_i32 : i32 to index
    %c0_10 = arith.constant 0 : index
    %c0_11 = arith.constant 0 : index
    %13 = vector.load %arg10[%12, %c0_10, %c0_11] : memref<8x16x512xbf16, #tpu.memory_space<vmem>>, vector<1x16x512xbf16>
    %14 = vector.shape_cast %13 : vector<1x16x512xbf16> to vector<16x512xbf16>
    %15 = arith.extf %14 : vector<16x512xbf16> to vector<16x512xf32>
    %16 = arith.truncf %11 : vector<16x128xf32> to vector<16x128xbf16>
    %c0_12 = arith.constant 0 : index
    %c0_13 = arith.constant 0 : index
    %17 = vector.load %arg3[%c0_12, %c0_13] : memref<128x512xbf16, #tpu.memory_space<vmem>>, vector<128x512xbf16>
    %cst_14 = arith.constant dense<0.000000e+00> : vector<16x512xf32>
    %18 = tpu.matmul %16, %17, %cst_14 {dimension_numbers = #tpu.dot_dimension_numbers<[1], [0], [0], [1], [0, 0, 1, 1], [], []>} : vector<16x128xbf16>, vector<128x512xbf16>, vector<16x512xf32> -> vector<16x512xf32>
    %19 = arith.addf %15, %18 : vector<16x512xf32>
    %20 = vector.extract_strided_slice %19 {offsets = [0, 0], sizes = [16, 128], strides = [1, 1]} : vector<16x512xf32> to vector<16x128xf32>
    %21 = arith.negf %20 : vector<16x128xf32>
    %22 = math.exp %21 : vector<16x128xf32>
    %cst_15 = arith.constant 1.000000e+00 : f32
    %23 = vector.broadcast %cst_15 : f32 to vector<16x128xf32>
    %24 = arith.addf %23, %22 : vector<16x128xf32>
    %25 = arith.divf %23, %24 : vector<16x128xf32>
    %26 = vector.extract_strided_slice %19 {offsets = [0, 128], sizes = [16, 128], strides = [1, 1]} : vector<16x512xf32> to vector<16x128xf32>
    %27 = arith.negf %26 : vector<16x128xf32>
    %28 = math.exp %27 : vector<16x128xf32>
    %cst_16 = arith.constant 1.000000e+00 : f32
    %29 = vector.broadcast %cst_16 : f32 to vector<16x128xf32>
    %30 = arith.addf %29, %28 : vector<16x128xf32>
    %31 = arith.divf %29, %30 : vector<16x128xf32>
    %32 = vector.extract_strided_slice %19 {offsets = [0, 256], sizes = [16, 128], strides = [1, 1]} : vector<16x512xf32> to vector<16x128xf32>
    %33 = math.tanh %32 : vector<16x128xf32>
    %34 = vector.extract_strided_slice %19 {offsets = [0, 384], sizes = [16, 128], strides = [1, 1]} : vector<16x512xf32> to vector<16x128xf32>
    %35 = arith.negf %34 : vector<16x128xf32>
    %36 = math.exp %35 : vector<16x128xf32>
    %cst_17 = arith.constant 1.000000e+00 : f32
    %37 = vector.broadcast %cst_17 : f32 to vector<16x128xf32>
    %38 = arith.addf %37, %36 : vector<16x128xf32>
    %39 = arith.divf %37, %38 : vector<16x128xf32>
    %40 = arith.mulf %31, %11 : vector<16x128xf32>
    %41 = arith.mulf %25, %33 : vector<16x128xf32>
    %42 = arith.addf %40, %41 : vector<16x128xf32>
    %43 = math.tanh %42 : vector<16x128xf32>
    %44 = arith.mulf %39, %43 : vector<16x128xf32>
    %45 = arith.truncf %44 : vector<16x128xf32> to vector<16x128xbf16>
    %46 = arith.index_cast %c0_i32 : i32 to index
    %c0_18 = arith.constant 0 : index
    %c0_19 = arith.constant 0 : index
    %47 = vector.load %arg11[%46, %c0_18, %c0_19] : memref<8x16x128xbf16, #tpu.memory_space<vmem>>, vector<1x16x128xbf16>
    %48 = vector.shape_cast %47 : vector<1x16x128xbf16> to vector<16x128xbf16>
    %49 = vector.shape_cast %45 : vector<16x128xbf16> to vector<1x16x128xbf16>
    tpu.vector_store %arg11[%46, %c0_18, %c0_19], %49 {strides = array<i32>} : memref<8x16x128xbf16, #tpu.memory_space<vmem>>, vector<1x16x128xbf16>,
    %c0_20 = arith.constant 0 : index
    %c0_21 = arith.constant 0 : index
    %50 = vector.load %arg5[%c0_20, %c0_21] : memref<1x128xf32, #tpu.memory_space<vmem>>, vector<1x128xf32>
    %51 = vector.broadcast %50 : vector<1x128xf32> to vector<16x128xf32>
    %52 = arith.mulf %44, %51 : vector<16x128xf32>
    %cst_22 = arith.constant dense<0.000000e+00> : vector<16xf32>
    %53 = vector.multi_reduction <add>, %52, %cst_22 [1] : vector<16x128xf32> to vector<16xf32>
    %54 = vector.shape_cast %53 : vector<16xf32> to vector<16x1xf32>
    %c0_23 = arith.constant 0 : index
    %c0_24 = arith.constant 0 : index
    %55 = vector.load %arg6[%c0_23, %c0_24] : memref<1x1xf32, #tpu.memory_space<vmem>>, vector<1x1xf32>
    %56 = vector.broadcast %55 : vector<1x1xf32> to vector<16x1xf32>
    %57 = arith.addf %54, %56 : vector<16x1xf32>
    %58 = arith.index_cast %c0_i32 : i32 to index
    %c0_25 = arith.constant 0 : index
    %c0_26 = arith.constant 0 : index
    %59 = vector.load %arg12[%58, %c0_25, %c0_26] : memref<8x16x1xf32, #tpu.memory_space<vmem>>, vector<1x16x1xf32>
    %60 = vector.shape_cast %59 : vector<1x16x1xf32> to vector<16x1xf32>
    %61 = vector.shape_cast %57 : vector<16x1xf32> to vector<1x16x1xf32>
    tpu.vector_store %arg12[%58, %c0_25, %c0_26], %61 {strides = array<i32>} : memref<8x16x1xf32, #tpu.memory_space<vmem>>, vector<1x16x1xf32>,
    %c1_i32 = arith.constant 1 : i32
    %62 = arith.index_cast %c1_i32 : i32 to index
    %c0_27 = arith.constant 0 : index
    %c0_28 = arith.constant 0 : index
    %63 = vector.load %arg10[%62, %c0_27, %c0_28] : memref<8x16x512xbf16, #tpu.memory_space<vmem>>, vector<1x16x512xbf16>
    %64 = vector.shape_cast %63 : vector<1x16x512xbf16> to vector<16x512xbf16>
    %65 = arith.extf %64 : vector<16x512xbf16> to vector<16x512xf32>
    %66 = arith.truncf %44 : vector<16x128xf32> to vector<16x128xbf16>
    %c0_29 = arith.constant 0 : index
    %c0_30 = arith.constant 0 : index
    %67 = vector.load %arg3[%c0_29, %c0_30] : memref<128x512xbf16, #tpu.memory_space<vmem>>, vector<128x512xbf16>
    %cst_31 = arith.constant dense<0.000000e+00> : vector<16x512xf32>
    %68 = tpu.matmul %66, %67, %cst_31 {dimension_numbers = #tpu.dot_dimension_numbers<[1], [0], [0], [1], [0, 0, 1, 1], [], []>} : vector<16x128xbf16>, vector<128x512xbf16>, vector<16x512xf32> -> vector<16x512xf32>
    %69 = arith.addf %65, %68 : vector<16x512xf32>
    %70 = vector.extract_strided_slice %69 {offsets = [0, 0], sizes = [16, 128], strides = [1, 1]} : vector<16x512xf32> to vector<16x128xf32>
    %71 = arith.negf %70 : vector<16x128xf32>
    %72 = math.exp %71 : vector<16x128xf32>
    %cst_32 = arith.constant 1.000000e+00 : f32
    %73 = vector.broadcast %cst_32 : f32 to vector<16x128xf32>
    %74 = arith.addf %73, %72 : vector<16x128xf32>
    %75 = arith.divf %73, %74 : vector<16x128xf32>
    %76 = vector.extract_strided_slice %69 {offsets = [0, 128], sizes = [16, 128], strides = [1, 1]} : vector<16x512xf32> to vector<16x128xf32>
    %77 = arith.negf %76 : vector<16x128xf32>
    %78 = math.exp %77 : vector<16x128xf32>
    %cst_33 = arith.constant 1.000000e+00 : f32
    %79 = vector.broadcast %cst_33 : f32 to vector<16x128xf32>
    %80 = arith.addf %79, %78 : vector<16x128xf32>
    %81 = arith.divf %79, %80 : vector<16x128xf32>
    %82 = vector.extract_strided_slice %69 {offsets = [0, 256], sizes = [16, 128], strides = [1, 1]} : vector<16x512xf32> to vector<16x128xf32>
    %83 = math.tanh %82 : vector<16x128xf32>
    %84 = vector.extract_strided_slice %69 {offsets = [0, 384], sizes = [16, 128], strides = [1, 1]} : vector<16x512xf32> to vector<16x128xf32>
    %85 = arith.negf %84 : vector<16x128xf32>
    %86 = math.exp %85 : vector<16x128xf32>
    %cst_34 = arith.constant 1.000000e+00 : f32
    %87 = vector.broadcast %cst_34 : f32 to vector<16x128xf32>
    %88 = arith.addf %87, %86 : vector<16x128xf32>
    %89 = arith.divf %87, %88 : vector<16x128xf32>
    %90 = arith.mulf %81, %42 : vector<16x128xf32>
    %91 = arith.mulf %75, %83 : vector<16x128xf32>
    %92 = arith.addf %90, %91 : vector<16x128xf32>
    %93 = math.tanh %92 : vector<16x128xf32>
    %94 = arith.mulf %89, %93 : vector<16x128xf32>
    %95 = arith.truncf %94 : vector<16x128xf32> to vector<16x128xbf16>
    %96 = arith.index_cast %c1_i32 : i32 to index
    %c0_35 = arith.constant 0 : index
    %c0_36 = arith.constant 0 : index
    %97 = vector.load %arg11[%96, %c0_35, %c0_36] : memref<8x16x128xbf16, #tpu.memory_space<vmem>>, vector<1x16x128xbf16>
    %98 = vector.shape_cast %97 : vector<1x16x128xbf16> to vector<16x128xbf16>
    %99 = vector.shape_cast %95 : vector<16x128xbf16> to vector<1x16x128xbf16>
    tpu.vector_store %arg11[%96, %c0_35, %c0_36], %99 {strides = array<i32>} : memref<8x16x128xbf16, #tpu.memory_space<vmem>>, vector<1x16x128xbf16>,
    %c0_37 = arith.constant 0 : index
    %c0_38 = arith.constant 0 : index
    %100 = vector.load %arg5[%c0_37, %c0_38] : memref<1x128xf32, #tpu.memory_space<vmem>>, vector<1x128xf32>
    %101 = vector.broadcast %100 : vector<1x128xf32> to vector<16x128xf32>
    %102 = arith.mulf %94, %101 : vector<16x128xf32>
    %cst_39 = arith.constant dense<0.000000e+00> : vector<16xf32>
    %103 = vector.multi_reduction <add>, %102, %cst_39 [1] : vector<16x128xf32> to vector<16xf32>
    %104 = vector.shape_cast %103 : vector<16xf32> to vector<16x1xf32>
    %c0_40 = arith.constant 0 : index
    %c0_41 = arith.constant 0 : index
    %105 = vector.load %arg6[%c0_40, %c0_41] : memref<1x1xf32, #tpu.memory_space<vmem>>, vector<1x1xf32>
    %106 = vector.broadcast %105 : vector<1x1xf32> to vector<16x1xf32>
    %107 = arith.addf %104, %106 : vector<16x1xf32>
    %108 = arith.index_cast %c1_i32 : i32 to index
    %c0_42 = arith.constant 0 : index
    %c0_43 = arith.constant 0 : index
    %109 = vector.load %arg12[%108, %c0_42, %c0_43] : memref<8x16x1xf32, #tpu.memory_space<vmem>>, vector<1x16x1xf32>
    %110 = vector.shape_cast %109 : vector<1x16x1xf32> to vector<16x1xf32>
    %111 = vector.shape_cast %107 : vector<16x1xf32> to vector<1x16x1xf32>
    tpu.vector_store %arg12[%108, %c0_42, %c0_43], %111 {strides = array<i32>} : memref<8x16x1xf32, #tpu.memory_space<vmem>>, vector<1x16x1xf32>,
    %c2_i32 = arith.constant 2 : i32
    %112 = arith.index_cast %c2_i32 : i32 to index
    %c0_44 = arith.constant 0 : index
    %c0_45 = arith.constant 0 : index
    %113 = vector.load %arg10[%112, %c0_44, %c0_45] : memref<8x16x512xbf16, #tpu.memory_space<vmem>>, vector<1x16x512xbf16>
    %114 = vector.shape_cast %113 : vector<1x16x512xbf16> to vector<16x512xbf16>
    %115 = arith.extf %114 : vector<16x512xbf16> to vector<16x512xf32>
    %116 = arith.truncf %94 : vector<16x128xf32> to vector<16x128xbf16>
    %c0_46 = arith.constant 0 : index
    %c0_47 = arith.constant 0 : index
    %117 = vector.load %arg3[%c0_46, %c0_47] : memref<128x512xbf16, #tpu.memory_space<vmem>>, vector<128x512xbf16>
    %cst_48 = arith.constant dense<0.000000e+00> : vector<16x512xf32>
    %118 = tpu.matmul %116, %117, %cst_48 {dimension_numbers = #tpu.dot_dimension_numbers<[1], [0], [0], [1], [0, 0, 1, 1], [], []>} : vector<16x128xbf16>, vector<128x512xbf16>, vector<16x512xf32> -> vector<16x512xf32>
    %119 = arith.addf %115, %118 : vector<16x512xf32>
    %120 = vector.extract_strided_slice %119 {offsets = [0, 0], sizes = [16, 128], strides = [1, 1]} : vector<16x512xf32> to vector<16x128xf32>
    %121 = arith.negf %120 : vector<16x128xf32>
    %122 = math.exp %121 : vector<16x128xf32>
    %cst_49 = arith.constant 1.000000e+00 : f32
    %123 = vector.broadcast %cst_49 : f32 to vector<16x128xf32>
    %124 = arith.addf %123, %122 : vector<16x128xf32>
    %125 = arith.divf %123, %124 : vector<16x128xf32>
    %126 = vector.extract_strided_slice %119 {offsets = [0, 128], sizes = [16, 128], strides = [1, 1]} : vector<16x512xf32> to vector<16x128xf32>
    %127 = arith.negf %126 : vector<16x128xf32>
    %128 = math.exp %127 : vector<16x128xf32>
    %cst_50 = arith.constant 1.000000e+00 : f32
    %129 = vector.broadcast %cst_50 : f32 to vector<16x128xf32>
    %130 = arith.addf %129, %128 : vector<16x128xf32>
    %131 = arith.divf %129, %130 : vector<16x128xf32>
    %132 = vector.extract_strided_slice %119 {offsets = [0, 256], sizes = [16, 128], strides = [1, 1]} : vector<16x512xf32> to vector<16x128xf32>
    %133 = math.tanh %132 : vector<16x128xf32>
    %134 = vector.extract_strided_slice %119 {offsets = [0, 384], sizes = [16, 128], strides = [1, 1]} : vector<16x512xf32> to vector<16x128xf32>
    %135 = arith.negf %134 : vector<16x128xf32>
    %136 = math.exp %135 : vector<16x128xf32>
    %cst_51 = arith.constant 1.000000e+00 : f32
    %137 = vector.broadcast %cst_51 : f32 to vector<16x128xf32>
    %138 = arith.addf %137, %136 : vector<16x128xf32>
    %139 = arith.divf %137, %138 : vector<16x128xf32>
    %140 = arith.mulf %131, %92 : vector<16x128xf32>
    %141 = arith.mulf %125, %133 : vector<16x128xf32>
    %142 = arith.addf %140, %141 : vector<16x128xf32>
    %143 = math.tanh %142 : vector<16x128xf32>
    %144 = arith.mulf %139, %143 : vector<16x128xf32>
    %145 = arith.truncf %144 : vector<16x128xf32> to vector<16x128xbf16>
    %146 = arith.index_cast %c2_i32 : i32 to index
    %c0_52 = arith.constant 0 : index
    %c0_53 = arith.constant 0 : index
    %147 = vector.load %arg11[%146, %c0_52, %c0_53] : memref<8x16x128xbf16, #tpu.memory_space<vmem>>, vector<1x16x128xbf16>
    %148 = vector.shape_cast %147 : vector<1x16x128xbf16> to vector<16x128xbf16>
    %149 = vector.shape_cast %145 : vector<16x128xbf16> to vector<1x16x128xbf16>
    tpu.vector_store %arg11[%146, %c0_52, %c0_53], %149 {strides = array<i32>} : memref<8x16x128xbf16, #tpu.memory_space<vmem>>, vector<1x16x128xbf16>,
    %c0_54 = arith.constant 0 : index
    %c0_55 = arith.constant 0 : index
    %150 = vector.load %arg5[%c0_54, %c0_55] : memref<1x128xf32, #tpu.memory_space<vmem>>, vector<1x128xf32>
    %151 = vector.broadcast %150 : vector<1x128xf32> to vector<16x128xf32>
    %152 = arith.mulf %144, %151 : vector<16x128xf32>
    %cst_56 = arith.constant dense<0.000000e+00> : vector<16xf32>
    %153 = vector.multi_reduction <add>, %152, %cst_56 [1] : vector<16x128xf32> to vector<16xf32>
    %154 = vector.shape_cast %153 : vector<16xf32> to vector<16x1xf32>
    %c0_57 = arith.constant 0 : index
    %c0_58 = arith.constant 0 : index
    %155 = vector.load %arg6[%c0_57, %c0_58] : memref<1x1xf32, #tpu.memory_space<vmem>>, vector<1x1xf32>
    %156 = vector.broadcast %155 : vector<1x1xf32> to vector<16x1xf32>
    %157 = arith.addf %154, %156 : vector<16x1xf32>
    %158 = arith.index_cast %c2_i32 : i32 to index
    %c0_59 = arith.constant 0 : index
    %c0_60 = arith.constant 0 : index
    %159 = vector.load %arg12[%158, %c0_59, %c0_60] : memref<8x16x1xf32, #tpu.memory_space<vmem>>, vector<1x16x1xf32>
    %160 = vector.shape_cast %159 : vector<1x16x1xf32> to vector<16x1xf32>
    %161 = vector.shape_cast %157 : vector<16x1xf32> to vector<1x16x1xf32>
    tpu.vector_store %arg12[%158, %c0_59, %c0_60], %161 {strides = array<i32>} : memref<8x16x1xf32, #tpu.memory_space<vmem>>, vector<1x16x1xf32>,
    %c3_i32 = arith.constant 3 : i32
    %162 = arith.index_cast %c3_i32 : i32 to index
    %c0_61 = arith.constant 0 : index
    %c0_62 = arith.constant 0 : index
    %163 = vector.load %arg10[%162, %c0_61, %c0_62] : memref<8x16x512xbf16, #tpu.memory_space<vmem>>, vector<1x16x512xbf16>
    %164 = vector.shape_cast %163 : vector<1x16x512xbf16> to vector<16x512xbf16>
    %165 = arith.extf %164 : vector<16x512xbf16> to vector<16x512xf32>
    %166 = arith.truncf %144 : vector<16x128xf32> to vector<16x128xbf16>
    %c0_63 = arith.constant 0 : index
    %c0_64 = arith.constant 0 : index
    %167 = vector.load %arg3[%c0_63, %c0_64] : memref<128x512xbf16, #tpu.memory_space<vmem>>, vector<128x512xbf16>
    %cst_65 = arith.constant dense<0.000000e+00> : vector<16x512xf32>
    %168 = tpu.matmul %166, %167, %cst_65 {dimension_numbers = #tpu.dot_dimension_numbers<[1], [0], [0], [1], [0, 0, 1, 1], [], []>} : vector<16x128xbf16>, vector<128x512xbf16>, vector<16x512xf32> -> vector<16x512xf32>
    %169 = arith.addf %165, %168 : vector<16x512xf32>
    %170 = vector.extract_strided_slice %169 {offsets = [0, 0], sizes = [16, 128], strides = [1, 1]} : vector<16x512xf32> to vector<16x128xf32>
    %171 = arith.negf %170 : vector<16x128xf32>
    %172 = math.exp %171 : vector<16x128xf32>
    %cst_66 = arith.constant 1.000000e+00 : f32
    %173 = vector.broadcast %cst_66 : f32 to vector<16x128xf32>
    %174 = arith.addf %173, %172 : vector<16x128xf32>
    %175 = arith.divf %173, %174 : vector<16x128xf32>
    %176 = vector.extract_strided_slice %169 {offsets = [0, 128], sizes = [16, 128], strides = [1, 1]} : vector<16x512xf32> to vector<16x128xf32>
    %177 = arith.negf %176 : vector<16x128xf32>
    %178 = math.exp %177 : vector<16x128xf32>
    %cst_67 = arith.constant 1.000000e+00 : f32
    %179 = vector.broadcast %cst_67 : f32 to vector<16x128xf32>
    %180 = arith.addf %179, %178 : vector<16x128xf32>
    %181 = arith.divf %179, %180 : vector<16x128xf32>
    %182 = vector.extract_strided_slice %169 {offsets = [0, 256], sizes = [16, 128], strides = [1, 1]} : vector<16x512xf32> to vector<16x128xf32>
    %183 = math.tanh %182 : vector<16x128xf32>
    %184 = vector.extract_strided_slice %169 {offsets = [0, 384], sizes = [16, 128], strides = [1, 1]} : vector<16x512xf32> to vector<16x128xf32>
    %185 = arith.negf %184 : vector<16x128xf32>
    %186 = math.exp %185 : vector<16x128xf32>
    %cst_68 = arith.constant 1.000000e+00 : f32
    %187 = vector.broadcast %cst_68 : f32 to vector<16x128xf32>
    %188 = arith.addf %187, %186 : vector<16x128xf32>
    %189 = arith.divf %187, %188 : vector<16x128xf32>
    %190 = arith.mulf %181, %142 : vector<16x128xf32>
    %191 = arith.mulf %175, %183 : vector<16x128xf32>
    %192 = arith.addf %190, %191 : vector<16x128xf32>
    %193 = math.tanh %192 : vector<16x128xf32>
    %194 = arith.mulf %189, %193 : vector<16x128xf32>
    %195 = arith.truncf %194 : vector<16x128xf32> to vector<16x128xbf16>
    %196 = arith.index_cast %c3_i32 : i32 to index
    %c0_69 = arith.constant 0 : index
    %c0_70 = arith.constant 0 : index
    %197 = vector.load %arg11[%196, %c0_69, %c0_70] : memref<8x16x128xbf16, #tpu.memory_space<vmem>>, vector<1x16x128xbf16>
    %198 = vector.shape_cast %197 : vector<1x16x128xbf16> to vector<16x128xbf16>
    %199 = vector.shape_cast %195 : vector<16x128xbf16> to vector<1x16x128xbf16>
    tpu.vector_store %arg11[%196, %c0_69, %c0_70], %199 {strides = array<i32>} : memref<8x16x128xbf16, #tpu.memory_space<vmem>>, vector<1x16x128xbf16>,
    %c0_71 = arith.constant 0 : index
    %c0_72 = arith.constant 0 : index
    %200 = vector.load %arg5[%c0_71, %c0_72] : memref<1x128xf32, #tpu.memory_space<vmem>>, vector<1x128xf32>
    %201 = vector.broadcast %200 : vector<1x128xf32> to vector<16x128xf32>
    %202 = arith.mulf %194, %201 : vector<16x128xf32>
    %cst_73 = arith.constant dense<0.000000e+00> : vector<16xf32>
    %203 = vector.multi_reduction <add>, %202, %cst_73 [1] : vector<16x128xf32> to vector<16xf32>
    %204 = vector.shape_cast %203 : vector<16xf32> to vector<16x1xf32>
    %c0_74 = arith.constant 0 : index
    %c0_75 = arith.constant 0 : index
    %205 = vector.load %arg6[%c0_74, %c0_75] : memref<1x1xf32, #tpu.memory_space<vmem>>, vector<1x1xf32>
    %206 = vector.broadcast %205 : vector<1x1xf32> to vector<16x1xf32>
    %207 = arith.addf %204, %206 : vector<16x1xf32>
    %208 = arith.index_cast %c3_i32 : i32 to index
    %c0_76 = arith.constant 0 : index
    %c0_77 = arith.constant 0 : index
    %209 = vector.load %arg12[%208, %c0_76, %c0_77] : memref<8x16x1xf32, #tpu.memory_space<vmem>>, vector<1x16x1xf32>
    %210 = vector.shape_cast %209 : vector<1x16x1xf32> to vector<16x1xf32>
    %211 = vector.shape_cast %207 : vector<16x1xf32> to vector<1x16x1xf32>
    tpu.vector_store %arg12[%208, %c0_76, %c0_77], %211 {strides = array<i32>} : memref<8x16x1xf32, #tpu.memory_space<vmem>>, vector<1x16x1xf32>,
    %c4_i32 = arith.constant 4 : i32
    %212 = arith.index_cast %c4_i32 : i32 to index
    %c0_78 = arith.constant 0 : index
    %c0_79 = arith.constant 0 : index
    %213 = vector.load %arg10[%212, %c0_78, %c0_79] : memref<8x16x512xbf16, #tpu.memory_space<vmem>>, vector<1x16x512xbf16>
    %214 = vector.shape_cast %213 : vector<1x16x512xbf16> to vector<16x512xbf16>
    %215 = arith.extf %214 : vector<16x512xbf16> to vector<16x512xf32>
    %216 = arith.truncf %194 : vector<16x128xf32> to vector<16x128xbf16>
    %c0_80 = arith.constant 0 : index
    %c0_81 = arith.constant 0 : index
    %217 = vector.load %arg3[%c0_80, %c0_81] : memref<128x512xbf16, #tpu.memory_space<vmem>>, vector<128x512xbf16>
    %cst_82 = arith.constant dense<0.000000e+00> : vector<16x512xf32>
    %218 = tpu.matmul %216, %217, %cst_82 {dimension_numbers = #tpu.dot_dimension_numbers<[1], [0], [0], [1], [0, 0, 1, 1], [], []>} : vector<16x128xbf16>, vector<128x512xbf16>, vector<16x512xf32> -> vector<16x512xf32>
    %219 = arith.addf %215, %218 : vector<16x512xf32>
    %220 = vector.extract_strided_slice %219 {offsets = [0, 0], sizes = [16, 128], strides = [1, 1]} : vector<16x512xf32> to vector<16x128xf32>
    %221 = arith.negf %220 : vector<16x128xf32>
    %222 = math.exp %221 : vector<16x128xf32>
    %cst_83 = arith.constant 1.000000e+00 : f32
    %223 = vector.broadcast %cst_83 : f32 to vector<16x128xf32>
    %224 = arith.addf %223, %222 : vector<16x128xf32>
    %225 = arith.divf %223, %224 : vector<16x128xf32>
    %226 = vector.extract_strided_slice %219 {offsets = [0, 128], sizes = [16, 128], strides = [1, 1]} : vector<16x512xf32> to vector<16x128xf32>
    %227 = arith.negf %226 : vector<16x128xf32>
    %228 = math.exp %227 : vector<16x128xf32>
    %cst_84 = arith.constant 1.000000e+00 : f32
    %229 = vector.broadcast %cst_84 : f32 to vector<16x128xf32>
    %230 = arith.addf %229, %228 : vector<16x128xf32>
    %231 = arith.divf %229, %230 : vector<16x128xf32>
    %232 = vector.extract_strided_slice %219 {offsets = [0, 256], sizes = [16, 128], strides = [1, 1]} : vector<16x512xf32> to vector<16x128xf32>
    %233 = math.tanh %232 : vector<16x128xf32>
    %234 = vector.extract_strided_slice %219 {offsets = [0, 384], sizes = [16, 128], strides = [1, 1]} : vector<16x512xf32> to vector<16x128xf32>
    %235 = arith.negf %234 : vector<16x128xf32>
    %236 = math.exp %235 : vector<16x128xf32>
    %cst_85 = arith.constant 1.000000e+00 : f32
    %237 = vector.broadcast %cst_85 : f32 to vector<16x128xf32>
    %238 = arith.addf %237, %236 : vector<16x128xf32>
    %239 = arith.divf %237, %238 : vector<16x128xf32>
    %240 = arith.mulf %231, %192 : vector<16x128xf32>
    %241 = arith.mulf %225, %233 : vector<16x128xf32>
    %242 = arith.addf %240, %241 : vector<16x128xf32>
    %243 = math.tanh %242 : vector<16x128xf32>
    %244 = arith.mulf %239, %243 : vector<16x128xf32>
    %245 = arith.truncf %244 : vector<16x128xf32> to vector<16x128xbf16>
    %246 = arith.index_cast %c4_i32 : i32 to index
    %c0_86 = arith.constant 0 : index
    %c0_87 = arith.constant 0 : index
    %247 = vector.load %arg11[%246, %c0_86, %c0_87] : memref<8x16x128xbf16, #tpu.memory_space<vmem>>, vector<1x16x128xbf16>
    %248 = vector.shape_cast %247 : vector<1x16x128xbf16> to vector<16x128xbf16>
    %249 = vector.shape_cast %245 : vector<16x128xbf16> to vector<1x16x128xbf16>
    tpu.vector_store %arg11[%246, %c0_86, %c0_87], %249 {strides = array<i32>} : memref<8x16x128xbf16, #tpu.memory_space<vmem>>, vector<1x16x128xbf16>,
    %c0_88 = arith.constant 0 : index
    %c0_89 = arith.constant 0 : index
    %250 = vector.load %arg5[%c0_88, %c0_89] : memref<1x128xf32, #tpu.memory_space<vmem>>, vector<1x128xf32>
    %251 = vector.broadcast %250 : vector<1x128xf32> to vector<16x128xf32>
    %252 = arith.mulf %244, %251 : vector<16x128xf32>
    %cst_90 = arith.constant dense<0.000000e+00> : vector<16xf32>
    %253 = vector.multi_reduction <add>, %252, %cst_90 [1] : vector<16x128xf32> to vector<16xf32>
    %254 = vector.shape_cast %253 : vector<16xf32> to vector<16x1xf32>
    %c0_91 = arith.constant 0 : index
    %c0_92 = arith.constant 0 : index
    %255 = vector.load %arg6[%c0_91, %c0_92] : memref<1x1xf32, #tpu.memory_space<vmem>>, vector<1x1xf32>
    %256 = vector.broadcast %255 : vector<1x1xf32> to vector<16x1xf32>
    %257 = arith.addf %254, %256 : vector<16x1xf32>
    %258 = arith.index_cast %c4_i32 : i32 to index
    %c0_93 = arith.constant 0 : index
    %c0_94 = arith.constant 0 : index
    %259 = vector.load %arg12[%258, %c0_93, %c0_94] : memref<8x16x1xf32, #tpu.memory_space<vmem>>, vector<1x16x1xf32>
    %260 = vector.shape_cast %259 : vector<1x16x1xf32> to vector<16x1xf32>
    %261 = vector.shape_cast %257 : vector<16x1xf32> to vector<1x16x1xf32>
    tpu.vector_store %arg12[%258, %c0_93, %c0_94], %261 {strides = array<i32>} : memref<8x16x1xf32, #tpu.memory_space<vmem>>, vector<1x16x1xf32>,
    %c5_i32 = arith.constant 5 : i32
    %262 = arith.index_cast %c5_i32 : i32 to index
    %c0_95 = arith.constant 0 : index
    %c0_96 = arith.constant 0 : index
    %263 = vector.load %arg10[%262, %c0_95, %c0_96] : memref<8x16x512xbf16, #tpu.memory_space<vmem>>, vector<1x16x512xbf16>
    %264 = vector.shape_cast %263 : vector<1x16x512xbf16> to vector<16x512xbf16>
    %265 = arith.extf %264 : vector<16x512xbf16> to vector<16x512xf32>
    %266 = arith.truncf %244 : vector<16x128xf32> to vector<16x128xbf16>
    %c0_97 = arith.constant 0 : index
    %c0_98 = arith.constant 0 : index
    %267 = vector.load %arg3[%c0_97, %c0_98] : memref<128x512xbf16, #tpu.memory_space<vmem>>, vector<128x512xbf16>
    %cst_99 = arith.constant dense<0.000000e+00> : vector<16x512xf32>
    %268 = tpu.matmul %266, %267, %cst_99 {dimension_numbers = #tpu.dot_dimension_numbers<[1], [0], [0], [1], [0, 0, 1, 1], [], []>} : vector<16x128xbf16>, vector<128x512xbf16>, vector<16x512xf32> -> vector<16x512xf32>
    %269 = arith.addf %265, %268 : vector<16x512xf32>
    %270 = vector.extract_strided_slice %269 {offsets = [0, 0], sizes = [16, 128], strides = [1, 1]} : vector<16x512xf32> to vector<16x128xf32>
    %271 = arith.negf %270 : vector<16x128xf32>
    %272 = math.exp %271 : vector<16x128xf32>
    %cst_100 = arith.constant 1.000000e+00 : f32
    %273 = vector.broadcast %cst_100 : f32 to vector<16x128xf32>
    %274 = arith.addf %273, %272 : vector<16x128xf32>
    %275 = arith.divf %273, %274 : vector<16x128xf32>
    %276 = vector.extract_strided_slice %269 {offsets = [0, 128], sizes = [16, 128], strides = [1, 1]} : vector<16x512xf32> to vector<16x128xf32>
    %277 = arith.negf %276 : vector<16x128xf32>
    %278 = math.exp %277 : vector<16x128xf32>
    %cst_101 = arith.constant 1.000000e+00 : f32
    %279 = vector.broadcast %cst_101 : f32 to vector<16x128xf32>
    %280 = arith.addf %279, %278 : vector<16x128xf32>
    %281 = arith.divf %279, %280 : vector<16x128xf32>
    %282 = vector.extract_strided_slice %269 {offsets = [0, 256], sizes = [16, 128], strides = [1, 1]} : vector<16x512xf32> to vector<16x128xf32>
    %283 = math.tanh %282 : vector<16x128xf32>
    %284 = vector.extract_strided_slice %269 {offsets = [0, 384], sizes = [16, 128], strides = [1, 1]} : vector<16x512xf32> to vector<16x128xf32>
    %285 = arith.negf %284 : vector<16x128xf32>
    %286 = math.exp %285 : vector<16x128xf32>
    %cst_102 = arith.constant 1.000000e+00 : f32
    %287 = vector.broadcast %cst_102 : f32 to vector<16x128xf32>
    %288 = arith.addf %287, %286 : vector<16x128xf32>
    %289 = arith.divf %287, %288 : vector<16x128xf32>
    %290 = arith.mulf %281, %242 : vector<16x128xf32>
    %291 = arith.mulf %275, %283 : vector<16x128xf32>
    %292 = arith.addf %290, %291 : vector<16x128xf32>
    %293 = math.tanh %292 : vector<16x128xf32>
    %294 = arith.mulf %289, %293 : vector<16x128xf32>
    %295 = arith.truncf %294 : vector<16x128xf32> to vector<16x128xbf16>
    %296 = arith.index_cast %c5_i32 : i32 to index
    %c0_103 = arith.constant 0 : index
    %c0_104 = arith.constant 0 : index
    %297 = vector.load %arg11[%296, %c0_103, %c0_104] : memref<8x16x128xbf16, #tpu.memory_space<vmem>>, vector<1x16x128xbf16>
    %298 = vector.shape_cast %297 : vector<1x16x128xbf16> to vector<16x128xbf16>
    %299 = vector.shape_cast %295 : vector<16x128xbf16> to vector<1x16x128xbf16>
    tpu.vector_store %arg11[%296, %c0_103, %c0_104], %299 {strides = array<i32>} : memref<8x16x128xbf16, #tpu.memory_space<vmem>>, vector<1x16x128xbf16>,
    %c0_105 = arith.constant 0 : index
    %c0_106 = arith.constant 0 : index
    %300 = vector.load %arg5[%c0_105, %c0_106] : memref<1x128xf32, #tpu.memory_space<vmem>>, vector<1x128xf32>
    %301 = vector.broadcast %300 : vector<1x128xf32> to vector<16x128xf32>
    %302 = arith.mulf %294, %301 : vector<16x128xf32>
    %cst_107 = arith.constant dense<0.000000e+00> : vector<16xf32>
    %303 = vector.multi_reduction <add>, %302, %cst_107 [1] : vector<16x128xf32> to vector<16xf32>
    %304 = vector.shape_cast %303 : vector<16xf32> to vector<16x1xf32>
    %c0_108 = arith.constant 0 : index
    %c0_109 = arith.constant 0 : index
    %305 = vector.load %arg6[%c0_108, %c0_109] : memref<1x1xf32, #tpu.memory_space<vmem>>, vector<1x1xf32>
    %306 = vector.broadcast %305 : vector<1x1xf32> to vector<16x1xf32>
    %307 = arith.addf %304, %306 : vector<16x1xf32>
    %308 = arith.index_cast %c5_i32 : i32 to index
    %c0_110 = arith.constant 0 : index
    %c0_111 = arith.constant 0 : index
    %309 = vector.load %arg12[%308, %c0_110, %c0_111] : memref<8x16x1xf32, #tpu.memory_space<vmem>>, vector<1x16x1xf32>
    %310 = vector.shape_cast %309 : vector<1x16x1xf32> to vector<16x1xf32>
    %311 = vector.shape_cast %307 : vector<16x1xf32> to vector<1x16x1xf32>
    tpu.vector_store %arg12[%308, %c0_110, %c0_111], %311 {strides = array<i32>} : memref<8x16x1xf32, #tpu.memory_space<vmem>>, vector<1x16x1xf32>,
    %c6_i32 = arith.constant 6 : i32
    %312 = arith.index_cast %c6_i32 : i32 to index
    %c0_112 = arith.constant 0 : index
    %c0_113 = arith.constant 0 : index
    %313 = vector.load %arg10[%312, %c0_112, %c0_113] : memref<8x16x512xbf16, #tpu.memory_space<vmem>>, vector<1x16x512xbf16>
    %314 = vector.shape_cast %313 : vector<1x16x512xbf16> to vector<16x512xbf16>
    %315 = arith.extf %314 : vector<16x512xbf16> to vector<16x512xf32>
    %316 = arith.truncf %294 : vector<16x128xf32> to vector<16x128xbf16>
    %c0_114 = arith.constant 0 : index
    %c0_115 = arith.constant 0 : index
    %317 = vector.load %arg3[%c0_114, %c0_115] : memref<128x512xbf16, #tpu.memory_space<vmem>>, vector<128x512xbf16>
    %cst_116 = arith.constant dense<0.000000e+00> : vector<16x512xf32>
    %318 = tpu.matmul %316, %317, %cst_116 {dimension_numbers = #tpu.dot_dimension_numbers<[1], [0], [0], [1], [0, 0, 1, 1], [], []>} : vector<16x128xbf16>, vector<128x512xbf16>, vector<16x512xf32> -> vector<16x512xf32>
    %319 = arith.addf %315, %318 : vector<16x512xf32>
    %320 = vector.extract_strided_slice %319 {offsets = [0, 0], sizes = [16, 128], strides = [1, 1]} : vector<16x512xf32> to vector<16x128xf32>
    %321 = arith.negf %320 : vector<16x128xf32>
    %322 = math.exp %321 : vector<16x128xf32>
    %cst_117 = arith.constant 1.000000e+00 : f32
    %323 = vector.broadcast %cst_117 : f32 to vector<16x128xf32>
    %324 = arith.addf %323, %322 : vector<16x128xf32>
    %325 = arith.divf %323, %324 : vector<16x128xf32>
    %326 = vector.extract_strided_slice %319 {offsets = [0, 128], sizes = [16, 128], strides = [1, 1]} : vector<16x512xf32> to vector<16x128xf32>
    %327 = arith.negf %326 : vector<16x128xf32>
    %328 = math.exp %327 : vector<16x128xf32>
    %cst_118 = arith.constant 1.000000e+00 : f32
    %329 = vector.broadcast %cst_118 : f32 to vector<16x128xf32>
    %330 = arith.addf %329, %328 : vector<16x128xf32>
    %331 = arith.divf %329, %330 : vector<16x128xf32>
    %332 = vector.extract_strided_slice %319 {offsets = [0, 256], sizes = [16, 128], strides = [1, 1]} : vector<16x512xf32> to vector<16x128xf32>
    %333 = math.tanh %332 : vector<16x128xf32>
    %334 = vector.extract_strided_slice %319 {offsets = [0, 384], sizes = [16, 128], strides = [1, 1]} : vector<16x512xf32> to vector<16x128xf32>
    %335 = arith.negf %334 : vector<16x128xf32>
    %336 = math.exp %335 : vector<16x128xf32>
    %cst_119 = arith.constant 1.000000e+00 : f32
    %337 = vector.broadcast %cst_119 : f32 to vector<16x128xf32>
    %338 = arith.addf %337, %336 : vector<16x128xf32>
    %339 = arith.divf %337, %338 : vector<16x128xf32>
    %340 = arith.mulf %331, %292 : vector<16x128xf32>
    %341 = arith.mulf %325, %333 : vector<16x128xf32>
    %342 = arith.addf %340, %341 : vector<16x128xf32>
    %343 = math.tanh %342 : vector<16x128xf32>
    %344 = arith.mulf %339, %343 : vector<16x128xf32>
    %345 = arith.truncf %344 : vector<16x128xf32> to vector<16x128xbf16>
    %346 = arith.index_cast %c6_i32 : i32 to index
    %c0_120 = arith.constant 0 : index
    %c0_121 = arith.constant 0 : index
    %347 = vector.load %arg11[%346, %c0_120, %c0_121] : memref<8x16x128xbf16, #tpu.memory_space<vmem>>, vector<1x16x128xbf16>
    %348 = vector.shape_cast %347 : vector<1x16x128xbf16> to vector<16x128xbf16>
    %349 = vector.shape_cast %345 : vector<16x128xbf16> to vector<1x16x128xbf16>
    tpu.vector_store %arg11[%346, %c0_120, %c0_121], %349 {strides = array<i32>} : memref<8x16x128xbf16, #tpu.memory_space<vmem>>, vector<1x16x128xbf16>,
    %c0_122 = arith.constant 0 : index
    %c0_123 = arith.constant 0 : index
    %350 = vector.load %arg5[%c0_122, %c0_123] : memref<1x128xf32, #tpu.memory_space<vmem>>, vector<1x128xf32>
    %351 = vector.broadcast %350 : vector<1x128xf32> to vector<16x128xf32>
    %352 = arith.mulf %344, %351 : vector<16x128xf32>
    %cst_124 = arith.constant dense<0.000000e+00> : vector<16xf32>
    %353 = vector.multi_reduction <add>, %352, %cst_124 [1] : vector<16x128xf32> to vector<16xf32>
    %354 = vector.shape_cast %353 : vector<16xf32> to vector<16x1xf32>
    %c0_125 = arith.constant 0 : index
    %c0_126 = arith.constant 0 : index
    %355 = vector.load %arg6[%c0_125, %c0_126] : memref<1x1xf32, #tpu.memory_space<vmem>>, vector<1x1xf32>
    %356 = vector.broadcast %355 : vector<1x1xf32> to vector<16x1xf32>
    %357 = arith.addf %354, %356 : vector<16x1xf32>
    %358 = arith.index_cast %c6_i32 : i32 to index
    %c0_127 = arith.constant 0 : index
    %c0_128 = arith.constant 0 : index
    %359 = vector.load %arg12[%358, %c0_127, %c0_128] : memref<8x16x1xf32, #tpu.memory_space<vmem>>, vector<1x16x1xf32>
    %360 = vector.shape_cast %359 : vector<1x16x1xf32> to vector<16x1xf32>
    %361 = vector.shape_cast %357 : vector<16x1xf32> to vector<1x16x1xf32>
    tpu.vector_store %arg12[%358, %c0_127, %c0_128], %361 {strides = array<i32>} : memref<8x16x1xf32, #tpu.memory_space<vmem>>, vector<1x16x1xf32>,
    %c7_i32 = arith.constant 7 : i32
    %362 = arith.index_cast %c7_i32 : i32 to index
    %c0_129 = arith.constant 0 : index
    %c0_130 = arith.constant 0 : index
    %363 = vector.load %arg10[%362, %c0_129, %c0_130] : memref<8x16x512xbf16, #tpu.memory_space<vmem>>, vector<1x16x512xbf16>
    %364 = vector.shape_cast %363 : vector<1x16x512xbf16> to vector<16x512xbf16>
    %365 = arith.extf %364 : vector<16x512xbf16> to vector<16x512xf32>
    %366 = arith.truncf %344 : vector<16x128xf32> to vector<16x128xbf16>
    %c0_131 = arith.constant 0 : index
    %c0_132 = arith.constant 0 : index
    %367 = vector.load %arg3[%c0_131, %c0_132] : memref<128x512xbf16, #tpu.memory_space<vmem>>, vector<128x512xbf16>
    %cst_133 = arith.constant dense<0.000000e+00> : vector<16x512xf32>
    %368 = tpu.matmul %366, %367, %cst_133 {dimension_numbers = #tpu.dot_dimension_numbers<[1], [0], [0], [1], [0, 0, 1, 1], [], []>} : vector<16x128xbf16>, vector<128x512xbf16>, vector<16x512xf32> -> vector<16x512xf32>
    %369 = arith.addf %365, %368 : vector<16x512xf32>
    %370 = vector.extract_strided_slice %369 {offsets = [0, 0], sizes = [16, 128], strides = [1, 1]} : vector<16x512xf32> to vector<16x128xf32>
    %371 = arith.negf %370 : vector<16x128xf32>
    %372 = math.exp %371 : vector<16x128xf32>
    %cst_134 = arith.constant 1.000000e+00 : f32
    %373 = vector.broadcast %cst_134 : f32 to vector<16x128xf32>
    %374 = arith.addf %373, %372 : vector<16x128xf32>
    %375 = arith.divf %373, %374 : vector<16x128xf32>
    %376 = vector.extract_strided_slice %369 {offsets = [0, 128], sizes = [16, 128], strides = [1, 1]} : vector<16x512xf32> to vector<16x128xf32>
    %377 = arith.negf %376 : vector<16x128xf32>
    %378 = math.exp %377 : vector<16x128xf32>
    %cst_135 = arith.constant 1.000000e+00 : f32
    %379 = vector.broadcast %cst_135 : f32 to vector<16x128xf32>
    %380 = arith.addf %379, %378 : vector<16x128xf32>
    %381 = arith.divf %379, %380 : vector<16x128xf32>
    %382 = vector.extract_strided_slice %369 {offsets = [0, 256], sizes = [16, 128], strides = [1, 1]} : vector<16x512xf32> to vector<16x128xf32>
    %383 = math.tanh %382 : vector<16x128xf32>
    %384 = vector.extract_strided_slice %369 {offsets = [0, 384], sizes = [16, 128], strides = [1, 1]} : vector<16x512xf32> to vector<16x128xf32>
    %385 = arith.negf %384 : vector<16x128xf32>
    %386 = math.exp %385 : vector<16x128xf32>
    %cst_136 = arith.constant 1.000000e+00 : f32
    %387 = vector.broadcast %cst_136 : f32 to vector<16x128xf32>
    %388 = arith.addf %387, %386 : vector<16x128xf32>
    %389 = arith.divf %387, %388 : vector<16x128xf32>
    %390 = arith.mulf %381, %342 : vector<16x128xf32>
    %391 = arith.mulf %375, %383 : vector<16x128xf32>
    %392 = arith.addf %390, %391 : vector<16x128xf32>
    %393 = math.tanh %392 : vector<16x128xf32>
    %394 = arith.mulf %389, %393 : vector<16x128xf32>
    %395 = arith.truncf %394 : vector<16x128xf32> to vector<16x128xbf16>
    %396 = arith.index_cast %c7_i32 : i32 to index
    %c0_137 = arith.constant 0 : index
    %c0_138 = arith.constant 0 : index
    %397 = vector.load %arg11[%396, %c0_137, %c0_138] : memref<8x16x128xbf16, #tpu.memory_space<vmem>>, vector<1x16x128xbf16>
    %398 = vector.shape_cast %397 : vector<1x16x128xbf16> to vector<16x128xbf16>
    %399 = vector.shape_cast %395 : vector<16x128xbf16> to vector<1x16x128xbf16>
    tpu.vector_store %arg11[%396, %c0_137, %c0_138], %399 {strides = array<i32>} : memref<8x16x128xbf16, #tpu.memory_space<vmem>>, vector<1x16x128xbf16>,
    %c0_139 = arith.constant 0 : index
    %c0_140 = arith.constant 0 : index
    %400 = vector.load %arg5[%c0_139, %c0_140] : memref<1x128xf32, #tpu.memory_space<vmem>>, vector<1x128xf32>
    %401 = vector.broadcast %400 : vector<1x128xf32> to vector<16x128xf32>
    %402 = arith.mulf %394, %401 : vector<16x128xf32>
    %cst_141 = arith.constant dense<0.000000e+00> : vector<16xf32>
    %403 = vector.multi_reduction <add>, %402, %cst_141 [1] : vector<16x128xf32> to vector<16xf32>
    %404 = vector.shape_cast %403 : vector<16xf32> to vector<16x1xf32>
    %c0_142 = arith.constant 0 : index
    %c0_143 = arith.constant 0 : index
    %405 = vector.load %arg6[%c0_142, %c0_143] : memref<1x1xf32, #tpu.memory_space<vmem>>, vector<1x1xf32>
    %406 = vector.broadcast %405 : vector<1x1xf32> to vector<16x1xf32>
    %407 = arith.addf %404, %406 : vector<16x1xf32>
    %408 = arith.index_cast %c7_i32 : i32 to index
    %c0_144 = arith.constant 0 : index
    %c0_145 = arith.constant 0 : index
    %409 = vector.load %arg12[%408, %c0_144, %c0_145] : memref<8x16x1xf32, #tpu.memory_space<vmem>>, vector<1x16x1xf32>
    %410 = vector.shape_cast %409 : vector<1x16x1xf32> to vector<16x1xf32>
    %411 = vector.shape_cast %407 : vector<16x1xf32> to vector<1x16x1xf32>
    tpu.vector_store %arg12[%408, %c0_144, %c0_145], %411 {strides = array<i32>} : memref<8x16x1xf32, #tpu.memory_space<vmem>>, vector<1x16x1xf32>,
    %c8_i32 = arith.constant 8 : i32
    %c0_146 = arith.constant 0 : index
    %c0_147 = arith.constant 0 : index
    %c0_148 = arith.constant 0 : index
    %412 = vector.load %arg12[%c0_146, %c0_147, %c0_148] : memref<8x16x1xf32, #tpu.memory_space<vmem>>, vector<8x16x1xf32>
    %cst_149 = arith.constant dense<0xFF800000> : vector<16x1xf32>
    %413 = vector.multi_reduction <maximumf>, %412, %cst_149 [0] : vector<8x16x1xf32> to vector<16x1xf32>
    %414 = vector.shape_cast %413 : vector<16x1xf32> to vector<1x16x1xf32>
    %415 = vector.broadcast %414 : vector<1x16x1xf32> to vector<8x16x1xf32>
    %416 = arith.subf %412, %415 : vector<8x16x1xf32>
    %417 = math.exp %416 : vector<8x16x1xf32>
    %cst_150 = arith.constant dense<0.000000e+00> : vector<16x1xf32>
    %418 = vector.multi_reduction <add>, %417, %cst_150 [0] : vector<8x16x1xf32> to vector<16x1xf32>
    %419 = vector.shape_cast %418 : vector<16x1xf32> to vector<1x16x1xf32>
    %420 = tpu.reciprocal %419 {approx = true} : vector<1x16x1xf32> -> vector<1x16x1xf32>
    %421 = vector.broadcast %420 : vector<1x16x1xf32> to vector<8x16x1xf32>
    %422 = arith.mulf %417, %421 : vector<8x16x1xf32>
    %c0_151 = arith.constant 0 : index
    %c0_152 = arith.constant 0 : index
    %c0_153 = arith.constant 0 : index
    %423 = vector.load %arg11[%c0_151, %c0_152, %c0_153] : memref<8x16x128xbf16, #tpu.memory_space<vmem>>, vector<8x16x128xbf16>
    %424 = arith.extf %423 : vector<8x16x128xbf16> to vector<8x16x128xf32>
    %425 = vector.broadcast %422 : vector<8x16x1xf32> to vector<8x16x128xf32>
    %426 = arith.mulf %424, %425 : vector<8x16x128xf32>
    %cst_154 = arith.constant dense<0.000000e+00> : vector<16x128xf32>
    %427 = vector.multi_reduction <add>, %426, %cst_154 [0] : vector<8x16x128xf32> to vector<16x128xf32>
    %428 = arith.truncf %427 : vector<16x128xf32> to vector<16x128xbf16>
    %c0_155 = arith.constant 0 : index
    %c0_156 = arith.constant 0 : index
    %429 = vector.load %arg7[%c0_155, %c0_156] : memref<128x128xbf16, #tpu.memory_space<vmem>>, vector<128x128xbf16>
    %cst_157 = arith.constant dense<0.000000e+00> : vector<16x128xf32>
    %430 = tpu.matmul %428, %429, %cst_157 {dimension_numbers = #tpu.dot_dimension_numbers<[1], [0], [0], [1], [0, 0, 1, 1], [], []>} : vector<16x128xbf16>, vector<128x128xbf16>, vector<16x128xf32> -> vector<16x128xf32>
    %c0_158 = arith.constant 0 : index
    %c0_159 = arith.constant 0 : index
    %431 = vector.load %arg8[%c0_158, %c0_159] : memref<1x128xf32, #tpu.memory_space<vmem>>, vector<1x128xf32>
    %432 = vector.broadcast %431 : vector<1x128xf32> to vector<16x128xf32>
    %433 = arith.addf %430, %432 : vector<16x128xf32>
    %c0_160 = arith.constant 0 : index
    %c0_161 = arith.constant 0 : index
    %434 = vector.load %arg9[%c0_160, %c0_161] : memref<16x128xf32, #tpu.memory_space<vmem>>, vector<16x128xf32>
    tpu.vector_store %arg9[%c0_160, %c0_161], %433 {strides = array<i32>} : memref<16x128xf32, #tpu.memory_space<vmem>>, vector<16x128xf32>,
    return
  }
  func.func @transform_0(%arg0: i32) -> (i32, i32, i32) {
    %c0_i32 = arith.constant 0 : i32
    %c0_i32_0 = arith.constant 0 : i32
    %c0_i32_1 = arith.constant 0 : i32
    return %c0_i32, %arg0, %c0_i32_0 : i32, i32, i32
  }
  func.func @transform_1(%arg0: i32) -> (i32, i32) {
    %c0_i32 = arith.constant 0 : i32
    %c0_i32_0 = arith.constant 0 : i32
    %c0_i32_1 = arith.constant 0 : i32
    return %c0_i32, %c0_i32_0 : i32, i32
  }
  func.func @transform_2(%arg0: i32) -> (i32, i32) {
    %c0_i32 = arith.constant 0 : i32
    %c0_i32_0 = arith.constant 0 : i32
    %c0_i32_1 = arith.constant 0 : i32
    return %c0_i32, %c0_i32_0 : i32, i32
  }
  func.func @transform_3(%arg0: i32) -> (i32, i32) {
    %c0_i32 = arith.constant 0 : i32
    %c0_i32_0 = arith.constant 0 : i32
    %c0_i32_1 = arith.constant 0 : i32
    return %c0_i32, %c0_i32_0 : i32, i32
  }
  func.func @transform_4(%arg0: i32) -> (i32, i32) {
    %c0_i32 = arith.constant 0 : i32
    %c0_i32_0 = arith.constant 0 : i32
    %c0_i32_1 = arith.constant 0 : i32
    return %c0_i32, %c0_i32_0 : i32, i32
  }
  func.func @transform_5(%arg0: i32) -> (i32, i32) {
    %c0_i32 = arith.constant 0 : i32
    %c0_i32_0 = arith.constant 0 : i32
    %c0_i32_1 = arith.constant 0 : i32
    return %c0_i32, %c0_i32_0 : i32, i32
  }
  func.func @transform_6(%arg0: i32) -> (i32, i32) {
    %c0_i32 = arith.constant 0 : i32
    %c0_i32_0 = arith.constant 0 : i32
    %c0_i32_1 = arith.constant 0 : i32
    return %c0_i32, %c0_i32_0 : i32, i32
  }
  func.func @transform_7(%arg0: i32) -> (i32, i32) {
    %c0_i32 = arith.constant 0 : i32
    %c0_i32_0 = arith.constant 0 : i32
    %c0_i32_1 = arith.constant 0 : i32
    return %c0_i32, %c0_i32_0 : i32, i32
  }
  func.func @transform_8(%arg0: i32) -> (i32, i32) {
    %c0_i32 = arith.constant 0 : i32
    %c0_i32_0 = arith.constant 0 : i32
    return %arg0, %c0_i32 : i32, i32
  }
}

</mosaic_0001>

<bundles_post_ra>
// kernel: tpu_custom_call.1
= control target key start
LH: loop header
LB: loop body
LE: loop exit
PB: predicated region body
PF: predicated region fallthrough
CT: control target
= control target key end

     0   :  { %s5839_s0 = inlined_call_operand.vmem [shape: f32[8,16,5], index: 0, kind: input, shape index: {}]   ;;  %s5840_s1 = inlined_call_operand.vmem [shape: bf16[5,512], index: 1, kind: input, shape index: {}]   ;;  %s5841_s2 = inlined_call_operand.hbm [shape: bf16[128,512], index: 2, kind: input, shape index: {}]   ;;  %s5842_s3 = inlined_call_operand.vmem [shape: f32[1,512], index: 3, kind: input, shape index: {}]   ;;  %s5843_s4 = inlined_call_operand.vmem [shape: f32[1,128], index: 4, kind: input, shape index: {}]   ;;  %s5844_s5 = inlined_call_operand.<no memory space> [shape: f32[1,1], index: 5, kind: input, shape index: {}]   ;;  %s5845_s6 = inlined_call_operand.vmem [shape: bf16[128,128], index: 6, kind: input, shape index: {}]   ;;  %s5846_s7 = inlined_call_operand.vmem [shape: f32[1,128], index: 7, kind: input, shape index: {}]   ;;  %s5847_s8 = inlined_call_operand.hbm [shape: f32[16,128], index: 8, kind: output, shape index: {}]  }
   0x1   :  { %v13_v0 = vstv %s5844_s5 }
   0x2   :  { %14 = vst [vmem:[#allocation5] sm:$0x1] %v13_v0 }
   0x3   :  { %15 = vsyncpa [#allocation7], 0 }
   0x4   :  { %16 = vsyncpa [#allocation8], 0  ;;  %s4730_s29 = smov [#allocation6]   ;;  %s4682_s11 = scalar_lea.hbm %s5841_s2, 4096 }
   0x5   :  { %s26_s30 = sshll.u32 %s4730_s29, 4  ;;  %p4683_p0 = scmp.ne.s32.totalorder %s5841_s2, %s4682_s11  ;;  %s27_s30 = int_to_ptr.vmem [resolvable:$true] %s26_s30 }
   0x6   :  { %p4686_p1 = scmp.lt.u32.totalorder %s4682_s11, %s5841_s2 }
   0x8   :  { %p4688_p2 = pnand %p4686_p1, %p4683_p0 }
   0xa   :  { %4691 = shalt.err (!%p4688_p2)
}
   0xb   :  { %s4692_s5 = scalar_lea.vmem %s27_s30, 4096  ;;  %p4697_p4 = scmp.lt.s32.totalorder %s27_s30, %s27_s30 }
   0xc   :  { %p4693_p3 = scmp.ne.s32.totalorder %s27_s30, %s4692_s5  ;;  %p4698_p5 = scmp.lt.s32.totalorder %s4692_s5, %s4692_s5 }
   0xe   :  { %p4699_p6 = por %p4698_p5, %p4697_p4 }
  0x10   :  { %p4700_p7 = pnand %p4699_p6, %p4693_p3 }
  0x12   :  { %4703 = shalt.err (!%p4700_p7)
}
  0x13   :  { %s4731_s16 = smov 256   ;;  %s4732_s17 = smov 16  }
  0x14   :  { %32 = dma.hbm_to_vmem [thread:$0]  %s5841_s2, 4096, %s27_s30, [#allocation7], %s4731_s16, %s4731_s16, %s4732_s17  }
  0x15   :  { %4726 = dma.done.wait [#allocation7], 4096  }
  0x16   :  { %4727 = vsyncadd [#allocation7], 4294963200  ;;  %vm130_vm0 = vcmask 1041408   ;;  %v5848_v1 = vmov 0   ;;  %vm131_vm1 = vcmask 1042432   ;;  %v4734_v2 = vmov 65535  }
  0x17   :  { %178 = vmatprep.mubr.bf16.mxu0 %v5848_v1  ;;  %238 = vmatprep.mubr.bf16.mxu1 %v5848_v1  ;;  %v132_v3 = vsel %vm130_vm0, 4294967295, %v4734_v2  ;;  %v71_v4 = vld [vmem:[%s5840_s1] sm:$0x77]  ;;  %v72_v9 = vld [vmem:[%s5840_s1 + $0x8] sm:$0x77]  ;;  %vm105_vm2 = vcmask 39936  }
  0x18   :  { %4233 = vset.pattern.permute.xlu1 %v5848_v1  ;;  %4232 = vset.pattern.permute.xlu0 %v5848_v1  ;;  %v133_v5 = vsel %vm131_vm1, %v132_v3, 0  ;;  %v3843_v6 = vcombine.high %v71_v4, %v71_v4  ;;  %v3842_v7 = vcombine.low %v71_v4, %v71_v4  ;;  %v47_v8 = vld [vmem:[%s5839_s0] sm:$0xff]  ;;  %v48_v10 = vld [vmem:[%s5839_s0 + $0x8] sm:$0xff]  ;;  %v3844_v13 = vcombine.low %v72_v9, %v72_v9  ;;  %v49_v23 = vld [vmem:[%s5839_s0 + $0x10] sm:$0xff]  ;;  %s4737_s27 = smov [#allocation9]  }
  0x19   :  { %v59_v11 = vld [vmem:[%s5839_s0 + $0x60] sm:$0xff]  ;;  %v60_v12 = vld [vmem:[%s5839_s0 + $0x68] sm:$0xff]  ;;  %v3845_v14 = vcombine.high %v72_v9, %v72_v9  ;;  %v63_v18 = vpack.c.bf16 %v48_v10, %v47_v8  ;;  %v50_v24 = vld [vmem:[%s5839_s0 + $0x18] sm:$0xff]  ;;  %v75_v8 = vlaneseq  ;;  %vm806_vm3 = vcmask 7168   ;;  %s3830_s28 = sshll.u32 %s4737_s27, 4  ;;  %s3831_s28 = int_to_ptr.vmem [resolvable:$true] %s3830_s28 }
  0x1a   :  { %v138_v15 = vand.u32 %v3843_v6, %v133_v5  ;;  %v135_v16 = vand.u32 %v3842_v7, %v133_v5  ;;  %v4822_v19 = vpack.c.bf16 %v60_v12, %v59_v11  ;;  %v4824_v20 = vld [vmem:[#allocation6 + $0x4] ss:$16 sps:$4 sm:$0xff]   ;;  %v141_v21 = vand.u32 %v3844_v13, %v133_v5  ;;  %v4827_v22 = vld [vmem:[#allocation6 + $0xc] ss:$16 sps:$4 sm:$0xff]   ;;  %v4835_v25 = vld [vmem:[#allocation6] ss:$16 sps:$4 sm:$0xff]   ;;  %p4709_p9 = scmp.lt.s32.totalorder %s3831_s28, %s3831_s28 }
  0x1b   :  { %v144_v17 = vand.u32 %v3845_v14, %v133_v5  ;;  %v61_v26 = vld [vmem:[%s5839_s0 + $0x70] sm:$0xff]  ;;  %v62_v28 = vld [vmem:[%s5839_s0 + $0x78] sm:$0xff]  ;;  %v64_v30 = vpack.c.bf16 %v50_v24, %v49_v23  ;;  %v51_v34 = vld [vmem:[%s5839_s0 + $0x20] sm:$0xff]  ;;  %v76_v9 = vshrl.u32 %v75_v8, 7  ;;  %vm4736_vm4 = vmmov 0   ;;  %s4704_s29 = scalar_lea.vmem %s3831_s28, 256 }
  0x1c   :  { %146 = vmatprep.subr.bf16.mxu0 %v138_v15  ;;  %4220 = vmatprep.subr.bf16.mxu1 %v138_v15  ;;  %v4843_v27 = vld [vmem:[#allocation6 + $0x24] ss:$16 sps:$4 sm:$0xff]   ;;  %v4852_v29 = vld [vmem:[#allocation6 + $0x20] ss:$16 sps:$4 sm:$0xff]   ;;  %v4854_v31 = vpack.c.bf16 %v62_v28, %v61_v26  ;;  %v4880_v39 = vld [vmem:[#allocation6 + $0x8] ss:$16 sps:$4 sm:$0xff]   ;;  %p4705_p8 = scmp.ne.s32.totalorder %s3831_s28, %s4704_s29  ;;  %p4710_p10 = scmp.lt.s32.totalorder %s4704_s29, %s4704_s29 }
  0x1d   :  { %147 = vmatpush1.bf16.msra.mxu0 %v135_v16  ;;  %4221 = vmatpush1.bf16.msra.mxu1 %v135_v16  ;;  %v4857_v32 = vld [vmem:[#allocation6 + $0x44] ss:$16 sps:$4 sm:$0xff]   ;;  %v4860_v33 = vld [vmem:[#allocation6 + $0x40] ss:$16 sps:$4 sm:$0xff]   ;;  %v4882_v40 = vld [vmem:[#allocation6 + $0x2c] ss:$16 sps:$4 sm:$0xff]  }
  0x1e   :  { %259 = vmatprep.subr.bf16.mxu1 %v144_v17  ;;  %640 = vmatprep.subr.bf16.mxu0 %v4824_v20  ;;  %v4868_v35 = vld [vmem:[#allocation6 + $0x64] ss:$16 sps:$4 sm:$0xff]   ;;  %v4877_v37 = vld [vmem:[#allocation6 + $0x60] ss:$16 sps:$4 sm:$0xff]   ;;  %v4895_v44 = vld [vmem:[#allocation6 + $0x28] ss:$16 sps:$4 sm:$0xff]   ;;  %p4711_p11 = por %p4710_p10, %p4709_p9 }
  0x1f   :  { %v52_v36 = vld [vmem:[%s5839_s0 + $0x28] sm:$0xff]  ;;  %v53_v41 = vld [vmem:[%s5839_s0 + $0x30] sm:$0xff]  ;;  %v54_v42 = vld [vmem:[%s5839_s0 + $0x38] sm:$0xff]  ;;  %v77_v10 = vsub.s32 0, %v76_v9  ;;  %v81_v12 = vsub.s32 1, %v76_v9 }
  0x20   :  { %3846 = vmatmul.mubr.msk.bf16.vlgmr.msra.gmra.mrb[0].mxu0 %vm105_vm2, %v63_v18  ;;  %3852 = vmatmul.mubr.msk.bf16.vlgmr.msra.gmra.mrb[0].mxu1 %vm105_vm2, %v4822_v19  ;;  %v65_v38 = vpack.c.bf16 %v52_v36, %v51_v34  ;;  %v4891_v43 = vld [vmem:[#allocation6 + $0x84] ss:$16 sps:$4 sm:$0xff]   ;;  %v4897_v45 = vld [vmem:[#allocation6 + $0x80] ss:$16 sps:$4 sm:$0xff]   ;;  %v4905_v47 = vld [vmem:[#allocation6 + $0x4c] ss:$16 sps:$4 sm:$0xff]   ;;  %v66_v48 = vpack.c.bf16 %v54_v42, %v53_v41  ;;  %p4712_p12 = pnand %p4711_p11, %p4705_p8 }
  0x21   :  { %260 = vmatpush1.bf16.msra.mxu1 %v141_v21  ;;  %188 = vmatprep.mubr.bf16.mxu0 %v5848_v1  ;;  %v4901_v46 = vld [vmem:[#allocation6 + $0xa4] ss:$16 sps:$4 sm:$0xff]   ;;  %v4908_v49 = vld [vmem:[#allocation6 + $0x48] ss:$16 sps:$4 sm:$0xff]   ;;  %v4911_v50 = vld [vmem:[#allocation6 + $0xa0] ss:$16 sps:$4 sm:$0xff]  }
  0x22   :  { %248 = vmatprep.mubr.bf16.mxu1 %v5848_v1  ;;  %683 = vmatprep.subr.bf16.mxu1 %v4827_v22  ;;  %v4915_v51 = vld [vmem:[#allocation6 + $0xc4] ss:$16 sps:$4 sm:$0xff]   ;;  %v4917_v52 = vld [vmem:[#allocation6 + $0x6c] ss:$16 sps:$4 sm:$0xff]   ;;  %v4928_v55 = vld [vmem:[#allocation6 + $0xc0] ss:$16 sps:$4 sm:$0xff]  }
  0x23   :  { %641 = vmatpush1.bf16.msra.mxu0 %v4835_v25  ;;  %v55_v53 = vld [vmem:[%s5839_s0 + $0x40] sm:$0xff]  ;;  %v56_v54 = vld [vmem:[%s5839_s0 + $0x48] sm:$0xff]  ;;  %v57_v63 = vld [vmem:[%s5839_s0 + $0x50] sm:$0xff] }
  0x24   :  { %642 = vmatprep.subr.bf16.mxu0 %v4843_v27  ;;  %v4930_v56 = vld [vmem:[#allocation6 + $0x68] ss:$16 sps:$4 sm:$0xff]   ;;  %v4273_v57 = vld [vmem:[#allocation6 + $0xe4] ss:$16 sps:$4 sm:$0xff]   ;;  %v4934_v58 = vld [vmem:[#allocation6 + $0x8c] ss:$16 sps:$4 sm:$0xff]   ;;  %v67_v59 = vpack.c.bf16 %v56_v54, %v55_v53 }
  0x25   :  { %v4271_v60 = vld [vmem:[#allocation6 + $0xe0] ss:$16 sps:$4 sm:$0xff]   ;;  %v4940_v61 = vld [vmem:[#allocation6 + $0x88] ss:$16 sps:$4 sm:$0xff]   ;;  %v4942_v62 = vld [vmem:[#allocation6 + $0xac] ss:$16 sps:$4 sm:$0xff]  }
  0x26   :  { %v58_v0 = vld [vmem:[%s5839_s0 + $0x58] sm:$0xff]  ;;  %v73_v11 = vld [vmem:[%s5842_s3] sm:$0xf]  ;;  %v89_v54 = vsub.s32 3, %v76_v9 }
  0x27   :  { %643 = vmatpush1.bf16.msra.mxu0 %v4852_v29  ;;  %v4955_v2 = vld [vmem:[#allocation6 + $0xa8] ss:$16 sps:$4 sm:$0xff]   ;;  %v4959_v3 = vld [vmem:[#allocation6 + $0xcc] ss:$16 sps:$4 sm:$0xff]   ;;  %v68_v4 = vpack.c.bf16 %v58_v0, %v57_v63  ;;  %v5025_v13 = vrot.slane %v73_v11, %v77_v10  ;;  %v5027_v14 = vrot.slane %v73_v11, %v81_v12 }
  0x28   :  { %3847 = vmatmul.mubr.msk.bf16.gmra.mrb[4].mxu0 %vm105_vm2, %v64_v30  ;;  %3853 = vmatmul.mubr.msk.bf16.gmra.mrb[4].mxu1 %vm105_vm2, %v4854_v31  ;;  %v4964_v5 = vld [vmem:[#allocation6 + $0xc8] ss:$16 sps:$4 sm:$0xff]   ;;  %v4966_v6 = vld [vmem:[#allocation6 + $0xec] ss:$16 sps:$4 sm:$0xff]   ;;  %v5063_v8 = vrot.slane %v73_v11, %v89_v54 }
  0x29   :  { %198 = vmatprep.mubr.bf16.mxu0 %v5848_v1  ;;  %291 = vmatprep.mubr.bf16.mxu1 %v5848_v1  ;;  %v4972_v7 = vld [vmem:[#allocation6 + $0xe8] ss:$16 sps:$4 sm:$0xff]  }
  0x2a   :  { %644 = vmatprep.subr.bf16.mxu0 %v4857_v32 }
  0x2b   :  { %645 = vmatpush1.bf16.msra.mxu0 %v4860_v33 }
  0x2c   :  { %646 = vmatprep.subr.bf16.mxu0 %v4868_v35 }
  0x2f   :  { %647 = vmatpush1.bf16.msra.mxu0 %v4877_v37 }
  0x30   :  { %3848 = vmatmul.mubr.msk.bf16.gmra.mrb[8].mxu0 %vm105_vm2, %v65_v38  ;;  %3854 = vmatmul.mubr.msk.bf16.vlgmr.msra.gmra.mrb[8].mxu1 %vm105_vm2, %v63_v18 }
  0x31   :  { %684 = vmatpush1.bf16.msra.mxu1 %v4880_v39  ;;  %208 = vmatprep.mubr.bf16.mxu0 %v5848_v1 }
  0x32   :  { %301 = vmatprep.mubr.bf16.mxu1 %v5848_v1  ;;  %685 = vmatprep.subr.bf16.mxu1 %v4882_v40 }
  0x33   :  { %648 = vmatprep.subr.bf16.mxu0 %v4891_v43 }
  0x34   :  { %649 = vmatpush1.bf16.msra.mxu0 %v4897_v45 }
  0x35   :  { %686 = vmatpush1.bf16.msra.mxu1 %v4895_v44  ;;  %650 = vmatprep.subr.bf16.mxu0 %v4901_v46 }
  0x36   :  { %687 = vmatprep.subr.bf16.mxu1 %v4905_v47 }
  0x38   :  { %3849 = vmatmul.mubr.msk.bf16.gmra.mrb[12].mxu0 %vm105_vm2, %v66_v48  ;;  %3855 = vmatmul.mubr.msk.bf16.gmra.mrb[12].mxu1 %vm105_vm2, %v64_v30 }
  0x39   :  { %218 = vmatprep.mubr.bf16.mxu0 %v5848_v1  ;;  %311 = vmatprep.mubr.bf16.mxu1 %v5848_v1 }
  0x3a   :  { %688 = vmatpush1.bf16.msra.mxu1 %v4908_v49  ;;  %651 = vmatpush1.bf16.msra.mxu0 %v4911_v50 }
  0x3b   :  { %652 = vmatprep.subr.bf16.mxu0 %v4915_v51  ;;  %689 = vmatprep.subr.bf16.mxu1 %v4917_v52 }
  0x3e   :  { %653 = vmatpush1.bf16.msra.mxu0 %v4928_v55  ;;  %690 = vmatpush1.bf16.msra.mxu1 %v4930_v56 }
  0x3f   :  { %654 = vmatprep.subr.bf16.mxu0 %v4273_v57  ;;  %691 = vmatprep.subr.bf16.mxu1 %v4934_v58 }
  0x40   :  { %3850 = vmatmul.mubr.msk.bf16.gmra.mrb[16].mxu0 %vm105_vm2, %v67_v59  ;;  %3856 = vmatmul.mubr.msk.bf16.gmra.mrb[16].mxu1 %vm105_vm2, %v65_v38 }
  0x41   :  { %228 = vmatprep.mubr.bf16.mxu0 %v5848_v1  ;;  %321 = vmatprep.mubr.bf16.mxu1 %v5848_v1 }
  0x42   :  { %655 = vmatpush1.bf16.msra.mxu0 %v4271_v60  ;;  %692 = vmatpush1.bf16.msra.mxu1 %v4940_v61 }
  0x43   :  { %693 = vmatprep.subr.bf16.mxu1 %v4942_v62  ;;  %1014 = vmatprep.subr.bf16.mxu0 %v4824_v20 }
  0x46   :  { %694 = vmatpush1.bf16.msra.mxu1 %v4955_v2 }
  0x47   :  { %695 = vmatprep.subr.bf16.mxu1 %v4959_v3 }
  0x48   :  { %3851 = vmatmul.mubr.msk.bf16.gmra.mrb[20].mxu0 %vm105_vm2, %v68_v4  ;;  %3857 = vmatmul.mubr.msk.bf16.gmra.mrb[20].mxu1 %vm105_vm2, %v66_v48  ;;  %v85_v48 = vsub.s32 2, %v76_v9 }
  0x49   :  { %331 = vmatprep.mubr.bf16.mxu1 %v5848_v1  ;;  %672 = vmatprep.mubr.bf16.mxu0 %v5848_v1 }
  0x4a   :  { %696 = vmatpush1.bf16.msra.mxu1 %v4964_v5  ;;  %v5061_v0 = vrot.slane %v73_v11, %v85_v48 }
  0x4b   :  { %697 = vmatprep.subr.bf16.mxu1 %v4966_v6 }
  0x4e   :  { %698 = vmatpush1.bf16.msra.mxu1 %v4972_v7 }
  0x4f   :  { %1057 = vmatprep.subr.bf16.mxu1 %v4827_v22 }
  0x50   :  { %3858 = vmatmul.mubr.msk.bf16.gmra.mrb[24].mxu1 %vm105_vm2, %v67_v59  ;;  %673 = vmatmul.mubr.bf16.vlgmr.msra.gmra.mrb[24].mxu0 %v5848_v1 }
  0x51   :  { %341 = vmatprep.mubr.bf16.mxu1 %v5848_v1  ;;  %1015 = vmatpush1.bf16.msra.mxu0 %v4835_v25 }
  0x52   :  { %1016 = vmatprep.subr.bf16.mxu0 %v4843_v27  ;;  %1046 = vmatprep.mubr.bf16.mxu0 %v5848_v1 }
  0x55   :  { %1017 = vmatpush1.bf16.msra.mxu0 %v4852_v29 }
  0x56   :  { %1018 = vmatprep.subr.bf16.mxu0 %v4857_v32 }
  0x58   :  { %3859 = vmatmul.mubr.msk.bf16.gmra.mrb[28].mxu1 %vm105_vm2, %v68_v4 }
  0x59   :  { %351 = vmatprep.mubr.bf16.mxu1 %v5848_v1  ;;  %1019 = vmatpush1.bf16.msra.mxu0 %v4860_v33 }
  0x5a   :  { %1020 = vmatprep.subr.bf16.mxu0 %v4868_v35 }
  0x5d   :  { %1021 = vmatpush1.bf16.msra.mxu0 %v4877_v37 }
  0x5e   :  { %1022 = vmatprep.subr.bf16.mxu0 %v4891_v43 }
  0x60   :  { %3860 = vmatmul.mubr.msk.bf16.gmra.mrb[32].mxu1 %vm105_vm2, %v4822_v19 }
  0x61   :  { %361 = vmatprep.mubr.bf16.mxu1 %v5848_v1  ;;  %1023 = vmatpush1.bf16.msra.mxu0 %v4897_v45 }
  0x62   :  { %1024 = vmatprep.subr.bf16.mxu0 %v4901_v46 }
  0x65   :  { %1025 = vmatpush1.bf16.msra.mxu0 %v4911_v50 }
  0x66   :  { %1026 = vmatprep.subr.bf16.mxu0 %v4915_v51 }
  0x68   :  { %3861 = vmatmul.mubr.msk.bf16.gmra.mrb[36].mxu1 %vm105_vm2, %v4854_v31 }
  0x69   :  { %715 = vmatprep.mubr.bf16.mxu1 %v5848_v1  ;;  %1027 = vmatpush1.bf16.msra.mxu0 %v4928_v55 }
  0x6a   :  { %1028 = vmatprep.subr.bf16.mxu0 %v4273_v57 }
  0x6d   :  { %1029 = vmatpush1.bf16.msra.mxu0 %v4271_v60 }
  0x70   :  { %716 = vmatmul.mubr.bf16.vlgmr.msra.gmra.mrb[40].mxu1 %v5848_v1 }
  0x71   :  { %1058 = vmatpush1.bf16.msra.mxu1 %v4880_v39  ;;  %1089 = vmatprep.mubr.bf16.mxu1 %v5848_v1 }
  0x72   :  { %1059 = vmatprep.subr.bf16.mxu1 %v4882_v40 }
  0x75   :  { %1060 = vmatpush1.bf16.msra.mxu1 %v4895_v44 }
  0x76   :  { %1061 = vmatprep.subr.bf16.mxu1 %v4905_v47 }
  0x79   :  { %1062 = vmatpush1.bf16.msra.mxu1 %v4908_v49 }
  0x7a   :  { %1063 = vmatprep.subr.bf16.mxu1 %v4917_v52 }
  0x7d   :  { %1064 = vmatpush1.bf16.msra.mxu1 %v4930_v56 }
  0x7e   :  { %1065 = vmatprep.subr.bf16.mxu1 %v4934_v58 }
  0x81   :  { %1066 = vmatpush1.bf16.msra.mxu1 %v4940_v61 }
  0x82   :  { %1067 = vmatprep.subr.bf16.mxu1 %v4942_v62 }
  0x85   :  { %1068 = vmatpush1.bf16.msra.mxu1 %v4955_v2 }
  0x86   :  { %1069 = vmatprep.subr.bf16.mxu1 %v4959_v3 }
  0x89   :  { %1070 = vmatpush1.bf16.msra.mxu1 %v4964_v5 }
  0x8a   :  { %1071 = vmatprep.subr.bf16.mxu1 %v4966_v6 }
  0x8d   :  { %1072 = vmatpush1.bf16.msra.mxu1 %v4972_v7 }
  0xf3   :  { %v240_v15 = vpop.f32.mrb[0].mxu1  ;;  %v180_v16 = vpop.f32.mrb[0].mxu0 }
  0xf4   :  { %v241_v17 = vadd.f32 %v240_v15, %v5025_v13  ;;  %v242_v18 = vpop.f32.mrb[1].mxu1  ;;  %v181_v19 = vadd.f32 %v180_v16, %v5025_v13  ;;  %v182_v20 = vpop.f32.mrb[1].mxu0 }
  0xf5   :  { %v243_v21 = vadd.f32 %v242_v18, %v5027_v14  ;;  %v244_v22 = vpop.f32.mrb[2].mxu1  ;;  %v183_v23 = vadd.f32 %v182_v20, %v5027_v14  ;;  %v184_v24 = vpop.f32.mrb[2].mxu0 }
  0xf6   :  { %v245_v25 = vadd.f32 %v244_v22, %v5025_v13  ;;  %v246_v26 = vpop.f32.mrb[3].mxu1  ;;  %v185_v27 = vadd.f32 %v184_v24, %v5025_v13  ;;  %v186_v28 = vpop.f32.mrb[3].mxu0 }
  0xf7   :  { %v247_v29 = vadd.f32 %v246_v26, %v5027_v14  ;;  %v187_v30 = vadd.f32 %v186_v28, %v5027_v14 }
  0xf8   :  { %v5037_v31 = vpack.c.bf16 %v245_v25, %v241_v17  ;;  %v5039_v32 = vpack.c.bf16 %v185_v27, %v181_v19 }
  0xf9   :  { %v5041_v33 = vpack.c.bf16 %v247_v29, %v243_v21  ;;  %v5043_v34 = vpack.c.bf16 %v187_v30, %v183_v23 }
  0xfa   :  { %5873 = vst [vmem:[#allocation12_spill] sm:$0xff] %v5037_v31 }
  0xfb   :  { %5874 = vst [vmem:[#allocation13_spill] sm:$0xff] %v5041_v33  ;;  %v250_v35 = vpop.f32.mrb[4].mxu1  ;;  %v190_v36 = vpop.f32.mrb[4].mxu0 }
  0xfc   :  { %v251_v37 = vadd.f32 %v250_v35, %v5025_v13  ;;  %v252_v38 = vpop.f32.mrb[5].mxu1  ;;  %v191_v39 = vadd.f32 %v190_v36, %v5025_v13  ;;  %v192_v40 = vpop.f32.mrb[5].mxu0 }
  0xfd   :  { %v253_v41 = vadd.f32 %v252_v38, %v5027_v14  ;;  %v254_v42 = vpop.f32.mrb[6].mxu1  ;;  %v193_v43 = vadd.f32 %v192_v40, %v5027_v14  ;;  %v194_v44 = vpop.f32.mrb[6].mxu0 }
  0xfe   :  { %v255_v45 = vadd.f32 %v254_v42, %v5025_v13  ;;  %v256_v46 = vpop.f32.mrb[7].mxu1  ;;  %v195_v50 = vadd.f32 %v194_v44, %v5025_v13  ;;  %v196_v51 = vpop.f32.mrb[7].mxu0 }
  0xff   :  { %v257_v53 = vadd.f32 %v256_v46, %v5027_v14  ;;  %v197_v55 = vadd.f32 %v196_v51, %v5027_v14 }
 0x100   :  { %v5053_v57 = vpack.c.bf16 %v255_v45, %v251_v37  ;;  %v5055_v59 = vpack.c.bf16 %v195_v50, %v191_v39 }
 0x101   :  { %v5057_v60 = vpack.c.bf16 %v257_v53, %v253_v41  ;;  %v5059_v63 = vpack.c.bf16 %v197_v55, %v193_v43 }
 0x102   :  { %5875 = vst [vmem:[#allocation14_spill] sm:$0xff] %v5053_v57 }
 0x103   :  { %5876 = vst [vmem:[#allocation15_spill] sm:$0xff] %v5057_v60  ;;  %v293_v4 = vpop.f32.mrb[8].mxu1  ;;  %v200_v10 = vpop.f32.mrb[8].mxu0 }
 0x104   :  { %v295_v12 = vpop.f32.mrb[9].mxu1  ;;  %v201_v15 = vadd.f32 %v200_v10, %v5025_v13  ;;  %v202_v9 = vpop.f32.mrb[9].mxu0  ;;  %v294_v19 = vadd.f32 %v293_v4, %v5061_v0 }
 0x105   :  { %v297_v16 = vpop.f32.mrb[10].mxu1  ;;  %v203_v17 = vadd.f32 %v202_v9, %v5027_v14  ;;  %v204_v18 = vpop.f32.mrb[10].mxu0  ;;  %v296_v11 = vadd.f32 %v295_v12, %v5063_v8 }
 0x106   :  { %v298_v20 = vadd.f32 %v297_v16, %v5061_v0  ;;  %v299_v21 = vpop.f32.mrb[11].mxu1  ;;  %v205_v22 = vadd.f32 %v204_v18, %v5025_v13  ;;  %v206_v23 = vpop.f32.mrb[11].mxu0 }
 0x107   :  { %v300_v24 = vadd.f32 %v299_v21, %v5063_v8  ;;  %v207_v25 = vadd.f32 %v206_v23, %v5027_v14 }
 0x108   :  { %v5073_v26 = vpack.c.bf16 %v298_v20, %v294_v19  ;;  %v5075_v27 = vpack.c.bf16 %v205_v22, %v201_v15 }
 0x109   :  { %v5077_v28 = vpack.c.bf16 %v300_v24, %v296_v11  ;;  %v5079_v29 = vpack.c.bf16 %v207_v25, %v203_v17 }
 0x10b   :  { %v303_v30 = vpop.f32.mrb[12].mxu1  ;;  %v210_v35 = vpop.f32.mrb[12].mxu0 }
 0x10c   :  { %v304_v36 = vadd.f32 %v303_v30, %v5061_v0  ;;  %v305_v37 = vpop.f32.mrb[13].mxu1  ;;  %v211_v38 = vadd.f32 %v210_v35, %v5025_v13  ;;  %v212_v39 = vpop.f32.mrb[13].mxu0 }
 0x10d   :  { %v306_v40 = vadd.f32 %v305_v37, %v5063_v8  ;;  %v307_v41 = vpop.f32.mrb[14].mxu1  ;;  %v213_v42 = vadd.f32 %v212_v39, %v5027_v14  ;;  %v214_v43 = vpop.f32.mrb[14].mxu0 }
 0x10e   :  { %v308_v44 = vadd.f32 %v307_v41, %v5061_v0  ;;  %v309_v45 = vpop.f32.mrb[15].mxu1  ;;  %v215_v46 = vadd.f32 %v214_v43, %v5025_v13  ;;  %v216_v48 = vpop.f32.mrb[15].mxu0 }
 0x10f   :  { %v310_v50 = vadd.f32 %v309_v45, %v5063_v8  ;;  %v217_v51 = vadd.f32 %v216_v48, %v5027_v14 }
 0x110   :  { %v5089_v53 = vpack.c.bf16 %v308_v44, %v304_v36  ;;  %v5091_v54 = vpack.c.bf16 %v215_v46, %v211_v38 }
 0x111   :  { %v5093_v55 = vpack.c.bf16 %v310_v50, %v306_v40  ;;  %v5095_v4 = vpack.c.bf16 %v217_v51, %v213_v42 }
 0x113   :  { %v313_v10 = vpop.f32.mrb[16].mxu1  ;;  %v220_v12 = vpop.f32.mrb[16].mxu0  ;;  %v821_v33 = vunpack.c.h.bf16 %v5093_v55 }
 0x114   :  { %v314_v15 = vadd.f32 %v313_v10, %v5061_v0  ;;  %v315_v9 = vpop.f32.mrb[17].mxu1  ;;  %v221_v16 = vadd.f32 %v220_v12, %v5025_v13  ;;  %v222_v17 = vpop.f32.mrb[17].mxu0 }
 0x115   :  { %v316_v18 = vadd.f32 %v315_v9, %v5063_v8  ;;  %v317_v19 = vpop.f32.mrb[18].mxu1  ;;  %v223_v20 = vadd.f32 %v222_v17, %v5027_v14  ;;  %v224_v21 = vpop.f32.mrb[18].mxu0 }
 0x116   :  { %v318_v22 = vadd.f32 %v317_v19, %v5061_v0  ;;  %v319_v23 = vpop.f32.mrb[19].mxu1  ;;  %v225_v11 = vadd.f32 %v224_v21, %v5025_v13  ;;  %v226_v24 = vpop.f32.mrb[19].mxu0  ;;  %v440_v21 = vunpack.c.l.bf16 %v5039_v32 }
 0x117   :  { %v320_v25 = vadd.f32 %v319_v23, %v5063_v8  ;;  %v227_v30 = vadd.f32 %v226_v24, %v5027_v14 }
 0x118   :  { %v5105_v35 = vpack.c.bf16 %v318_v22, %v314_v15  ;;  %v5107_v36 = vpack.c.bf16 %v225_v11, %v221_v16  ;;  %v441_v11 = vunpack.c.l.bf16 %v5043_v34 }
 0x119   :  { %v5109_v37 = vpack.c.bf16 %v320_v25, %v316_v18  ;;  %v5111_v38 = vpack.c.bf16 %v227_v30, %v223_v20 }
 0x11a   :  { %5877 = vst [vmem:[#allocation16_spill] sm:$0xff] %v5107_v36 }
 0x11b   :  { %5878 = vst [vmem:[#allocation17_spill] sm:$0xff] %v5111_v38  ;;  %v323_v39 = vpop.f32.mrb[20].mxu1  ;;  %v230_v40 = vpop.f32.mrb[20].mxu0 }
 0x11c   :  { %v324_v41 = vadd.f32 %v323_v39, %v5061_v0  ;;  %v325_v42 = vpop.f32.mrb[21].mxu1  ;;  %v231_v43 = vadd.f32 %v230_v40, %v5025_v13  ;;  %v232_v44 = vpop.f32.mrb[21].mxu0 }
 0x11d   :  { %v326_v45 = vadd.f32 %v325_v42, %v5063_v8  ;;  %v327_v46 = vpop.f32.mrb[22].mxu1  ;;  %v233_v48 = vadd.f32 %v232_v44, %v5027_v14  ;;  %v234_v50 = vpop.f32.mrb[22].mxu0 }
 0x11e   :  { %v328_v51 = vadd.f32 %v327_v46, %v5061_v0  ;;  %v329_v10 = vpop.f32.mrb[23].mxu1  ;;  %v235_v12 = vadd.f32 %v234_v50, %v5025_v13  ;;  %v236_v15 = vpop.f32.mrb[23].mxu0 }
 0x11f   :  { %v330_v9 = vadd.f32 %v329_v10, %v5063_v8  ;;  %v237_v16 = vadd.f32 %v236_v15, %v5027_v14  ;;  %v444_v14 = vunpack.c.h.bf16 %v5039_v32 }
 0x120   :  { %v5121_v17 = vpack.c.bf16 %v328_v51, %v324_v41  ;;  %v5123_v18 = vpack.c.bf16 %v235_v12, %v231_v43  ;;  %v445_v43 = vunpack.c.h.bf16 %v5043_v34 }
 0x121   :  { %v5125_v19 = vpack.c.bf16 %v330_v9, %v326_v45  ;;  %v5127_v20 = vpack.c.bf16 %v237_v16, %v233_v48 }
 0x122   :  { %5879 = vst [vmem:[#allocation18_spill] sm:$0xff] %v5123_v18  ;;  %v1194_v18 = vunpack.c.h.bf16 %v5079_v29 }
 0x123   :  { %5880 = vst [vmem:[#allocation19_spill] sm:$0xff] %v5125_v19  ;;  %5881 = vst [vmem:[#allocation20_spill] sm:$0xff] %v5127_v20  ;;  %v333_v22 = vpop.f32.mrb[24].mxu1  ;;  %v674_v23 = vpop.f32.mrb[24].mxu0 }
 0x124   :  { %v334_v13 = vadd.f32 %v333_v22, %v5061_v0  ;;  %v726_v24 = vadd.f32 %v674_v23, %v440_v21  ;;  %v335_v25 = vpop.f32.mrb[25].mxu1  ;;  %v676_v30 = vpop.f32.mrb[25].mxu0 }
 0x125   :  { %v336_v39 = vadd.f32 %v335_v25, %v5063_v8  ;;  %v727_v40 = vadd.f32 %v676_v30, %v441_v11  ;;  %v337_v41 = vpop.f32.mrb[26].mxu1  ;;  %v678_v42 = vpop.f32.mrb[26].mxu0 }
 0x126   :  { %v338_v44 = vadd.f32 %v337_v41, %v5061_v0  ;;  %v730_v45 = vadd.f32 %v678_v42, %v444_v14  ;;  %v339_v46 = vpop.f32.mrb[27].mxu1  ;;  %v680_v48 = vpop.f32.mrb[27].mxu0  ;;  %v3894_v34 = vmul.f32 -1.442695, %v726_v24 }
 0x127   :  { %v340_v50 = vadd.f32 %v339_v46, %v5063_v8  ;;  %v731_v51 = vadd.f32 %v680_v48, %v445_v43  ;;  %v3896_v11 = vmul.f32 -1.442695, %v727_v40 }
 0x128   :  { %v5137_v10 = vpack.c.bf16 %v338_v44, %v334_v13  ;;  %4390 = vpow2.f32 %v3894_v34 }
 0x129   :  { %v5139_v12 = vpack.c.bf16 %v340_v50, %v336_v39  ;;  %v3897_v30 = vmul.f32 -1.442695, %v731_v51  ;;  %v3895_v39 = vmul.f32 -1.442695, %v730_v45  ;;  %4392 = vpow2.f32 %v3896_v11 }
 0x12a   :  { %5882 = vst [vmem:[#allocation21_spill] sm:$0xff] %v5137_v10 }
 0x12b   :  { %5883 = vst [vmem:[#allocation22_spill] sm:$0xff] %v5139_v12  ;;  %v343_v32 = vpop.f32.mrb[28].mxu1  ;;  %4394 = vpow2.f32 %v3897_v30  ;;  %v1196_v12 = vunpack.c.h.bf16 %v5109_v37 }
 0x12c   :  { %v344_v15 = vadd.f32 %v343_v32, %v5061_v0  ;;  %v345_v9 = vpop.f32.mrb[29].mxu1  ;;  %4396 = vpow2.f32 %v3895_v39 }
 0x12d   :  { %v346_v16 = vadd.f32 %v345_v9, %v5063_v8  ;;  %v347_v21 = vpop.f32.mrb[30].mxu1 }
 0x12e   :  { %v348_v22 = vadd.f32 %v347_v21, %v5061_v0  ;;  %v349_v23 = vpop.f32.mrb[31].mxu1 }
 0x12f   :  { %v350_v25 = vadd.f32 %v349_v23, %v5063_v8 }
 0x130   :  { %v5145_v14 = vpack.c.bf16 %v348_v22, %v344_v15 }
 0x131   :  { %v5147_v13 = vpack.c.bf16 %v350_v25, %v346_v16 }
 0x132   :  { %5884 = vst [vmem:[#allocation23_spill] sm:$0xff] %v5145_v14  ;;  %v4391_v32 = vpop.eup %4390 }
 0x133   :  { %5885 = vst [vmem:[#allocation24_spill] sm:$0xff] %v5147_v13  ;;  %v353_v41 = vpop.f32.mrb[32].mxu1  ;;  %v4393_v16 = vpop.eup %4392  ;;  %v740_v25 = vadd.f32 1.0, %v4391_v32  ;;  %v446_v32 = vunpack.c.h.bf16 %v5073_v26 }
 0x134   :  { %v354_v42 = vadd.f32 %v353_v41, %v5061_v0  ;;  %v355_v43 = vpop.f32.mrb[33].mxu1  ;;  %v752_v41 = vadd.f32 1.0, %v4393_v16 }
 0x135   :  { %v356_v24 = vadd.f32 %v355_v43, %v5063_v8  ;;  %v357_v44 = vpop.f32.mrb[34].mxu1  ;;  %v4395_v22 = vpop.eup %4394  ;;  %4398 = vrcp.f32 %v740_v25 }
 0x136   :  { %v358_v40 = vadd.f32 %v357_v44, %v5061_v0  ;;  %v359_v46 = vpop.f32.mrb[35].mxu1  ;;  %v4397_v39 = vpop.eup %4396  ;;  %v753_v43 = vadd.f32 1.0, %v4395_v22  ;;  %v442_v44 = vunpack.c.l.bf16 %v5073_v26  ;;  %4400 = vrcp.f32 %v752_v41 }
 0x137   :  { %v360_v48 = vadd.f32 %v359_v46, %v5063_v8 }
 0x138   :  { %v5153_v50 = vpack.c.bf16 %v358_v40, %v354_v42  ;;  %v741_v40 = vadd.f32 1.0, %v4397_v39  ;;  %4402 = vrcp.f32 %v753_v43 }
 0x139   :  { %v5155_v51 = vpack.c.bf16 %v360_v48, %v356_v24  ;;  %v443_v48 = vunpack.c.l.bf16 %v5077_v28 }
 0x13a   :  { %5886 = vst [vmem:[#allocation25_spill] sm:$0xff] %v5153_v50 }
 0x13b   :  { %5887 = vst [vmem:[#allocation26_spill] sm:$0xff] %v5155_v51  ;;  %v363_v45 = vpop.f32.mrb[36].mxu1  ;;  %v819_v51 = vunpack.c.h.bf16 %v5059_v63 }
 0x13c   :  { %v364_v15 = vadd.f32 %v363_v45, %v5061_v0  ;;  %v365_v9 = vpop.f32.mrb[37].mxu1 }
 0x13d   :  { %v366_v21 = vadd.f32 %v365_v9, %v5063_v8  ;;  %v367_v34 = vpop.f32.mrb[38].mxu1 }
 0x13e   :  { %v368_v23 = vadd.f32 %v367_v34, %v5061_v0  ;;  %v369_v11 = vpop.f32.mrb[39].mxu1 }
 0x13f   :  { %v370_v30 = vadd.f32 %v369_v11, %v5063_v8  ;;  %v4399_v11 = vpop.eup %4398 }
 0x140   :  { %v5161_v42 = vpack.c.bf16 %v368_v23, %v364_v15  ;;  %v447_v15 = vunpack.c.h.bf16 %v5077_v28  ;;  %v4401_v25 = vpop.eup %4400 }
 0x141   :  { %v5163_v24 = vpack.c.bf16 %v370_v30, %v366_v21  ;;  %v772_v41 = vmul.f32 0.0, %v4401_v25 }
 0x142   :  { %5888 = vst [vmem:[#allocation27_spill] sm:$0xff] %v5161_v42  ;;  %v4403_v30 = vpop.eup %4402 }
 0x143   :  { %5889 = vst [vmem:[#allocation28_spill] sm:$0xff] %v5163_v24  ;;  %v717_v46 = vpop.f32.mrb[40].mxu1  ;;  %v773_v28 = vmul.f32 0.0, %v4403_v30 }
 0x144   :  { %v728_v0 = vadd.f32 %v717_v46, %v442_v44  ;;  %v719_v45 = vpop.f32.mrb[41].mxu1 }
 0x145   :  { %v729_v8 = vadd.f32 %v719_v45, %v443_v48  ;;  %v721_v9 = vpop.f32.mrb[42].mxu1 }
 0x146   :  { %4404 = vtanh.f32 %v728_v0  ;;  %v732_v16 = vadd.f32 %v721_v9, %v446_v32  ;;  %v723_v21 = vpop.f32.mrb[43].mxu1 }
 0x147   :  { %4406 = vrcp.f32 %v741_v40  ;;  %v3898_v34 = vmul.f32 -1.442695, %v729_v8  ;;  %v733_v22 = vadd.f32 %v723_v21, %v447_v15 }
 0x148   :  { %4408 = vtanh.f32 %v732_v16  ;;  %v5178_v16 = vld [vmem:[%s5843_s4] ss:$0 sm:$0xff] }
 0x149   :  { %4410 = vpow2.f32 %v3898_v34  ;;  %v3899_v23 = vmul.f32 -1.442695, %v733_v22 }
 0x14b   :  { %4412 = vpow2.f32 %v3899_v23 }
 0x150   :  { %v4405_v39 = vpop.eup %4404 }
 0x151   :  { %v4407_v26 = vpop.eup %4406  ;;  %v774_v43 = vmul.f32 %v4405_v39, %v4399_v11  ;;  %v5188_v39 = vld [vmem:[#allocation6 + $0x4] ss:$16 sps:$4 sm:$0xff]  }
 0x152   :  { %v4409_v44 = vpop.eup %4408  ;;  %1389 = vmatprep.subr.bf16.mxu0 %v5188_v39 }
 0x153   :  { %v4411_v46 = vpop.eup %4410  ;;  %v5169_v48 = vadd.f32 %v774_v43, %v772_v41  ;;  %v775_v0 = vmul.f32 %v4409_v44, %v4407_v26  ;;  %v5190_v26 = vld [vmem:[#allocation6 + $0xc] ss:$16 sps:$4 sm:$0xff]   ;;  %v5192_v41 = vld [vmem:[#allocation6] ss:$16 sps:$4 sm:$0xff]   ;;  %v5194_v43 = vld [vmem:[#allocation6 + $0x8] ss:$16 sps:$4 sm:$0xff]  }
 0x154   :  { %v766_v40 = vadd.f32 1.0, %v4411_v46  ;;  %1432 = vmatprep.subr.bf16.mxu1 %v5190_v26  ;;  %v5200_v44 = vld [vmem:[#allocation6 + $0x24] ss:$16 sps:$4 sm:$0xff]   ;;  %v5202_v46 = vld [vmem:[#allocation6 + $0x2c] ss:$16 sps:$4 sm:$0xff]  }
 0x155   :  { %v4413_v45 = vpop.eup %4412  ;;  %v5171_v32 = vadd.f32 %v775_v0, %v773_v28  ;;  %4414 = vtanh.f32 %v5169_v48  ;;  %v5204_v28 = vld [vmem:[#allocation6 + $0x20] ss:$16 sps:$4 sm:$0xff]   ;;  %v5206_v0 = vld [vmem:[#allocation6 + $0x28] ss:$16 sps:$4 sm:$0xff]  }
 0x156   :  { %4416 = vrcp.f32 %v766_v40  ;;  %v767_v8 = vadd.f32 1.0, %v4413_v45  ;;  %v5212_v40 = vld [vmem:[#allocation6 + $0x44] ss:$16 sps:$4 sm:$0xff]   ;;  %v5215_v45 = vld [vmem:[#allocation6 + $0x40] ss:$16 sps:$4 sm:$0xff]  }
 0x157   :  { %4418 = vtanh.f32 %v5171_v32 }
 0x158   :  { %4420 = vrcp.f32 %v767_v8  ;;  %v5220_v8 = vld [vmem:[#allocation6 + $0x64] ss:$16 sps:$4 sm:$0xff]  }
 0x15f   :  { %v4415_v9 = vpop.eup %4414 }
 0x160   :  { %v4417_v15 = vpop.eup %4416 }
 0x161   :  { %v4419_v21 = vpop.eup %4418  ;;  %v780_v34 = vmul.f32 %v4417_v15, %v4415_v9  ;;  %v5223_v9 = vld [vmem:[#allocation6 + $0x60] ss:$16 sps:$4 sm:$0xff]   ;;  %v5230_v15 = vld [vmem:[#allocation6 + $0x84] ss:$16 sps:$4 sm:$0xff]  }
 0x162   :  { %v4421_v22 = vpop.eup %4420 }
 0x163   :  { %v781_v23 = vmul.f32 %v4421_v22, %v4419_v21  ;;  %v791_v11 = vmul.f32 %v5178_v16, %v780_v34  ;;  %v5233_v21 = vld [vmem:[#allocation6 + $0xa4] ss:$16 sps:$4 sm:$0xff]  }
 0x165   :  { %793 = vadd.xlane.f32.xlu0 %v791_v11  ;;  %v5181_v25 = vpack.c.bf16 %v781_v23, %v780_v34  ;;  %v792_v30 = vmul.f32 %v5178_v16, %v781_v23  ;;  %v815_v11 = vunpack.c.l.bf16 %v5059_v63 }
 0x167   :  { %5890 = vst [vmem:[#allocation29_spill] sm:$0xff] %v5181_v25  ;;  %1047 = vmatmul.mubr.bf16.vlgmr.msra.gmra.mrb[28].mxu0 %v5181_v25  ;;  %1090 = vmatmul.mubr.bf16.vlgmr.msra.gmra.mrb[44].mxu1 %v5181_v25 }
 0x168   :  { %1421 = vmatprep.mubr.bf16.mxu0 %v5848_v1  ;;  %1464 = vmatprep.mubr.bf16.mxu1 %v5848_v1 }
 0x169   :  { %795 = vadd.xlane.f32.xlu0 %v792_v30  ;;  %1390 = vmatpush1.bf16.msra.mxu0 %v5192_v41  ;;  %v817_v30 = vunpack.c.l.bf16 %v5093_v55 }
 0x16a   :  { %1433 = vmatpush1.bf16.msra.mxu1 %v5194_v43  ;;  %1391 = vmatprep.subr.bf16.mxu0 %v5200_v44 }
 0x16b   :  { %1434 = vmatprep.subr.bf16.mxu1 %v5202_v46 }
 0x16d   :  { %1392 = vmatpush1.bf16.msra.mxu0 %v5204_v28 }
 0x16e   :  { %1435 = vmatpush1.bf16.msra.mxu1 %v5206_v0  ;;  %1393 = vmatprep.subr.bf16.mxu0 %v5212_v40 }
 0x16f   :  { %1436 = vmatprep.subr.bf16.mxu1 %v4905_v47  ;;  %v5228_v47 = vld [vmem:[#allocation6 + $0x80] ss:$16 sps:$4 sm:$0xff]  }
 0x171   :  { %1394 = vmatpush1.bf16.msra.mxu0 %v5215_v45 }
 0x172   :  { %1437 = vmatpush1.bf16.msra.mxu1 %v4908_v49  ;;  %1395 = vmatprep.subr.bf16.mxu0 %v5220_v8  ;;  %v5238_v49 = vld [vmem:[#allocation6 + $0xa0] ss:$16 sps:$4 sm:$0xff]  }
 0x173   :  { %1438 = vmatprep.subr.bf16.mxu1 %v4917_v52  ;;  %v5242_v52 = vld [vmem:[#allocation6 + $0xc4] ss:$16 sps:$4 sm:$0xff]  }
 0x175   :  { %1396 = vmatpush1.bf16.msra.mxu0 %v5223_v9 }
 0x176   :  { %1439 = vmatpush1.bf16.msra.mxu1 %v4930_v56  ;;  %1397 = vmatprep.subr.bf16.mxu0 %v5230_v15  ;;  %v5246_v56 = vld [vmem:[#allocation6 + $0xc0] ss:$16 sps:$4 sm:$0xff]  }
 0x177   :  { %1440 = vmatprep.subr.bf16.mxu1 %v4934_v58  ;;  %v5250_v58 = vld [vmem:[#allocation6 + $0xe4] ss:$16 sps:$4 sm:$0xff]  }
 0x179   :  { %1398 = vmatpush1.bf16.msra.mxu0 %v5228_v47 }
 0x17a   :  { %1441 = vmatpush1.bf16.msra.mxu1 %v4940_v61  ;;  %1399 = vmatprep.subr.bf16.mxu0 %v5233_v21  ;;  %v5254_v61 = vld [vmem:[#allocation6 + $0xe0] ss:$16 sps:$4 sm:$0xff]  }
 0x17b   :  { %1442 = vmatprep.subr.bf16.mxu1 %v4942_v62  ;;  %v5262_v62 = vld [vmem:[#allocation5] ss:$0 sm:$0xff] }
 0x17d   :  { %1400 = vmatpush1.bf16.msra.mxu0 %v5238_v49 }
 0x17e   :  { %1443 = vmatpush1.bf16.msra.mxu1 %v4955_v2  ;;  %1401 = vmatprep.subr.bf16.mxu0 %v5242_v52 }
 0x17f   :  { %1444 = vmatprep.subr.bf16.mxu1 %v4959_v3 }
 0x181   :  { %1402 = vmatpush1.bf16.msra.mxu0 %v5246_v56 }
 0x182   :  { %1445 = vmatpush1.bf16.msra.mxu1 %v4964_v5  ;;  %1403 = vmatprep.subr.bf16.mxu0 %v5250_v58 }
 0x183   :  { %1446 = vmatprep.subr.bf16.mxu1 %v4966_v6  ;;  %v814_v6 = vunpack.c.l.bf16 %v5055_v59 }
 0x185   :  { %1404 = vmatpush1.bf16.msra.mxu0 %v5254_v61 }
 0x186   :  { %1447 = vmatpush1.bf16.msra.mxu1 %v4972_v7  ;;  %1764 = vmatprep.subr.bf16.mxu0 %v5188_v39  ;;  %v816_v7 = vunpack.c.l.bf16 %v5089_v53 }
 0x187   :  { %1807 = vmatprep.subr.bf16.mxu1 %v5190_v26 }
 0x1f2   :  { %v794_v2 = vpop.xlane.xlu0 %793 }
 0x1f3   :  { %v804_v3 = vadd.f32 %v5262_v62, %v794_v2 }
 0x1f5   :  { %807 = vst.msk [vmem:[#allocation4] sm:$0xff] %vm806_vm3, %v804_v3  ;;  %v818_v3 = vunpack.c.h.bf16 %v5055_v59 }
 0x1f6   :  { %v796_v5 = vpop.xlane.xlu0 %795 }
 0x1f7   :  { %v805_v34 = vadd.f32 %v5262_v62, %v796_v5  ;;  %v820_v5 = vunpack.c.h.bf16 %v5089_v53 }
 0x1f9   :  { %808 = vst.msk [vmem:[#allocation4 + $0x8] sm:$0xff] %vm806_vm3, %v805_v34 }
 0x23a   :  { %v1048_v22 = vpop.f32.mrb[28].mxu0  ;;  %v1091_v23 = vpop.f32.mrb[44].mxu1 }
 0x23b   :  { %v1100_v1 = vadd.f32 %v1048_v22, %v814_v6  ;;  %v1102_v25 = vadd.f32 %v1091_v23, %v816_v7  ;;  %v1050_v2 = vpop.f32.mrb[29].mxu0  ;;  %v1093_v24 = vpop.f32.mrb[45].mxu1 }
 0x23c   :  { %v1101_v60 = vadd.f32 %v1050_v2, %v815_v11  ;;  %v1103_v34 = vadd.f32 %v1093_v24, %v817_v30  ;;  %v1052_v42 = vpop.f32.mrb[30].mxu0  ;;  %v1095_v57 = vpop.f32.mrb[46].mxu1 }
 0x23d   :  { %v3934_v50 = vmul.f32 -1.442695, %v1100_v1  ;;  %v1104_v31 = vadd.f32 %v1052_v42, %v818_v3  ;;  %v1106_v13 = vadd.f32 %v1095_v57, %v820_v5  ;;  %v1054_v20 = vpop.f32.mrb[31].mxu0  ;;  %v1097_v6 = vpop.f32.mrb[47].mxu1 }
 0x23e   :  { %v3936_v7 = vmul.f32 -1.442695, %v1101_v60  ;;  %v1105_v22 = vadd.f32 %v1054_v20, %v819_v51  ;;  %v1107_v23 = vadd.f32 %v1097_v6, %v821_v33  ;;  %v3938_v24 = vmul.f32 -1.442695, %v1103_v34 }
 0x23f   :  { %4422 = vpow2.f32 %v3934_v50  ;;  %v3935_v59 = vmul.f32 -1.442695, %v1104_v31 }
 0x240   :  { %4424 = vpow2.f32 %v3936_v7  ;;  %v3937_v53 = vmul.f32 -1.442695, %v1105_v22  ;;  %v3939_v1 = vmul.f32 -1.442695, %v1107_v23 }
 0x241   :  { %4426 = vpow2.f32 %v3935_v59 }
 0x242   :  { %4428 = vpow2.f32 %v3937_v53 }
 0x243   :  { %4430 = vtanh.f32 %v1102_v25 }
 0x244   :  { %4432 = vpow2.f32 %v3938_v24 }
 0x245   :  { %4434 = vtanh.f32 %v1106_v13 }
 0x249   :  { %v4423_v11 = vpop.eup %4422 }
 0x24a   :  { %v4425_v63 = vpop.eup %4424  ;;  %v1114_v30 = vadd.f32 1.0, %v4423_v11 }
 0x24b   :  { %v1126_v55 = vadd.f32 1.0, %v4425_v63  ;;  %v4427_v57 = vpop.eup %4426 }
 0x24c   :  { %4436 = vrcp.f32 %v1114_v30  ;;  %v1115_v60 = vadd.f32 1.0, %v4427_v57  ;;  %v4429_v33 = vpop.eup %4428 }
 0x24d   :  { %4438 = vrcp.f32 %v1126_v55  ;;  %v1127_v31 = vadd.f32 1.0, %v4429_v33  ;;  %v4431_v20 = vpop.eup %4430  ;;  %v5311_v33 = vld [vmem:[#allocation6 + $0x4c] ss:$16 sps:$4 sm:$0xff]  }
 0x24e   :  { %4440 = vpow2.f32 %v3939_v1  ;;  %v4433_v50 = vpop.eup %4432 }
 0x24f   :  { %4442 = vrcp.f32 %v1115_v60  ;;  %v4435_v51 = vpop.eup %4434  ;;  %v1140_v3 = vadd.f32 1.0, %v4433_v50  ;;  %v5892_v60 = vmov 0   ;;  %v5319_v50 = vld [vmem:[#allocation6 + $0x68] ss:$16 sps:$4 sm:$0xff]  }
 0x250   :  { %4444 = vrcp.f32 %v1127_v31  ;;  %v5313_v31 = vld [vmem:[#allocation6 + $0x48] ss:$16 sps:$4 sm:$0xff]  }
 0x251   :  { %4446 = vrcp.f32 %v1140_v3  ;;  %v5337_v3 = vld [vmem:[#allocation6 + $0xc8] ss:$16 sps:$4 sm:$0xff]  }
 0x256   :  { %v4437_v42 = vpop.eup %4436 }
 0x257   :  { %v4439_v25 = vpop.eup %4438  ;;  %v1148_v2 = vmul.f32 %v4437_v42, %v4431_v20  ;;  %v5317_v20 = vld [vmem:[#allocation6 + $0x6c] ss:$16 sps:$4 sm:$0xff]   ;;  %v5325_v42 = vld [vmem:[#allocation6 + $0x88] ss:$16 sps:$4 sm:$0xff]  }
 0x258   :  { %v4441_v5 = vpop.eup %4440  ;;  %v1146_v34 = vmul.f32 %v4439_v25, %v5169_v48  ;;  %v5331_v25 = vld [vmem:[#allocation6 + $0xa8] ss:$16 sps:$4 sm:$0xff]  }
 0x259   :  { %v4443_v13 = vpop.eup %4442  ;;  %v1141_v23 = vadd.f32 1.0, %v4441_v5  ;;  %v5340_v5 = vld [vmem:[#allocation6 + $0xec] ss:$16 sps:$4 sm:$0xff]  }
 0x25a   :  { %v1149_v6 = vmul.f32 %v4443_v13, %v4435_v51  ;;  %v5277_v7 = vadd.f32 %v1148_v2, %v1146_v34  ;;  %v4445_v22 = vpop.eup %4444  ;;  %v5321_v51 = vld [vmem:[#allocation6 + $0x8c] ss:$16 sps:$4 sm:$0xff]   ;;  %v5343_v34 = vld [vmem:[#allocation6 + $0xe8] ss:$16 sps:$4 sm:$0xff]  }
 0x25b   :  { %v1147_v59 = vmul.f32 %v4445_v22, %v5171_v32  ;;  %v4447_v24 = vpop.eup %4446  ;;  %v5334_v2 = vld [vmem:[#allocation6 + $0xcc] ss:$16 sps:$4 sm:$0xff]  }
 0x25c   :  { %4448 = vtanh.f32 %v5277_v7 }
 0x25d   :  { %v5281_v53 = vadd.f32 %v1149_v6, %v1147_v59  ;;  %4450 = vrcp.f32 %v1141_v23  ;;  %v1189_v59 = vunpack.c.l.bf16 %v5075_v27 }
 0x25f   :  { %4452 = vtanh.f32 %v5281_v53 }
 0x266   :  { %v4449_v11 = vpop.eup %4448 }
 0x267   :  { %v1154_v63 = vmul.f32 %v4449_v11, %v4447_v24  ;;  %v4451_v48 = vpop.eup %4450  ;;  %v1191_v24 = vunpack.c.l.bf16 %v5105_v35 }
 0x269   :  { %v1166_v30 = vmul.f32 %v5178_v16, %v1154_v63  ;;  %v4453_v1 = vpop.eup %4452 }
 0x26a   :  { %v1155_v55 = vmul.f32 %v4453_v1, %v4451_v48  ;;  %v1190_v48 = vunpack.c.l.bf16 %v5079_v29 }
 0x26b   :  { %1168 = vadd.xlane.f32.xlu1 %v1166_v30 }
 0x26c   :  { %v5285_v57 = vpack.c.bf16 %v1155_v55, %v1154_v63  ;;  %v1167_v32 = vmul.f32 %v5178_v16, %v1155_v55 }
 0x26e   :  { %5891 = vst [vmem:[#allocation30_spill] sm:$0xff] %v5285_v57  ;;  %1422 = vmatmul.mubr.bf16.vlgmr.msra.gmra.mrb[32].mxu0 %v5285_v57  ;;  %1465 = vmatmul.mubr.bf16.vlgmr.msra.gmra.mrb[48].mxu1 %v5285_v57 }
 0x26f   :  { %1170 = vadd.xlane.f32.xlu1 %v1167_v32  ;;  %1765 = vmatpush1.bf16.msra.mxu0 %v5192_v41 }
 0x270   :  { %1808 = vmatpush1.bf16.msra.mxu1 %v5194_v43  ;;  %1766 = vmatprep.subr.bf16.mxu0 %v5200_v44 }
 0x271   :  { %1809 = vmatprep.subr.bf16.mxu1 %v5202_v46  ;;  %1796 = vmatprep.mubr.bf16.mxu0 %v5892_v60 }
 0x272   :  { %1839 = vmatprep.mubr.bf16.mxu1 %v5892_v60 }
 0x273   :  { %1767 = vmatpush1.bf16.msra.mxu0 %v5204_v28 }
 0x274   :  { %1810 = vmatpush1.bf16.msra.mxu1 %v5206_v0  ;;  %1768 = vmatprep.subr.bf16.mxu0 %v5212_v40 }
 0x275   :  { %1811 = vmatprep.subr.bf16.mxu1 %v5311_v33 }
 0x277   :  { %1769 = vmatpush1.bf16.msra.mxu0 %v5215_v45 }
 0x278   :  { %1770 = vmatprep.subr.bf16.mxu0 %v5220_v8  ;;  %1812 = vmatpush1.bf16.msra.mxu1 %v5313_v31 }
 0x279   :  { %1813 = vmatprep.subr.bf16.mxu1 %v5317_v20 }
 0x27b   :  { %1771 = vmatpush1.bf16.msra.mxu0 %v5223_v9 }
 0x27c   :  { %1772 = vmatprep.subr.bf16.mxu0 %v5230_v15  ;;  %1814 = vmatpush1.bf16.msra.mxu1 %v5319_v50 }
 0x27d   :  { %1815 = vmatprep.subr.bf16.mxu1 %v5321_v51 }
 0x27f   :  { %1773 = vmatpush1.bf16.msra.mxu0 %v5228_v47 }
 0x280   :  { %1774 = vmatprep.subr.bf16.mxu0 %v5233_v21  ;;  %1816 = vmatpush1.bf16.msra.mxu1 %v5325_v42 }
 0x283   :  { %1775 = vmatpush1.bf16.msra.mxu0 %v5238_v49 }
 0x284   :  { %1776 = vmatprep.subr.bf16.mxu0 %v5242_v52 }
 0x287   :  { %1777 = vmatpush1.bf16.msra.mxu0 %v5246_v56 }
 0x288   :  { %1778 = vmatprep.subr.bf16.mxu0 %v5250_v58 }
 0x28b   :  { %1779 = vmatpush1.bf16.msra.mxu0 %v5254_v61 }
 0x28c   :  { %2139 = vmatprep.subr.bf16.mxu0 %v5188_v39  ;;  %v5328_v39 = vld [vmem:[#allocation6 + $0xac] ss:$16 sps:$4 sm:$0xff]  }
 0x28d   :  { %1817 = vmatprep.subr.bf16.mxu1 %v5328_v39 }
 0x28e   :  { %1818 = vmatpush1.bf16.msra.mxu1 %v5331_v25 }
 0x28f   :  { %1819 = vmatprep.subr.bf16.mxu1 %v5334_v2 }
 0x292   :  { %1820 = vmatpush1.bf16.msra.mxu1 %v5337_v3 }
 0x293   :  { %1821 = vmatprep.subr.bf16.mxu1 %v5340_v5 }
 0x296   :  { %1822 = vmatpush1.bf16.msra.mxu1 %v5343_v34 }
 0x297   :  { %2182 = vmatprep.subr.bf16.mxu1 %v5190_v26  ;;  %v1192_v26 = vunpack.c.l.bf16 %v5109_v37 }
 0x2f8   :  { %v1169_v13 = vpop.xlane.xlu1 %1168 }
 0x2f9   :  { %v1179_v6 = vadd.f32 %v5262_v62, %v1169_v13  ;;  %v1193_v13 = vunpack.c.h.bf16 %v5075_v27 }
 0x2fb   :  { %1182 = vst.msk [vmem:[#allocation4 + $0x10] sm:$0xff] %vm806_vm3, %v1179_v6  ;;  %v1195_v6 = vunpack.c.h.bf16 %v5105_v35 }
 0x2fc   :  { %v1171_v22 = vpop.xlane.xlu1 %1170 }
 0x2fd   :  { %v1180_v23 = vadd.f32 %v5262_v62, %v1171_v22 }
 0x2ff   :  { %1183 = vst.msk [vmem:[#allocation4 + $0x18] sm:$0xff] %vm806_vm3, %v1180_v23 }
 0x341   :  { %v1423_v11 = vpop.f32.mrb[32].mxu0  ;;  %v1466_v63 = vpop.f32.mrb[48].mxu1 }
 0x342   :  { %v1475_v30 = vadd.f32 %v1423_v11, %v1189_v59  ;;  %v1477_v1 = vadd.f32 %v1466_v63, %v1191_v24  ;;  %v1425_v55 = vpop.f32.mrb[33].mxu0  ;;  %v1468_v32 = vpop.f32.mrb[49].mxu1 }
 0x343   :  { %v1476_v22 = vadd.f32 %v1425_v55, %v1190_v48  ;;  %v1478_v23 = vadd.f32 %v1468_v32, %v1192_v26  ;;  %v1427_v57 = vpop.f32.mrb[34].mxu0  ;;  %v1470_v14 = vpop.f32.mrb[50].mxu1 }
 0x344   :  { %v3974_v38 = vmul.f32 -1.442695, %v1475_v30  ;;  %v1479_v10 = vadd.f32 %v1427_v57, %v1193_v13  ;;  %v1481_v36 = vadd.f32 %v1470_v14, %v1195_v6  ;;  %v1429_v19 = vpop.f32.mrb[35].mxu0  ;;  %v1472_v59 = vpop.f32.mrb[51].mxu1 }
 0x345   :  { %v3976_v24 = vmul.f32 -1.442695, %v1476_v22  ;;  %v1480_v11 = vadd.f32 %v1429_v19, %v1194_v18  ;;  %v1482_v63 = vadd.f32 %v1472_v59, %v1196_v12  ;;  %v3978_v48 = vmul.f32 -1.442695, %v1478_v23 }
 0x346   :  { %4454 = vpow2.f32 %v3974_v38  ;;  %v3975_v27 = vmul.f32 -1.442695, %v1479_v10 }
 0x347   :  { %4456 = vpow2.f32 %v3976_v24  ;;  %v3977_v35 = vmul.f32 -1.442695, %v1480_v11  ;;  %v3979_v37 = vmul.f32 -1.442695, %v1482_v63 }
 0x348   :  { %4458 = vpow2.f32 %v3975_v27 }
 0x349   :  { %4460 = vpow2.f32 %v3977_v35 }
 0x34a   :  { %4462 = vtanh.f32 %v1477_v1 }
 0x34b   :  { %4464 = vpow2.f32 %v3978_v48 }
 0x34c   :  { %4466 = vtanh.f32 %v1481_v36 }
 0x350   :  { %v4455_v26 = vpop.eup %4454 }
 0x351   :  { %v4457_v29 = vpop.eup %4456  ;;  %v1489_v55 = vadd.f32 1.0, %v4455_v26 }
 0x352   :  { %v1501_v57 = vadd.f32 1.0, %v4457_v29  ;;  %v4459_v14 = vpop.eup %4458 }
 0x353   :  { %4468 = vrcp.f32 %v1489_v55  ;;  %v1490_v18 = vadd.f32 1.0, %v4459_v14  ;;  %v4461_v19 = vpop.eup %4460 }
 0x354   :  { %4470 = vrcp.f32 %v1501_v57  ;;  %v1502_v38 = vadd.f32 1.0, %v4461_v19  ;;  %v4463_v10 = vpop.eup %4462 }
 0x355   :  { %4472 = vpow2.f32 %v3979_v37  ;;  %v4465_v12 = vpop.eup %4464 }
 0x356   :  { %4474 = vrcp.f32 %v1490_v18  ;;  %v4467_v30 = vpop.eup %4466  ;;  %v1515_v6 = vadd.f32 1.0, %v4465_v12 }
 0x357   :  { %4476 = vrcp.f32 %v1502_v38 }
 0x358   :  { %4478 = vrcp.f32 %v1515_v6 }
 0x35d   :  { %v4469_v32 = vpop.eup %4468 }
 0x35e   :  { %v4471_v1 = vpop.eup %4470  ;;  %v1523_v13 = vmul.f32 %v4469_v32, %v4463_v10 }
 0x35f   :  { %v4473_v22 = vpop.eup %4472  ;;  %v1521_v23 = vmul.f32 %v4471_v1, %v5277_v7 }
 0x360   :  { %v4475_v36 = vpop.eup %4474  ;;  %v1516_v63 = vadd.f32 1.0, %v4473_v22 }
 0x361   :  { %v1524_v59 = vmul.f32 %v4475_v36, %v4467_v30  ;;  %v5361_v24 = vadd.f32 %v1523_v13, %v1521_v23  ;;  %v4477_v11 = vpop.eup %4476 }
 0x362   :  { %v1522_v27 = vmul.f32 %v4477_v11, %v5281_v53  ;;  %v4479_v48 = vpop.eup %4478 }
 0x363   :  { %4480 = vtanh.f32 %v5361_v24 }
 0x364   :  { %v5365_v35 = vadd.f32 %v1524_v59, %v1522_v27  ;;  %4482 = vrcp.f32 %v1516_v63 }
 0x366   :  { %4484 = vtanh.f32 %v5365_v35 }
 0x36d   :  { %v4481_v26 = vpop.eup %4480 }
 0x36e   :  { %v1529_v29 = vmul.f32 %v4481_v26, %v4479_v48  ;;  %v4483_v7 = vpop.eup %4482 }
 0x370   :  { %v1541_v55 = vmul.f32 %v5178_v16, %v1529_v29  ;;  %v4485_v37 = vpop.eup %4484 }
 0x371   :  { %v1530_v57 = vmul.f32 %v4485_v37, %v4483_v7 }
 0x372   :  { %1543 = vadd.xlane.f32.xlu0 %v1541_v55 }
 0x373   :  { %v1542_v14 = vmul.f32 %v5178_v16, %v1530_v57  ;;  %v5370_v18 = vpack.c.bf16 %v1530_v57, %v1529_v29 }
 0x375   :  { %1545 = vadd.xlane.f32.xlu1 %v1542_v14  ;;  %1797 = vmatmul.mubr.bf16.vlgmr.msra.gmra.mrb[36].mxu0 %v5370_v18 }
 0x376   :  { %1840 = vmatmul.mubr.bf16.vlgmr.msra.gmra.mrb[52].mxu1 %v5370_v18  ;;  %2140 = vmatpush1.bf16.msra.mxu0 %v5192_v41 }
 0x377   :  { %2183 = vmatpush1.bf16.msra.mxu1 %v5194_v43  ;;  %2141 = vmatprep.subr.bf16.mxu0 %v5200_v44 }
 0x378   :  { %2184 = vmatprep.subr.bf16.mxu1 %v5202_v46  ;;  %2171 = vmatprep.mubr.bf16.mxu0 %v5892_v60  ;;  %v1564_v46 = vunpack.c.l.bf16 %v5091_v54 }
 0x379   :  { %2214 = vmatprep.mubr.bf16.mxu1 %v5892_v60 }
 0x37a   :  { %2142 = vmatpush1.bf16.msra.mxu0 %v5204_v28 }
 0x37b   :  { %2185 = vmatpush1.bf16.msra.mxu1 %v5206_v0  ;;  %2143 = vmatprep.subr.bf16.mxu0 %v5212_v40  ;;  %v1566_v0 = vunpack.c.l.bf16 %v5121_v17  ;;  %v1565_v40 = vunpack.c.l.bf16 %v5095_v4 }
 0x37c   :  { %2186 = vmatprep.subr.bf16.mxu1 %v5311_v33 }
 0x37e   :  { %2144 = vmatpush1.bf16.msra.mxu0 %v5215_v45 }
 0x37f   :  { %2187 = vmatpush1.bf16.msra.mxu1 %v5313_v31  ;;  %2145 = vmatprep.subr.bf16.mxu0 %v5220_v8 }
 0x380   :  { %2188 = vmatprep.subr.bf16.mxu1 %v5317_v20 }
 0x382   :  { %2146 = vmatpush1.bf16.msra.mxu0 %v5223_v9 }
 0x383   :  { %2189 = vmatpush1.bf16.msra.mxu1 %v5319_v50  ;;  %2147 = vmatprep.subr.bf16.mxu0 %v5230_v15 }
 0x384   :  { %2190 = vmatprep.subr.bf16.mxu1 %v5321_v51 }
 0x386   :  { %2148 = vmatpush1.bf16.msra.mxu0 %v5228_v47  ;;  %v5893_v47 = vld [vmem:[#allocation19_spill] sm:$0xff] }
 0x387   :  { %2191 = vmatpush1.bf16.msra.mxu1 %v5325_v42  ;;  %2149 = vmatprep.subr.bf16.mxu0 %v5233_v21  ;;  %v1567_v15 = vunpack.c.l.bf16 %v5893_v47  ;;  %v1568_v21 = vunpack.c.h.bf16 %v5091_v54  ;;  %v1571_v30 = vunpack.c.h.bf16 %v5893_v47 }
 0x388   :  { %2192 = vmatprep.subr.bf16.mxu1 %v5328_v39 }
 0x38a   :  { %2150 = vmatpush1.bf16.msra.mxu0 %v5238_v49 }
 0x38b   :  { %2193 = vmatpush1.bf16.msra.mxu1 %v5331_v25  ;;  %2151 = vmatprep.subr.bf16.mxu0 %v5242_v52 }
 0x38c   :  { %2194 = vmatprep.subr.bf16.mxu1 %v5334_v2 }
 0x38e   :  { %2152 = vmatpush1.bf16.msra.mxu0 %v5246_v56 }
 0x38f   :  { %2195 = vmatpush1.bf16.msra.mxu1 %v5337_v3  ;;  %2153 = vmatprep.subr.bf16.mxu0 %v5250_v58 }
 0x390   :  { %2196 = vmatprep.subr.bf16.mxu1 %v5340_v5 }
 0x392   :  { %2154 = vmatpush1.bf16.msra.mxu0 %v5254_v61  ;;  %v1570_v61 = vunpack.c.h.bf16 %v5121_v17 }
 0x393   :  { %2197 = vmatpush1.bf16.msra.mxu1 %v5343_v34 }
 0x3ff   :  { %v1544_v16 = vpop.xlane.xlu0 %1543 }
 0x400   :  { %v1554_v41 = vadd.f32 %v5262_v62, %v1544_v16 }
 0x402   :  { %1557 = vst.msk [vmem:[#allocation4 + $0x20] sm:$0xff] %vm806_vm3, %v1554_v41  ;;  %v1546_v43 = vpop.xlane.xlu1 %1545 }
 0x403   :  { %v1555_v44 = vadd.f32 %v5262_v62, %v1546_v43  ;;  %v1569_v62 = vunpack.c.h.bf16 %v5095_v4 }
 0x405   :  { %1558 = vst.msk [vmem:[#allocation4 + $0x28] sm:$0xff] %vm806_vm3, %v1555_v44 }
 0x448   :  { %v1798_v28 = vpop.f32.mrb[36].mxu0 }
 0x449   :  { %v1850_v45 = vadd.f32 %v1798_v28, %v1564_v46  ;;  %v1841_v8 = vpop.f32.mrb[52].mxu1  ;;  %v1800_v9 = vpop.f32.mrb[37].mxu0 }
 0x44a   :  { %v1852_v49 = vadd.f32 %v1841_v8, %v1566_v0  ;;  %v1851_v52 = vadd.f32 %v1800_v9, %v1565_v40  ;;  %v1843_v56 = vpop.f32.mrb[53].mxu1  ;;  %v1802_v58 = vpop.f32.mrb[38].mxu0 }
 0x44b   :  { %v4014_v53 = vmul.f32 -1.442695, %v1850_v45  ;;  %v1853_v19 = vadd.f32 %v1843_v56, %v1567_v15  ;;  %v1854_v38 = vadd.f32 %v1802_v58, %v1568_v21  ;;  %v1845_v10 = vpop.f32.mrb[54].mxu1  ;;  %v1804_v12 = vpop.f32.mrb[39].mxu0 }
 0x44c   :  { %v4016_v32 = vmul.f32 -1.442695, %v1851_v52  ;;  %v1856_v1 = vadd.f32 %v1845_v10, %v1570_v61  ;;  %v1855_v13 = vadd.f32 %v1804_v12, %v1569_v62  ;;  %v1847_v6 = vpop.f32.mrb[55].mxu1  ;;  %v5439_v62 = vld [vmem:[#allocation6 + $0x4] ss:$16 sps:$4 sm:$0xff]  }
 0x44d   :  { %4486 = vpow2.f32 %v4014_v53  ;;  %v4015_v54 = vmul.f32 -1.442695, %v1854_v38  ;;  %v1857_v22 = vadd.f32 %v1847_v6, %v1571_v30  ;;  %v4018_v17 = vmul.f32 -1.442695, %v1853_v19  ;;  %v5441_v53 = vld [vmem:[#allocation6 + $0xc] ss:$16 sps:$4 sm:$0xff]   ;;  %2514 = vmatprep.subr.bf16.mxu0 %v5439_v62 }
 0x44e   :  { %4488 = vpow2.f32 %v4016_v32  ;;  %v4017_v23 = vmul.f32 -1.442695, %v1855_v13  ;;  %v5443_v19 = vld [vmem:[#allocation6] ss:$16 sps:$4 sm:$0xff]   ;;  %v5445_v38 = vld [vmem:[#allocation6 + $0x8] ss:$16 sps:$4 sm:$0xff]   ;;  %2557 = vmatprep.subr.bf16.mxu1 %v5441_v53 }
 0x44f   :  { %4490 = vpow2.f32 %v4015_v54  ;;  %v4019_v11 = vmul.f32 -1.442695, %v1857_v22  ;;  %v5451_v10 = vld [vmem:[#allocation6 + $0x24] ss:$16 sps:$4 sm:$0xff]   ;;  %v5453_v12 = vld [vmem:[#allocation6 + $0x2c] ss:$16 sps:$4 sm:$0xff]  }
 0x450   :  { %4492 = vpow2.f32 %v4017_v23  ;;  %v5455_v30 = vld [vmem:[#allocation6 + $0x20] ss:$16 sps:$4 sm:$0xff]   ;;  %v5457_v32 = vld [vmem:[#allocation6 + $0x28] ss:$16 sps:$4 sm:$0xff]   ;;  %v5471_v6 = vld [vmem:[#allocation6 + $0x64] ss:$16 sps:$4 sm:$0xff]  }
 0x451   :  { %4494 = vtanh.f32 %v1852_v49  ;;  %v5466_v13 = vld [vmem:[#allocation6 + $0x40] ss:$16 sps:$4 sm:$0xff]   ;;  %v5476_v22 = vld [vmem:[#allocation6 + $0x84] ss:$16 sps:$4 sm:$0xff]  }
 0x452   :  { %4496 = vpow2.f32 %v4018_v17  ;;  %v5474_v54 = vld [vmem:[#allocation6 + $0x60] ss:$16 sps:$4 sm:$0xff]   ;;  %v5493_v23 = vld [vmem:[#allocation6 + $0xc4] ss:$16 sps:$4 sm:$0xff]  }
 0x453   :  { %4498 = vtanh.f32 %v1856_v1  ;;  %v5463_v1 = vld [vmem:[#allocation6 + $0x44] ss:$16 sps:$4 sm:$0xff]  }
 0x457   :  { %v4487_v4 = vpop.eup %4486 }
 0x458   :  { %v4489_v36 = vpop.eup %4488  ;;  %v1864_v59 = vadd.f32 1.0, %v4487_v4 }
 0x459   :  { %v1876_v63 = vadd.f32 1.0, %v4489_v36  ;;  %v4491_v27 = vpop.eup %4490 }
 0x45a   :  { %4500 = vrcp.f32 %v1864_v59  ;;  %v1865_v48 = vadd.f32 1.0, %v4491_v27  ;;  %v4493_v26 = vpop.eup %4492  ;;  %v5895_v59 = vld [vmem:[#allocation21_spill] sm:$0xff] }
 0x45b   :  { %4502 = vrcp.f32 %v1876_v63  ;;  %v1877_v29 = vadd.f32 1.0, %v4493_v26  ;;  %v4495_v7 = vpop.eup %4494 }
 0x45c   :  { %4504 = vpow2.f32 %v4019_v11  ;;  %v4497_v55 = vpop.eup %4496  ;;  %v1941_v11 = vunpack.c.l.bf16 %v5895_v59 }
 0x45d   :  { %4506 = vrcp.f32 %v1865_v48  ;;  %v4499_v37 = vpop.eup %4498  ;;  %v1890_v41 = vadd.f32 1.0, %v4497_v55 }
 0x45e   :  { %4508 = vrcp.f32 %v1877_v29  ;;  %v5897_v29 = vld [vmem:[#allocation22_spill] sm:$0xff] }
 0x45f   :  { %4510 = vrcp.f32 %v1890_v41  ;;  %v1945_v41 = vunpack.c.h.bf16 %v5895_v59 }
 0x464   :  { %v4501_v57 = vpop.eup %4500 }
 0x465   :  { %v4503_v14 = vpop.eup %4502  ;;  %v1898_v16 = vmul.f32 %v4501_v57, %v4495_v7  ;;  %v1942_v7 = vunpack.c.l.bf16 %v5897_v29 }
 0x466   :  { %v4505_v43 = vpop.eup %4504  ;;  %v1896_v44 = vmul.f32 %v4503_v14, %v5361_v24  ;;  %v5429_v24 = vld [vmem:[%s5843_s4] ss:$0 sm:$0xff] }
 0x467   :  { %v4507_v46 = vpop.eup %4506  ;;  %v1891_v45 = vadd.f32 1.0, %v4505_v43 }
 0x468   :  { %v1899_v28 = vmul.f32 %v4507_v46, %v4499_v37  ;;  %v5419_v0 = vadd.f32 %v1898_v16, %v1896_v44  ;;  %v4509_v40 = vpop.eup %4508 }
 0x469   :  { %v1897_v8 = vmul.f32 %v4509_v40, %v5365_v35  ;;  %v4511_v47 = vpop.eup %4510 }
 0x46a   :  { %4512 = vtanh.f32 %v5419_v0 }
 0x46b   :  { %v5423_v9 = vadd.f32 %v1899_v28, %v1897_v8  ;;  %4514 = vrcp.f32 %v1891_v45  ;;  %v1946_v8 = vunpack.c.h.bf16 %v5897_v29 }
 0x46d   :  { %4516 = vtanh.f32 %v5423_v9 }
 0x474   :  { %v4513_v15 = vpop.eup %4512 }
 0x475   :  { %v1904_v21 = vmul.f32 %v4513_v15, %v4511_v47  ;;  %v4515_v49 = vpop.eup %4514 }
 0x477   :  { %v1916_v52 = vmul.f32 %v5429_v24, %v1904_v21  ;;  %v4517_v56 = vpop.eup %4516 }
 0x478   :  { %v1905_v35 = vmul.f32 %v4517_v56, %v4515_v49 }
 0x479   :  { %1918 = vadd.xlane.f32.xlu0 %v1916_v52 }
 0x47a   :  { %v1917_v58 = vmul.f32 %v5429_v24, %v1905_v35  ;;  %v5433_v61 = vpack.c.bf16 %v1905_v35, %v1904_v21 }
 0x47c   :  { %1920 = vadd.xlane.f32.xlu1 %v1917_v58  ;;  %2172 = vmatmul.mubr.bf16.vlgmr.msra.gmra.mrb[40].mxu0 %v5433_v61 }
 0x47d   :  { %2215 = vmatmul.mubr.bf16.vlgmr.msra.gmra.mrb[56].mxu1 %v5433_v61  ;;  %2546 = vmatprep.mubr.bf16.mxu0 %v5892_v60 }
 0x47e   :  { %2589 = vmatprep.mubr.bf16.mxu1 %v5892_v60  ;;  %2515 = vmatpush1.bf16.msra.mxu0 %v5443_v19 }
 0x47f   :  { %2558 = vmatpush1.bf16.msra.mxu1 %v5445_v38  ;;  %2516 = vmatprep.subr.bf16.mxu0 %v5451_v10 }
 0x480   :  { %2559 = vmatprep.subr.bf16.mxu1 %v5453_v12 }
 0x482   :  { %2517 = vmatpush1.bf16.msra.mxu0 %v5455_v30 }
 0x483   :  { %2560 = vmatpush1.bf16.msra.mxu1 %v5457_v32  ;;  %2518 = vmatprep.subr.bf16.mxu0 %v5463_v1 }
 0x484   :  { %2561 = vmatprep.subr.bf16.mxu1 %v5311_v33  ;;  %v5481_v33 = vld [vmem:[#allocation6 + $0x80] ss:$16 sps:$4 sm:$0xff]  }
 0x486   :  { %2519 = vmatpush1.bf16.msra.mxu0 %v5466_v13 }
 0x487   :  { %2562 = vmatpush1.bf16.msra.mxu1 %v5313_v31  ;;  %2520 = vmatprep.subr.bf16.mxu0 %v5471_v6  ;;  %v5485_v31 = vld [vmem:[#allocation6 + $0xa4] ss:$16 sps:$4 sm:$0xff]  }
 0x488   :  { %2563 = vmatprep.subr.bf16.mxu1 %v5317_v20  ;;  %v5489_v20 = vld [vmem:[#allocation6 + $0xa0] ss:$16 sps:$4 sm:$0xff]  }
 0x48a   :  { %2521 = vmatpush1.bf16.msra.mxu0 %v5474_v54 }
 0x48b   :  { %2564 = vmatpush1.bf16.msra.mxu1 %v5319_v50  ;;  %2522 = vmatprep.subr.bf16.mxu0 %v5476_v22  ;;  %v5497_v50 = vld [vmem:[#allocation6 + $0xc0] ss:$16 sps:$4 sm:$0xff]  }
 0x48c   :  { %2565 = vmatprep.subr.bf16.mxu1 %v5321_v51  ;;  %v5501_v51 = vld [vmem:[#allocation6 + $0xe4] ss:$16 sps:$4 sm:$0xff]  }
 0x48e   :  { %2523 = vmatpush1.bf16.msra.mxu0 %v5481_v33 }
 0x48f   :  { %2566 = vmatpush1.bf16.msra.mxu1 %v5325_v42  ;;  %2524 = vmatprep.subr.bf16.mxu0 %v5485_v31  ;;  %v5505_v42 = vld [vmem:[#allocation6 + $0xe0] ss:$16 sps:$4 sm:$0xff]  }
 0x490   :  { %2567 = vmatprep.subr.bf16.mxu1 %v5328_v39  ;;  %v5509_v39 = vld [vmem:[#allocation5] ss:$0 sm:$0xff] }
 0x492   :  { %2525 = vmatpush1.bf16.msra.mxu0 %v5489_v20 }
 0x493   :  { %2568 = vmatpush1.bf16.msra.mxu1 %v5331_v25  ;;  %2526 = vmatprep.subr.bf16.mxu0 %v5493_v23 }
 0x494   :  { %2569 = vmatprep.subr.bf16.mxu1 %v5334_v2 }
 0x496   :  { %2527 = vmatpush1.bf16.msra.mxu0 %v5497_v50 }
 0x497   :  { %2570 = vmatpush1.bf16.msra.mxu1 %v5337_v3  ;;  %2528 = vmatprep.subr.bf16.mxu0 %v5501_v51 }
 0x498   :  { %2571 = vmatprep.subr.bf16.mxu1 %v5340_v5  ;;  %v5894_v5 = vld [vmem:[#allocation16_spill] sm:$0xff] }
 0x499   :  { %v1939_v4 = vunpack.c.l.bf16 %v5894_v5  ;;  %v1943_v55 = vunpack.c.h.bf16 %v5894_v5 }
 0x49a   :  { %2529 = vmatpush1.bf16.msra.mxu0 %v5505_v42 }
 0x49b   :  { %2572 = vmatpush1.bf16.msra.mxu1 %v5343_v34  ;;  %2889 = vmatprep.subr.bf16.mxu0 %v5439_v62  ;;  %v5896_v34 = vld [vmem:[#allocation17_spill] sm:$0xff] }
 0x49c   :  { %2932 = vmatprep.subr.bf16.mxu1 %v5441_v53  ;;  %v1940_v63 = vunpack.c.l.bf16 %v5896_v34  ;;  %v1944_v43 = vunpack.c.h.bf16 %v5896_v34 }
 0x506   :  { %v1919_v25 = vpop.xlane.xlu0 %1918 }
 0x507   :  { %v1929_v2 = vadd.f32 %v5509_v39, %v1919_v25 }
 0x509   :  { %1932 = vst.msk [vmem:[#allocation4 + $0x30] sm:$0xff] %vm806_vm3, %v1929_v2  ;;  %v1921_v3 = vpop.xlane.xlu1 %1920 }
 0x50a   :  { %v1930_v17 = vadd.f32 %v5509_v39, %v1921_v3 }
 0x50c   :  { %1933 = vst.msk [vmem:[#allocation4 + $0x38] sm:$0xff] %vm806_vm3, %v1930_v17 }
 0x54f   :  { %v2173_v36 = vpop.f32.mrb[40].mxu0 }
 0x550   :  { %v2225_v27 = vadd.f32 %v2173_v36, %v1939_v4  ;;  %v2216_v48 = vpop.f32.mrb[56].mxu1  ;;  %v2175_v26 = vpop.f32.mrb[41].mxu0 }
 0x551   :  { %v2227_v37 = vadd.f32 %v2216_v48, %v1941_v11  ;;  %v2226_v57 = vadd.f32 %v2175_v26, %v1940_v63  ;;  %v2218_v14 = vpop.f32.mrb[57].mxu1  ;;  %v2177_v16 = vpop.f32.mrb[42].mxu0 }
 0x552   :  { %v4054_v44 = vmul.f32 -1.442695, %v2225_v27  ;;  %v2228_v46 = vadd.f32 %v2218_v14, %v1942_v7  ;;  %v2229_v28 = vadd.f32 %v2177_v16, %v1943_v55  ;;  %v2220_v40 = vpop.f32.mrb[58].mxu1  ;;  %v2179_v45 = vpop.f32.mrb[43].mxu0 }
 0x553   :  { %v4056_v47 = vmul.f32 -1.442695, %v2226_v57  ;;  %v2231_v15 = vadd.f32 %v2220_v40, %v1945_v41  ;;  %v2230_v21 = vadd.f32 %v2179_v45, %v1944_v43  ;;  %v2222_v49 = vpop.f32.mrb[59].mxu1 }
 0x554   :  { %4518 = vpow2.f32 %v4054_v44  ;;  %v4055_v52 = vmul.f32 -1.442695, %v2229_v28  ;;  %v2232_v56 = vadd.f32 %v2222_v49, %v1946_v8  ;;  %v4058_v58 = vmul.f32 -1.442695, %v2228_v46 }
 0x555   :  { %4520 = vpow2.f32 %v4056_v47  ;;  %v4057_v35 = vmul.f32 -1.442695, %v2230_v21 }
 0x556   :  { %4522 = vpow2.f32 %v4055_v52  ;;  %v4059_v17 = vmul.f32 -1.442695, %v2232_v56  ;;  %v5564_v52 = vld [vmem:[#allocation6 + $0x48] ss:$16 sps:$4 sm:$0xff]   ;;  %v5568_v56 = vld [vmem:[#allocation6 + $0x6c] ss:$16 sps:$4 sm:$0xff]  }
 0x557   :  { %4524 = vpow2.f32 %v4057_v35  ;;  %v5570_v35 = vld [vmem:[#allocation6 + $0x68] ss:$16 sps:$4 sm:$0xff]  }
 0x558   :  { %4526 = vtanh.f32 %v2227_v37 }
 0x559   :  { %4528 = vpow2.f32 %v4058_v58  ;;  %v5572_v58 = vld [vmem:[#allocation6 + $0x8c] ss:$16 sps:$4 sm:$0xff]  }
 0x55a   :  { %4530 = vtanh.f32 %v2231_v15 }
 0x55e   :  { %v4519_v25 = vpop.eup %4518 }
 0x55f   :  { %v4521_v2 = vpop.eup %4520  ;;  %v2239_v3 = vadd.f32 1.0, %v4519_v25  ;;  %v5576_v25 = vld [vmem:[#allocation6 + $0x88] ss:$16 sps:$4 sm:$0xff]  }
 0x560   :  { %v2251_v5 = vadd.f32 1.0, %v4521_v2  ;;  %v4523_v4 = vpop.eup %4522  ;;  %v5582_v2 = vld [vmem:[#allocation6 + $0xa8] ss:$16 sps:$4 sm:$0xff]  }
 0x561   :  { %4532 = vrcp.f32 %v2239_v3  ;;  %v2240_v36 = vadd.f32 1.0, %v4523_v4  ;;  %v4525_v59 = vpop.eup %4524  ;;  %v5585_v3 = vld [vmem:[#allocation6 + $0xcc] ss:$16 sps:$4 sm:$0xff]   ;;  %v5594_v4 = vld [vmem:[#allocation6 + $0xe8] ss:$16 sps:$4 sm:$0xff]  }
 0x562   :  { %4534 = vrcp.f32 %v2251_v5  ;;  %v2252_v11 = vadd.f32 1.0, %v4525_v59  ;;  %v4527_v34 = vpop.eup %4526  ;;  %v5591_v5 = vld [vmem:[#allocation6 + $0xec] ss:$16 sps:$4 sm:$0xff]  }
 0x563   :  { %4536 = vpow2.f32 %v4059_v17  ;;  %v4529_v63 = vpop.eup %4528  ;;  %v5588_v17 = vld [vmem:[#allocation6 + $0xc8] ss:$16 sps:$4 sm:$0xff]  }
 0x564   :  { %4538 = vrcp.f32 %v2240_v36  ;;  %v4531_v27 = vpop.eup %4530  ;;  %v2265_v7 = vadd.f32 1.0, %v4529_v63  ;;  %v5899_v63 = vld [vmem:[#allocation18_spill] sm:$0xff] }
 0x565   :  { %4540 = vrcp.f32 %v2252_v11 }
 0x566   :  { %4542 = vrcp.f32 %v2265_v7  ;;  %v5901_v7 = vld [vmem:[#allocation20_spill] sm:$0xff] }
 0x56b   :  { %v4533_v48 = vpop.eup %4532 }
 0x56c   :  { %v4535_v26 = vpop.eup %4534  ;;  %v2273_v29 = vmul.f32 %v4533_v48, %v4527_v34 }
 0x56d   :  { %v4537_v55 = vpop.eup %4536  ;;  %v2271_v37 = vmul.f32 %v4535_v26, %v5419_v0  ;;  %v5900_v26 = vld [vmem:[#allocation23_spill] sm:$0xff] }
 0x56e   :  { %v4539_v57 = vpop.eup %4538  ;;  %v2266_v43 = vadd.f32 1.0, %v4537_v55  ;;  %v2315_v55 = vunpack.c.l.bf16 %v5901_v7 }
 0x56f   :  { %v2274_v14 = vmul.f32 %v4539_v57, %v4531_v27  ;;  %v5528_v16 = vadd.f32 %v2273_v29, %v2271_v37  ;;  %v4541_v41 = vpop.eup %4540  ;;  %v2314_v27 = vunpack.c.l.bf16 %v5899_v63  ;;  %v2316_v29 = vunpack.c.l.bf16 %v5900_v26 }
 0x570   :  { %v2272_v44 = vmul.f32 %v4541_v41, %v5423_v9  ;;  %v4543_v28 = vpop.eup %4542  ;;  %v5562_v9 = vld [vmem:[#allocation6 + $0x4c] ss:$16 sps:$4 sm:$0xff]  }
 0x571   :  { %4544 = vtanh.f32 %v5528_v16 }
 0x572   :  { %v5532_v46 = vadd.f32 %v2274_v14, %v2272_v44  ;;  %4546 = vrcp.f32 %v2266_v43  ;;  %v5902_v14 = vld [vmem:[#allocation24_spill] sm:$0xff]  ;;  %v2318_v43 = vunpack.c.h.bf16 %v5899_v63 }
 0x573   :  { %v2317_v41 = vunpack.c.l.bf16 %v5902_v14 }
 0x574   :  { %4548 = vtanh.f32 %v5532_v46 }
 0x57b   :  { %v4545_v40 = vpop.eup %4544 }
 0x57c   :  { %v2279_v45 = vmul.f32 %v4545_v40, %v4543_v28  ;;  %v4547_v0 = vpop.eup %4546 }
 0x57e   :  { %v2291_v8 = vmul.f32 %v5429_v24, %v2279_v45  ;;  %v4549_v47 = vpop.eup %4548 }
 0x57f   :  { %v2280_v15 = vmul.f32 %v4549_v47, %v4547_v0  ;;  %v2320_v0 = vunpack.c.h.bf16 %v5900_v26 }
 0x580   :  { %2293 = vadd.xlane.f32.xlu0 %v2291_v8  ;;  %v2319_v8 = vunpack.c.h.bf16 %v5901_v7 }
 0x581   :  { %v2292_v21 = vmul.f32 %v5429_v24, %v2280_v15  ;;  %v5537_v49 = vpack.c.bf16 %v2280_v15, %v2279_v45 }
 0x583   :  { %5898 = vst [vmem:[#allocation19_spill] sm:$0xff] %v5537_v49  ;;  %2295 = vadd.xlane.f32.xlu1 %v2292_v21  ;;  %2547 = vmatmul.mubr.bf16.vlgmr.msra.gmra.mrb[44].mxu0 %v5537_v49 }
 0x584   :  { %2590 = vmatmul.mubr.bf16.vlgmr.msra.gmra.mrb[60].mxu1 %v5537_v49  ;;  %2890 = vmatpush1.bf16.msra.mxu0 %v5443_v19 }
 0x585   :  { %2933 = vmatpush1.bf16.msra.mxu1 %v5445_v38  ;;  %2891 = vmatprep.subr.bf16.mxu0 %v5451_v10 }
 0x586   :  { %2934 = vmatprep.subr.bf16.mxu1 %v5453_v12  ;;  %2921 = vmatprep.mubr.bf16.mxu0 %v5892_v60 }
 0x587   :  { %2964 = vmatprep.mubr.bf16.mxu1 %v5892_v60 }
 0x588   :  { %2892 = vmatpush1.bf16.msra.mxu0 %v5455_v30 }
 0x589   :  { %2935 = vmatpush1.bf16.msra.mxu1 %v5457_v32  ;;  %2893 = vmatprep.subr.bf16.mxu0 %v5463_v1 }
 0x58a   :  { %2936 = vmatprep.subr.bf16.mxu1 %v5562_v9 }
 0x58c   :  { %2894 = vmatpush1.bf16.msra.mxu0 %v5466_v13 }
 0x58d   :  { %2895 = vmatprep.subr.bf16.mxu0 %v5471_v6  ;;  %2937 = vmatpush1.bf16.msra.mxu1 %v5564_v52 }
 0x58e   :  { %2938 = vmatprep.subr.bf16.mxu1 %v5568_v56 }
 0x590   :  { %2896 = vmatpush1.bf16.msra.mxu0 %v5474_v54 }
 0x591   :  { %2897 = vmatprep.subr.bf16.mxu0 %v5476_v22  ;;  %2939 = vmatpush1.bf16.msra.mxu1 %v5570_v35 }
 0x592   :  { %2940 = vmatprep.subr.bf16.mxu1 %v5572_v58 }
 0x594   :  { %2898 = vmatpush1.bf16.msra.mxu0 %v5481_v33 }
 0x595   :  { %2899 = vmatprep.subr.bf16.mxu0 %v5485_v31  ;;  %2941 = vmatpush1.bf16.msra.mxu1 %v5576_v25 }
 0x598   :  { %2900 = vmatpush1.bf16.msra.mxu0 %v5489_v20 }
 0x599   :  { %2901 = vmatprep.subr.bf16.mxu0 %v5493_v23 }
 0x59c   :  { %2902 = vmatpush1.bf16.msra.mxu0 %v5497_v50 }
 0x59d   :  { %2903 = vmatprep.subr.bf16.mxu0 %v5501_v51 }
 0x5a0   :  { %2904 = vmatpush1.bf16.msra.mxu0 %v5505_v42 }
 0x5a1   :  { %3264 = vmatprep.subr.bf16.mxu0 %v5439_v62  ;;  %v5579_v62 = vld [vmem:[#allocation6 + $0xac] ss:$16 sps:$4 sm:$0xff]  }
 0x5a2   :  { %2942 = vmatprep.subr.bf16.mxu1 %v5579_v62 }
 0x5a3   :  { %2943 = vmatpush1.bf16.msra.mxu1 %v5582_v2 }
 0x5a4   :  { %2944 = vmatprep.subr.bf16.mxu1 %v5585_v3 }
 0x5a7   :  { %2945 = vmatpush1.bf16.msra.mxu1 %v5588_v17 }
 0x5a8   :  { %2946 = vmatprep.subr.bf16.mxu1 %v5591_v5 }
 0x5ab   :  { %2947 = vmatpush1.bf16.msra.mxu1 %v5594_v4 }
 0x5ac   :  { %3307 = vmatprep.subr.bf16.mxu1 %v5441_v53 }
 0x60d   :  { %v2294_v36 = vpop.xlane.xlu0 %2293 }
 0x60e   :  { %v2304_v59 = vadd.f32 %v5509_v39, %v2294_v36 }
 0x610   :  { %2307 = vst.msk [vmem:[#allocation4 + $0x40] sm:$0xff] %vm806_vm3, %v2304_v59  ;;  %v2296_v11 = vpop.xlane.xlu1 %2295 }
 0x611   :  { %v2305_v34 = vadd.f32 %v5509_v39, %v2296_v11  ;;  %v2321_v11 = vunpack.c.h.bf16 %v5902_v14 }
 0x613   :  { %2308 = vst.msk [vmem:[#allocation4 + $0x48] sm:$0xff] %vm806_vm3, %v2305_v34 }
 0x656   :  { %v2548_v48 = vpop.f32.mrb[44].mxu0 }
 0x657   :  { %v2600_v37 = vadd.f32 %v2548_v48, %v2314_v27  ;;  %v2591_v57 = vpop.f32.mrb[60].mxu1  ;;  %v2550_v53 = vpop.f32.mrb[45].mxu0 }
 0x658   :  { %v2602_v44 = vadd.f32 %v2591_v57, %v2316_v29  ;;  %v2601_v28 = vadd.f32 %v2550_v53, %v2315_v55  ;;  %v2593_v40 = vpop.f32.mrb[61].mxu1  ;;  %v2552_v45 = vpop.f32.mrb[46].mxu0 }
 0x659   :  { %v4094_v47 = vmul.f32 -1.442695, %v2600_v37  ;;  %v2603_v15 = vadd.f32 %v2593_v40, %v2317_v41  ;;  %v2604_v21 = vadd.f32 %v2552_v45, %v2318_v43  ;;  %v2595_v36 = vpop.f32.mrb[62].mxu1  ;;  %v2554_v59 = vpop.f32.mrb[47].mxu0 }
 0x65a   :  { %v4096_v34 = vmul.f32 -1.442695, %v2601_v28  ;;  %v2606_v27 = vadd.f32 %v2595_v36, %v2320_v0  ;;  %v2605_v48 = vadd.f32 %v2554_v59, %v2319_v8  ;;  %v2597_v49 = vpop.f32.mrb[63].mxu1 }
 0x65b   :  { %4550 = vpow2.f32 %v4094_v47  ;;  %v4095_v63 = vmul.f32 -1.442695, %v2604_v21  ;;  %v2607_v29 = vadd.f32 %v2597_v49, %v2321_v11  ;;  %v4098_v26 = vmul.f32 -1.442695, %v2603_v15 }
 0x65c   :  { %4552 = vpow2.f32 %v4096_v34  ;;  %v4097_v55 = vmul.f32 -1.442695, %v2605_v48 }
 0x65d   :  { %4554 = vpow2.f32 %v4095_v63  ;;  %v4099_v53 = vmul.f32 -1.442695, %v2607_v29 }
 0x65e   :  { %4556 = vpow2.f32 %v4097_v55 }
 0x65f   :  { %4558 = vtanh.f32 %v2602_v44 }
 0x660   :  { %4560 = vpow2.f32 %v4098_v26 }
 0x661   :  { %4562 = vtanh.f32 %v2606_v27 }
 0x665   :  { %v4551_v7 = vpop.eup %4550 }
 0x666   :  { %v4553_v37 = vpop.eup %4552  ;;  %v2614_v57 = vadd.f32 1.0, %v4551_v7 }
 0x667   :  { %v2626_v41 = vadd.f32 1.0, %v4553_v37  ;;  %v4555_v14 = vpop.eup %4554 }
 0x668   :  { %4564 = vrcp.f32 %v2614_v57  ;;  %v2615_v43 = vadd.f32 1.0, %v4555_v14  ;;  %v4557_v28 = vpop.eup %4556 }
 0x669   :  { %4566 = vrcp.f32 %v2626_v41  ;;  %v2627_v49 = vadd.f32 1.0, %v4557_v28  ;;  %v4559_v40 = vpop.eup %4558 }
 0x66a   :  { %4568 = vpow2.f32 %v4099_v53  ;;  %v4561_v45 = vpop.eup %4560 }
 0x66b   :  { %4570 = vrcp.f32 %v2615_v43  ;;  %v4563_v0 = vpop.eup %4562  ;;  %v2640_v15 = vadd.f32 1.0, %v4561_v45 }
 0x66c   :  { %4572 = vrcp.f32 %v2627_v49 }
 0x66d   :  { %4574 = vrcp.f32 %v2640_v15 }
 0x672   :  { %v4565_v8 = vpop.eup %4564 }
 0x673   :  { %v4567_v44 = vpop.eup %4566  ;;  %v2648_v47 = vmul.f32 %v4565_v8, %v4559_v40 }
 0x674   :  { %v4569_v21 = vpop.eup %4568  ;;  %v2646_v36 = vmul.f32 %v4567_v44, %v5528_v16 }
 0x675   :  { %v4571_v59 = vpop.eup %4570  ;;  %v2641_v48 = vadd.f32 1.0, %v4569_v21 }
 0x676   :  { %v2649_v11 = vmul.f32 %v4571_v59, %v4563_v0  ;;  %v5612_v34 = vadd.f32 %v2648_v47, %v2646_v36  ;;  %v4573_v27 = vpop.eup %4572 }
 0x677   :  { %v2647_v63 = vmul.f32 %v4573_v27, %v5532_v46  ;;  %v4575_v55 = vpop.eup %4574 }
 0x678   :  { %4576 = vtanh.f32 %v5612_v34 }
 0x679   :  { %v5616_v29 = vadd.f32 %v2649_v11, %v2647_v63  ;;  %4578 = vrcp.f32 %v2641_v48 }
 0x67b   :  { %4580 = vtanh.f32 %v5616_v29 }
 0x682   :  { %v4577_v26 = vpop.eup %4576 }
 0x683   :  { %v2654_v7 = vmul.f32 %v4577_v26, %v4575_v55  ;;  %v4579_v16 = vpop.eup %4578 }
 0x685   :  { %v2666_v37 = vmul.f32 %v5429_v24, %v2654_v7  ;;  %v4581_v57 = vpop.eup %4580 }
 0x686   :  { %v2655_v53 = vmul.f32 %v4581_v57, %v4579_v16 }
 0x687   :  { %2668 = vadd.xlane.f32.xlu0 %v2666_v37 }
 0x688   :  { %v2667_v41 = vmul.f32 %v5429_v24, %v2655_v53  ;;  %v5621_v14 = vpack.c.bf16 %v2655_v53, %v2654_v7 }
 0x68a   :  { %2670 = vadd.xlane.f32.xlu1 %v2667_v41  ;;  %2922 = vmatmul.mubr.bf16.vlgmr.msra.gmra.mrb[48].mxu0 %v5621_v14 }
 0x68b   :  { %2965 = vmatmul.mubr.bf16.vlgmr.msra.gmra.mrb[64].mxu1 %v5621_v14  ;;  %3265 = vmatpush1.bf16.msra.mxu0 %v5443_v19 }
 0x68c   :  { %3308 = vmatpush1.bf16.msra.mxu1 %v5445_v38  ;;  %3266 = vmatprep.subr.bf16.mxu0 %v5451_v10  ;;  %v5903_v10 = vld [vmem:[#allocation12_spill] sm:$0xff] }
 0x68d   :  { %3309 = vmatprep.subr.bf16.mxu1 %v5453_v12  ;;  %3296 = vmatprep.mubr.bf16.mxu0 %v5892_v60  ;;  %v2689_v12 = vunpack.c.l.bf16 %v5903_v10 }
 0x68e   :  { %3339 = vmatprep.mubr.bf16.mxu1 %v5892_v60 }
 0x68f   :  { %3267 = vmatpush1.bf16.msra.mxu0 %v5455_v30 }
 0x690   :  { %3310 = vmatpush1.bf16.msra.mxu1 %v5457_v32  ;;  %3268 = vmatprep.subr.bf16.mxu0 %v5463_v1  ;;  %v5904_v32 = vld [vmem:[#allocation25_spill] sm:$0xff] }
 0x691   :  { %3311 = vmatprep.subr.bf16.mxu1 %v5562_v9  ;;  %v2691_v1 = vunpack.c.l.bf16 %v5904_v32  ;;  %v2695_v46 = vunpack.c.h.bf16 %v5904_v32 }
 0x693   :  { %3269 = vmatpush1.bf16.msra.mxu0 %v5466_v13  ;;  %v5905_v13 = vld [vmem:[#allocation13_spill] sm:$0xff] }
 0x694   :  { %3312 = vmatpush1.bf16.msra.mxu1 %v5564_v52  ;;  %3270 = vmatprep.subr.bf16.mxu0 %v5471_v6  ;;  %v2690_v6 = vunpack.c.l.bf16 %v5905_v13  ;;  %v2694_v9 = vunpack.c.h.bf16 %v5905_v13 }
 0x695   :  { %3313 = vmatprep.subr.bf16.mxu1 %v5568_v56 }
 0x697   :  { %3271 = vmatpush1.bf16.msra.mxu0 %v5474_v54 }
 0x698   :  { %3314 = vmatpush1.bf16.msra.mxu1 %v5570_v35  ;;  %3272 = vmatprep.subr.bf16.mxu0 %v5476_v22 }
 0x699   :  { %3315 = vmatprep.subr.bf16.mxu1 %v5572_v58 }
 0x69b   :  { %3273 = vmatpush1.bf16.msra.mxu0 %v5481_v33 }
 0x69c   :  { %3316 = vmatpush1.bf16.msra.mxu1 %v5576_v25  ;;  %3274 = vmatprep.subr.bf16.mxu0 %v5485_v31  ;;  %v5906_v31 = vld [vmem:[#allocation26_spill] sm:$0xff] }
 0x69d   :  { %3317 = vmatprep.subr.bf16.mxu1 %v5579_v62  ;;  %v2696_v62 = vunpack.c.h.bf16 %v5906_v31 }
 0x69f   :  { %3275 = vmatpush1.bf16.msra.mxu0 %v5489_v20  ;;  %v2692_v20 = vunpack.c.l.bf16 %v5906_v31 }
 0x6a0   :  { %3318 = vmatpush1.bf16.msra.mxu1 %v5582_v2  ;;  %3276 = vmatprep.subr.bf16.mxu0 %v5493_v23  ;;  %v2693_v23 = vunpack.c.h.bf16 %v5903_v10 }
 0x6a1   :  { %3319 = vmatprep.subr.bf16.mxu1 %v5585_v3 }
 0x6a3   :  { %3277 = vmatpush1.bf16.msra.mxu0 %v5497_v50 }
 0x6a4   :  { %3320 = vmatpush1.bf16.msra.mxu1 %v5588_v17  ;;  %3278 = vmatprep.subr.bf16.mxu0 %v5501_v51 }
 0x6a5   :  { %3321 = vmatprep.subr.bf16.mxu1 %v5591_v5 }
 0x6a7   :  { %3279 = vmatpush1.bf16.msra.mxu0 %v5505_v42 }
 0x6a8   :  { %3322 = vmatpush1.bf16.msra.mxu1 %v5594_v4 }
 0x714   :  { %v2669_v60 = vpop.xlane.xlu0 %2668 }
 0x715   :  { %v2679_v24 = vadd.f32 %v5509_v39, %v2669_v60 }
 0x717   :  { %2682 = vst.msk [vmem:[#allocation4 + $0x50] sm:$0xff] %vm806_vm3, %v2679_v24  ;;  %v2671_v19 = vpop.xlane.xlu1 %2670 }
 0x718   :  { %v2680_v38 = vadd.f32 %v5509_v39, %v2671_v19 }
 0x71a   :  { %2683 = vst.msk [vmem:[#allocation4 + $0x58] sm:$0xff] %vm806_vm3, %v2680_v38 }
 0x75d   :  { %v2923_v30 = vpop.f32.mrb[48].mxu0 }
 0x75e   :  { %v2975_v54 = vadd.f32 %v2923_v30, %v2689_v12  ;;  %v2966_v22 = vpop.f32.mrb[64].mxu1  ;;  %v2925_v33 = vpop.f32.mrb[49].mxu0 }
 0x75f   :  { %v2977_v50 = vadd.f32 %v2966_v22, %v2691_v1  ;;  %v2976_v51 = vadd.f32 %v2925_v33, %v2690_v6  ;;  %v2968_v42 = vpop.f32.mrb[65].mxu1  ;;  %v2927_v39 = vpop.f32.mrb[50].mxu0 }
 0x760   :  { %v4134_v52 = vmul.f32 -1.442695, %v2975_v54  ;;  %v2978_v56 = vadd.f32 %v2968_v42, %v2692_v20  ;;  %v2979_v35 = vadd.f32 %v2927_v39, %v2693_v23  ;;  %v2970_v58 = vpop.f32.mrb[66].mxu1  ;;  %v2929_v25 = vpop.f32.mrb[51].mxu0  ;;  %v5688_v54 = vld [vmem:[#allocation5] ss:$0 sm:$0xff] }
 0x761   :  { %v4136_v2 = vmul.f32 -1.442695, %v2976_v51  ;;  %v2981_v3 = vadd.f32 %v2970_v58, %v2695_v46  ;;  %v2980_v17 = vadd.f32 %v2929_v25, %v2694_v9  ;;  %v2972_v5 = vpop.f32.mrb[67].mxu1  ;;  %v5907_v23 = vld [vmem:[#allocation14_spill] sm:$0xff]  ;;  %v5908_v42 = vld [vmem:[#allocation27_spill] sm:$0xff]  ;;  %v5910_v58 = vld [vmem:[#allocation28_spill] sm:$0xff] }
 0x762   :  { %4582 = vpow2.f32 %v4134_v52  ;;  %v4135_v4 = vmul.f32 -1.442695, %v2979_v35  ;;  %v2982_v43 = vadd.f32 %v2972_v5, %v2696_v62  ;;  %v4138_v49 = vmul.f32 -1.442695, %v2978_v56  ;;  %v5909_v46 = vld [vmem:[#allocation15_spill] sm:$0xff] }
 0x763   :  { %4584 = vpow2.f32 %v4136_v2  ;;  %v4137_v28 = vmul.f32 -1.442695, %v2980_v17  ;;  %v3066_v39 = vunpack.c.l.bf16 %v5908_v42  ;;  %v3065_v9 = vunpack.c.l.bf16 %v5909_v46 }
 0x764   :  { %4586 = vpow2.f32 %v4135_v4  ;;  %v4139_v8 = vmul.f32 -1.442695, %v2982_v43  ;;  %v3067_v25 = vunpack.c.l.bf16 %v5910_v58  ;;  %v3068_v62 = vunpack.c.h.bf16 %v5907_v23 }
 0x765   :  { %4588 = vpow2.f32 %v4137_v28  ;;  %v3070_v4 = vunpack.c.h.bf16 %v5908_v42  ;;  %v3069_v43 = vunpack.c.h.bf16 %v5909_v46 }
 0x766   :  { %4590 = vtanh.f32 %v2977_v50  ;;  %v3064_v50 = vunpack.c.l.bf16 %v5907_v23 }
 0x767   :  { %4592 = vpow2.f32 %v4138_v49 }
 0x768   :  { %4594 = vtanh.f32 %v2981_v3 }
 0x76c   :  { %v4583_v40 = vpop.eup %4582 }
 0x76d   :  { %v4585_v45 = vpop.eup %4584  ;;  %v2989_v0 = vadd.f32 1.0, %v4583_v40 }
 0x76e   :  { %v3001_v44 = vadd.f32 1.0, %v4585_v45  ;;  %v4587_v47 = vpop.eup %4586 }
 0x76f   :  { %4596 = vrcp.f32 %v2989_v0  ;;  %v2990_v15 = vadd.f32 1.0, %v4587_v47  ;;  %v4589_v21 = vpop.eup %4588 }
 0x770   :  { %4598 = vrcp.f32 %v3001_v44  ;;  %v3002_v36 = vadd.f32 1.0, %v4589_v21  ;;  %v4591_v59 = vpop.eup %4590 }
 0x771   :  { %4600 = vpow2.f32 %v4139_v8  ;;  %v4593_v11 = vpop.eup %4592  ;;  %v3071_v8 = vunpack.c.h.bf16 %v5910_v58 }
 0x772   :  { %4602 = vrcp.f32 %v2990_v15  ;;  %v4595_v27 = vpop.eup %4594  ;;  %v3015_v26 = vadd.f32 1.0, %v4593_v11 }
 0x773   :  { %4604 = vrcp.f32 %v3002_v36 }
 0x774   :  { %4606 = vrcp.f32 %v3015_v26 }
 0x779   :  { %v4597_v48 = vpop.eup %4596 }
 0x77a   :  { %v4599_v63 = vpop.eup %4598  ;;  %v3023_v55 = vmul.f32 %v4597_v48, %v4591_v59 }
 0x77b   :  { %v4601_v7 = vpop.eup %4600  ;;  %v3021_v16 = vmul.f32 %v4599_v63, %v5612_v34  ;;  %v5680_v34 = vld [vmem:[%s5843_s4] ss:$0 sm:$0xff] }
 0x77c   :  { %v4603_v37 = vpop.eup %4602  ;;  %v3016_v60 = vadd.f32 1.0, %v4601_v7 }
 0x77d   :  { %v3024_v57 = vmul.f32 %v4603_v37, %v4595_v27  ;;  %v5670_v53 = vadd.f32 %v3023_v55, %v3021_v16  ;;  %v4605_v41 = vpop.eup %4604 }
 0x77e   :  { %v3022_v24 = vmul.f32 %v4605_v41, %v5616_v29  ;;  %v4607_v38 = vpop.eup %4606 }
 0x77f   :  { %4608 = vtanh.f32 %v5670_v53 }
 0x780   :  { %v5674_v19 = vadd.f32 %v3024_v57, %v3022_v24  ;;  %4610 = vrcp.f32 %v3016_v60 }
 0x782   :  { %4612 = vtanh.f32 %v5674_v19 }
 0x789   :  { %v4609_v10 = vpop.eup %4608 }
 0x78a   :  { %v3029_v12 = vmul.f32 %v4609_v10, %v4607_v38  ;;  %v4611_v30 = vpop.eup %4610 }
 0x78c   :  { %v3041_v32 = vmul.f32 %v5680_v34, %v3029_v12  ;;  %v4613_v1 = vpop.eup %4612 }
 0x78d   :  { %v3030_v29 = vmul.f32 %v4613_v1, %v4611_v30 }
 0x78e   :  { %3043 = vadd.xlane.f32.xlu0 %v3041_v32 }
 0x78f   :  { %v3042_v13 = vmul.f32 %v5680_v34, %v3030_v29  ;;  %v5684_v6 = vpack.c.bf16 %v3030_v29, %v3029_v12 }
 0x791   :  { %3045 = vadd.xlane.f32.xlu1 %v3042_v13  ;;  %3297 = vmatmul.mubr.bf16.vlgmr.msra.gmra.mrb[52].mxu0 %v5684_v6 }
 0x792   :  { %3340 = vmatmul.mubr.bf16.vlgmr.msra.gmra.mrb[68].mxu1 %v5684_v6 }
 0x81b   :  { %v3044_v22 = vpop.xlane.xlu0 %3043 }
 0x81c   :  { %v3054_v33 = vadd.f32 %v5688_v54, %v3044_v22 }
 0x81e   :  { %3057 = vst.msk [vmem:[#allocation4 + $0x60] sm:$0xff] %vm806_vm3, %v3054_v33  ;;  %v3046_v31 = vpop.xlane.xlu1 %3045 }
 0x81f   :  { %v3055_v20 = vadd.f32 %v5688_v54, %v3046_v31 }
 0x821   :  { %3058 = vst.msk [vmem:[#allocation4 + $0x68] sm:$0xff] %vm806_vm3, %v3055_v20 }
 0x864   :  { %v3298_v51 = vpop.f32.mrb[52].mxu0 }
 0x865   :  { %v3350_v52 = vadd.f32 %v3298_v51, %v3064_v50  ;;  %v3341_v56 = vpop.f32.mrb[68].mxu1  ;;  %v3300_v35 = vpop.f32.mrb[53].mxu0 }
 0x866   :  { %v3352_v2 = vadd.f32 %v3341_v56, %v3066_v39  ;;  %v3351_v3 = vadd.f32 %v3300_v35, %v3065_v9  ;;  %v3343_v17 = vpop.f32.mrb[69].mxu1  ;;  %v3302_v5 = vpop.f32.mrb[54].mxu0 }
 0x867   :  { %v4174_v28 = vmul.f32 -1.442695, %v3350_v52  ;;  %v3353_v49 = vadd.f32 %v3343_v17, %v3067_v25  ;;  %v3354_v40 = vadd.f32 %v3302_v5, %v3068_v62  ;;  %v3345_v45 = vpop.f32.mrb[70].mxu1  ;;  %v3304_v0 = vpop.f32.mrb[55].mxu0  ;;  %v3438_v25 = vld [vmem:[#allocation4 + $0x20] sm:$0xff]  ;;  %v3440_v62 = vld [vmem:[#allocation4 + $0x30] sm:$0xff] }
 0x868   :  { %v4176_v44 = vmul.f32 -1.442695, %v3351_v3  ;;  %v3356_v47 = vadd.f32 %v3345_v45, %v3070_v4  ;;  %v3355_v15 = vadd.f32 %v3304_v0, %v3069_v43  ;;  %v3347_v21 = vpop.f32.mrb[71].mxu1  ;;  %v3436_v17 = vld [vmem:[#allocation4 + $0x10] sm:$0xff]  ;;  %v3442_v5 = vld [vmem:[#allocation4 + $0x40] sm:$0xff] }
 0x869   :  { %4614 = vpow2.f32 %v4174_v28  ;;  %v4175_v36 = vmul.f32 -1.442695, %v3354_v40  ;;  %v3357_v59 = vadd.f32 %v3347_v21, %v3071_v8  ;;  %v4178_v27 = vmul.f32 -1.442695, %v3353_v49  ;;  %v3444_v4 = vld [vmem:[#allocation4 + $0x50] sm:$0xff]  ;;  %v3446_v49 = vld [vmem:[#allocation4 + $0x60] sm:$0xff] }
 0x86a   :  { %4616 = vpow2.f32 %v4176_v44  ;;  %v4177_v11 = vmul.f32 -1.442695, %v3355_v15  ;;  %v3452_v28 = vsel %vm806_vm3, %v3438_v25, -inf  ;;  %v3451_v45 = vsel %vm806_vm3, %v3436_v17, -inf  ;;  %v5718_v44 = vld [vmem:[#allocation4 + $0x28] sm:$0xff] }
 0x86b   :  { %4618 = vpow2.f32 %v4175_v36  ;;  %v4179_v26 = vmul.f32 -1.442695, %v3357_v59  ;;  %v3456_v0 = vsel %vm806_vm3, %v3442_v5, -inf  ;;  %v3458_v8 = vsel %vm806_vm3, %v3444_v4, -inf  ;;  %v3435_v21 = vld [vmem:[#allocation4 + $0x8] sm:$0xff]  ;;  %v3437_v36 = vld [vmem:[#allocation4 + $0x18] sm:$0xff] }
 0x86c   :  { %4620 = vpow2.f32 %v4177_v11  ;;  %v3460_v59 = vsel %vm806_vm3, %v3446_v49, -inf  ;;  %v5723_v11 = vld [vmem:[#allocation4 + $0x48] sm:$0xff] }
 0x86d   :  { %4622 = vtanh.f32 %v3352_v2  ;;  %v3434_v2 = vld [vmem:[#allocation4] sm:$0xff] }
 0x86e   :  { %4624 = vpow2.f32 %v4178_v27  ;;  %v3450_v40 = vsel %vm806_vm3, %v3434_v2, -inf  ;;  %v5725_v27 = vld [vmem:[#allocation4 + $0x58] sm:$0xff] }
 0x86f   :  { %4626 = vtanh.f32 %v3356_v47  ;;  %v5720_v47 = vld [vmem:[#allocation4 + $0x38] sm:$0xff] }
 0x873   :  { %v4615_v48 = vpop.eup %4614 }
 0x874   :  { %v4617_v63 = vpop.eup %4616  ;;  %v3364_v55 = vadd.f32 1.0, %v4615_v48 }
 0x875   :  { %v3376_v7 = vadd.f32 1.0, %v4617_v63  ;;  %v4619_v16 = vpop.eup %4618 }
 0x876   :  { %4628 = vrcp.f32 %v3364_v55  ;;  %v3365_v37 = vadd.f32 1.0, %v4619_v16  ;;  %v4621_v57 = vpop.eup %4620 }
 0x877   :  { %4630 = vrcp.f32 %v3376_v7  ;;  %v3377_v41 = vadd.f32 1.0, %v4621_v57  ;;  %v4623_v60 = vpop.eup %4622  ;;  %v3469_v7 = vsel %vm806_vm3, %v5720_v47, -inf  ;;  %v3465_v57 = vsel %vm806_vm3, %v3435_v21, -inf }
 0x878   :  { %4632 = vpow2.f32 %v4179_v26  ;;  %v4625_v24 = vpop.eup %4624  ;;  %v3467_v26 = vsel %vm806_vm3, %v5718_v44, -inf }
 0x879   :  { %4634 = vrcp.f32 %v3365_v37  ;;  %v4627_v38 = vpop.eup %4626  ;;  %v3390_v32 = vadd.f32 1.0, %v4625_v24  ;;  %v5732_v37 = vld [vmem:[#allocation4 + $0x68] sm:$0xff] }
 0x87a   :  { %4636 = vrcp.f32 %v3377_v41  ;;  %v3466_v41 = vsel %vm806_vm3, %v3437_v36, -inf }
 0x87b   :  { %4638 = vrcp.f32 %v3390_v32 }
 0x880   :  { %v4629_v10 = vpop.eup %4628 }
 0x881   :  { %v4631_v12 = vpop.eup %4630  ;;  %v3398_v30 = vmul.f32 %v4629_v10, %v4623_v60  ;;  %v3473_v10 = vsel %vm806_vm3, %v5725_v27, -inf }
 0x882   :  { %v4633_v1 = vpop.eup %4632  ;;  %v3396_v29 = vmul.f32 %v4631_v12, %v5670_v53  ;;  %v3468_v12 = vmax.f32 %v3465_v57, %v3467_v26 }
 0x883   :  { %v4635_v13 = vpop.eup %4634  ;;  %v3391_v20 = vadd.f32 1.0, %v4633_v1 }
 0x884   :  { %v3399_v22 = vmul.f32 %v4635_v13, %v4627_v38  ;;  %v3400_v33 = vadd.f32 %v3398_v30, %v3396_v29  ;;  %v4637_v31 = vpop.eup %4636  ;;  %v3471_v38 = vsel %vm806_vm3, %v5723_v11, -inf  ;;  %v3470_v30 = vmax.f32 %v3466_v41, %v3469_v7 }
 0x885   :  { %v3397_v23 = vmul.f32 %v4637_v31, %v5674_v19  ;;  %v4639_v51 = vpop.eup %4638  ;;  %v3475_v29 = vsel %vm806_vm3, %v5732_v37, -inf  ;;  %v3472_v13 = vmax.f32 %v3468_v12, %v3471_v38 }
 0x886   :  { %4640 = vtanh.f32 %v3400_v33 }
 0x887   :  { %v3401_v50 = vadd.f32 %v3399_v22, %v3397_v23  ;;  %4642 = vrcp.f32 %v3391_v20  ;;  %v3474_v22 = vmax.f32 %v3470_v30, %v3473_v10 }
 0x889   :  { %4644 = vtanh.f32 %v3401_v50 }
 0x890   :  { %v4641_v42 = vpop.eup %4640 }
 0x891   :  { %v3404_v39 = vmul.f32 %v4641_v42, %v4639_v51  ;;  %v4643_v46 = vpop.eup %4642 }
 0x893   :  { %v3416_v9 = vmul.f32 %v5680_v34, %v3404_v39  ;;  %v4645_v52 = vpop.eup %4644 }
 0x894   :  { %v3405_v53 = vmul.f32 %v4645_v52, %v4643_v46  ;;  %v3476_v46 = vmax.f32 %v3472_v13, %v3475_v29 }
 0x895   :  { %3418 = vadd.xlane.f32.xlu0 %v3416_v9 }
 0x896   :  { %v3417_v56 = vmul.f32 %v5680_v34, %v3405_v53  ;;  %v5706_v35 = vpack.c.bf16 %v3405_v53, %v3404_v39  ;;  %v3454_v34 = vsel %vm806_vm3, %v3440_v62, -inf }
 0x897   :  { %v3455_v15 = vmax.f32 %v3451_v45, %v3454_v34 }
 0x898   :  { %3420 = vadd.xlane.f32.xlu1 %v3417_v56 }
 0x899   :  { %v3459_v55 = vmax.f32 %v3455_v15, %v3458_v8 }
 0x922   :  { %v3419_v58 = vpop.xlane.xlu0 %3418 }
 0x923   :  { %v3429_v19 = vadd.f32 %v5688_v54, %v3419_v58 }
 0x925   :  { %3432 = vst.msk [vmem:[#allocation4 + $0x70] sm:$0xff] %vm806_vm3, %v3429_v19  ;;  %v3421_v3 = vpop.xlane.xlu1 %3420 }
 0x926   :  { %v3430_v43 = vadd.f32 %v5688_v54, %v3421_v3  ;;  %v3453_v54 = vmax.f32 %v3450_v40, %v3452_v28 }
 0x928   :  { %3433 = vst.msk [vmem:[#allocation4 + $0x78] sm:$0xff] %vm806_vm3, %v3430_v43  ;;  %v3457_v63 = vmax.f32 %v3453_v54, %v3456_v0 }
 0x92a   :  { %v3461_v60 = vmax.f32 %v3457_v63, %v3460_v59 }
 0x92c   :  { %v3448_v48 = vld [vmem:[#allocation4 + $0x70] sm:$0xff] }
 0x92d   :  { %v3462_v16 = vsel %vm806_vm3, %v3448_v48, -inf }
 0x92e   :  { %v3463_v24 = vmax.f32 %v3459_v55, %v3462_v16 }
 0x92f   :  { %v5740_v1 = vld [vmem:[#allocation4 + $0x78] sm:$0xff] }
 0x930   :  { %v3464_v32 = vmax.f32 %v3461_v60, %v3463_v24  ;;  %v3477_v33 = vsel %vm806_vm3, %v5740_v1, -inf }
 0x931   :  { %v3478_v56 = vmax.f32 %v3474_v22, %v3477_v33 }
 0x932   :  { %v3480_v31 = vsub.f32 %v3434_v2, %v3464_v32  ;;  %v3482_v20 = vsub.f32 %v3436_v17, %v3464_v32  ;;  %v3484_v23 = vsub.f32 %v3438_v25, %v3464_v32  ;;  %v3486_v50 = vsub.f32 %v3440_v62, %v3464_v32 }
 0x933   :  { %v3488_v51 = vsub.f32 %v3442_v5, %v3464_v32  ;;  %v3490_v42 = vsub.f32 %v3444_v4, %v3464_v32  ;;  %v3492_v39 = vsub.f32 %v3446_v49, %v3464_v32  ;;  %v3494_v58 = vsub.f32 %v3448_v48, %v3464_v32 }
 0x934   :  { %v3496_v9 = vmul.f32 1.442695, %v3480_v31  ;;  %v3500_v52 = vmul.f32 1.442695, %v3482_v20  ;;  %v3504_v53 = vmul.f32 1.442695, %v3484_v23  ;;  %v3479_v43 = vmax.f32 %v3476_v46, %v3478_v56 }
 0x935   :  { %v3508_v19 = vmul.f32 1.442695, %v3486_v50  ;;  %v3512_v3 = vmul.f32 1.442695, %v3488_v51  ;;  %v3516_v28 = vmul.f32 1.442695, %v3490_v42 }
 0x936   :  { %4646 = vpow2.f32 %v3496_v9  ;;  %v3520_v34 = vmul.f32 1.442695, %v3492_v39  ;;  %v3481_v2 = vsub.f32 %v3435_v21, %v3479_v43  ;;  %v3483_v25 = vsub.f32 %v3437_v36, %v3479_v43 }
 0x937   :  { %4648 = vpow2.f32 %v3500_v52  ;;  %v3485_v62 = vsub.f32 %v5718_v44, %v3479_v43  ;;  %v3524_v17 = vmul.f32 1.442695, %v3494_v58  ;;  %v3487_v5 = vsub.f32 %v5720_v47, %v3479_v43 }
 0x938   :  { %4650 = vpow2.f32 %v3504_v53  ;;  %v3498_v4 = vmul.f32 1.442695, %v3481_v2  ;;  %v3489_v49 = vsub.f32 %v5723_v11, %v3479_v43  ;;  %v3502_v40 = vmul.f32 1.442695, %v3483_v25 }
 0x939   :  { %4652 = vpow2.f32 %v3508_v19  ;;  %v3506_v45 = vmul.f32 1.442695, %v3485_v62  ;;  %v3491_v0 = vsub.f32 %v5725_v27, %v3479_v43  ;;  %v3510_v8 = vmul.f32 1.442695, %v3487_v5 }
 0x93a   :  { %4654 = vpow2.f32 %v3512_v3  ;;  %v3493_v54 = vsub.f32 %v5732_v37, %v3479_v43  ;;  %v3514_v44 = vmul.f32 1.442695, %v3489_v49  ;;  %v3495_v36 = vsub.f32 %v5740_v1, %v3479_v43 }
 0x93b   :  { %4656 = vpow2.f32 %v3516_v28  ;;  %v3518_v59 = vmul.f32 1.442695, %v3491_v0 }
 0x93c   :  { %4658 = vpow2.f32 %v3520_v34  ;;  %v3522_v55 = vmul.f32 1.442695, %v3493_v54  ;;  %v3526_v57 = vmul.f32 1.442695, %v3495_v36 }
 0x93d   :  { %4660 = vpow2.f32 %v3524_v17 }
 0x93e   :  { %4662 = vpow2.f32 %v3498_v4 }
 0x93f   :  { %4664 = vpow2.f32 %v3502_v40 }
 0x940   :  { %v4647_v15 = vpop.eup %4646  ;;  %4666 = vpow2.f32 %v3506_v45 }
 0x941   :  { %v4649_v47 = vpop.eup %4648  ;;  %v3528_v21 = vsel %vm806_vm3, %v4647_v15, 0.0  ;;  %4668 = vpow2.f32 %v3510_v8 }
 0x942   :  { %v4651_v11 = vpop.eup %4650  ;;  %v3529_v48 = vsel %vm806_vm3, %v4649_v47, 0.0  ;;  %4670 = vpow2.f32 %v3514_v44 }
 0x943   :  { %v4653_v63 = vpop.eup %4652  ;;  %v3530_v27 = vadd.f32 %v3529_v48, %v3528_v21  ;;  %v3531_v7 = vsel %vm806_vm3, %v4651_v11, 0.0  ;;  %4672 = vpow2.f32 %v3518_v59  ;;  %v4383_v48 = vld [vmem:[%s5845_s6 + $0x8] sm:$0xff]  }
 0x944   :  { %v4655_v26 = vpop.eup %4654  ;;  %v3533_v60 = vsel %vm806_vm3, %v4653_v63, 0.0  ;;  %4674 = vpow2.f32 %v3522_v55 }
 0x945   :  { %v4657_v16 = vpop.eup %4656  ;;  %v3532_v37 = vadd.f32 %v3531_v7, %v3530_v27  ;;  %v3535_v12 = vsel %vm806_vm3, %v4655_v26, 0.0  ;;  %4676 = vpow2.f32 %v3526_v57  ;;  %v4384_v27 = vld [vmem:[%s5845_s6 + $0x10] sm:$0xff]  }
 0x946   :  { %v5755_v41 = vpop.eup %4658  ;;  %v3537_v13 = vsel %vm806_vm3, %v4657_v16, 0.0 }
 0x947   :  { %v5758_v24 = vpop.eup %4660  ;;  %v3534_v38 = vadd.f32 %v3533_v60, %v3532_v37  ;;  %v3539_v23 = vsel %vm806_vm3, %v5755_v41, 0.0  ;;  %v4387_v60 = vld [vmem:[%s5845_s6 + $0x28] sm:$0xff]  }
 0x948   :  { %v4663_v10 = vpop.eup %4662  ;;  %v3541_v46 = vsel %vm806_vm3, %v5758_v24, 0.0 }
 0x949   :  { %v4665_v30 = vpop.eup %4664  ;;  %v3536_v32 = vadd.f32 %v3535_v12, %v3534_v38  ;;  %v3543_v1 = vsel %vm806_vm3, %v4663_v10, 0.0  ;;  %v4388_v38 = vld [vmem:[%s5845_s6 + $0x30] sm:$0xff]   ;;  %v5912_v12 = vld [vmem:[#allocation30_spill] sm:$0xff] }
 0x94a   :  { %v5762_v29 = vpop.eup %4666  ;;  %v3544_v22 = vsel %vm806_vm3, %v4665_v30, 0.0 }
 0x94b   :  { %v5766_v33 = vpop.eup %4668  ;;  %v3538_v31 = vadd.f32 %v3537_v13, %v3536_v32  ;;  %v3545_v20 = vadd.f32 %v3544_v22, %v3543_v1  ;;  %v3546_v50 = vsel %vm806_vm3, %v5762_v29, 0.0 }
 0x94c   :  { %v4671_v51 = vpop.eup %4670  ;;  %v3548_v9 = vsel %vm806_vm3, %v5766_v33, 0.0 }
 0x94d   :  { %v3540_v42 = vadd.f32 %v3539_v23, %v3538_v31  ;;  %v3547_v39 = vadd.f32 %v3546_v50, %v3545_v20  ;;  %v4673_v52 = vpop.eup %4672  ;;  %v3550_v58 = vsel %vm806_vm3, %v4671_v51, 0.0  ;;  %v3590_v50 = vunpack.c.l.bf16 %v5433_v61 }
 0x94e   :  { %v4675_v19 = vpop.eup %4674  ;;  %v3552_v43 = vsel %vm806_vm3, %v4673_v52, 0.0 }
 0x94f   :  { %v3542_v53 = vadd.f32 %v3541_v46, %v3540_v42  ;;  %v3549_v56 = vadd.f32 %v3548_v9, %v3547_v39  ;;  %v4677_v28 = vpop.eup %4676  ;;  %v3554_v2 = vsel %vm806_vm3, %v4675_v19, 0.0  ;;  %v5913_v46 = vld [vmem:[#allocation19_spill] sm:$0xff] }
 0x950   :  { %v3556_v62 = vsel %vm806_vm3, %v4677_v28, 0.0  ;;  %v3592_v9 = vunpack.c.l.bf16 %v5913_v46 }
 0x951   :  { %4678 = vrcp.f32 %v3542_v53  ;;  %v3551_v3 = vadd.f32 %v3550_v58, %v3549_v56  ;;  %v3594_v58 = vunpack.c.l.bf16 %v5621_v14 }
 0x953   :  { %v3553_v34 = vadd.f32 %v3552_v43, %v3551_v3 }
 0x955   :  { %v3555_v25 = vadd.f32 %v3554_v2, %v3553_v34 }
 0x957   :  { %v3557_v17 = vadd.f32 %v3556_v62, %v3555_v25  ;;  %v3587_v25 = vunpack.c.h.bf16 %v5912_v12 }
 0x959   :  { %4680 = vrcp.f32 %v3557_v17 }
 0x95b   :  { %v4679_v5 = vpop.eup %4678 }
 0x95c   :  { %v3560_v4 = vmul.f32 %v4679_v5, %v4647_v15  ;;  %v3562_v49 = vmul.f32 %v4679_v5, %v4649_v47  ;;  %v3564_v40 = vmul.f32 %v4679_v5, %v4651_v11  ;;  %v3566_v8 = vmul.f32 %v4679_v5, %v4653_v63  ;;  %v4382_v15 = vld [vmem:[%s5845_s6] sm:$0xff]  }
 0x95d   :  { %v3568_v44 = vmul.f32 %v4679_v5, %v4655_v26  ;;  %v3570_v36 = vmul.f32 %v4679_v5, %v4657_v16  ;;  %v4735_v47 = vmov 0.0   ;;  %v4385_v26 = vld [vmem:[%s5845_s6 + $0x18] sm:$0xff]   ;;  %v4386_v16 = vld [vmem:[%s5845_s6 + $0x20] sm:$0xff]   ;;  %v3572_v37 = vmul.f32 %v4679_v5, %v5755_v41 }
 0x95e   :  { %3602 = vperm.xlu0 %4232, %v3560_v4   ;;  %3612 = vperm.xlu1 %4233, %v3562_v49   ;;  %v3574_v57 = vmul.f32 %v4679_v5, %v5758_v24  ;;  %v4389_v41 = vld [vmem:[%s5845_s6 + $0x38] sm:$0xff]  }
 0x95f   :  { %4200 = vmatprep.subr.bf16.mxu0 %v4735_v47  ;;  %4216 = vmatprep.mubr.msk.bf16.mxu0 %vm4736_vm4, %v4735_v47  ;;  %v5911_v24 = vld [vmem:[#allocation29_spill] sm:$0xff] }
 0x960   :  { %4201 = vmatpush3.bf16.msra.mxu0 %v4382_v15  ;;  %v3585_v2 = vunpack.c.h.bf16 %v5911_v24 }
 0x961   :  { %4202 = vmatprep.subr.bf16.mxu0 %v4735_v47 }
 0x962   :  { %3622 = vperm.xlu1 %4233, %v3564_v40   ;;  %v3589_v40 = vunpack.c.h.bf16 %v5370_v18 }
 0x963   :  { %v4681_v45 = vpop.eup %4680 }
 0x964   :  { %v3569_v0 = vmul.f32 %v4681_v45, %v4671_v51  ;;  %v3571_v54 = vmul.f32 %v4681_v45, %v4673_v52  ;;  %v3573_v21 = vmul.f32 %v4681_v45, %v4675_v19  ;;  %v3575_v59 = vmul.f32 %v4681_v45, %v4677_v28  ;;  %4203 = vmatpush3.bf16.msra.mxu0 %v4383_v48 }
 0x965   :  { %v3561_v11 = vmul.f32 %v4681_v45, %v4663_v10  ;;  %v3563_v63 = vmul.f32 %v4681_v45, %v4665_v30  ;;  %4204 = vmatprep.subr.bf16.mxu0 %v4735_v47  ;;  %v3565_v55 = vmul.f32 %v4681_v45, %v5762_v29  ;;  %v3567_v7 = vmul.f32 %v4681_v45, %v5766_v33 }
 0x966   :  { %3647 = vperm.xlu0 %4232, %v3569_v0   ;;  %3632 = vperm.xlu1 %4233, %v3566_v8   ;;  %v3584_v10 = vunpack.c.l.bf16 %v5911_v24  ;;  %v3586_v30 = vunpack.c.l.bf16 %v5912_v12  ;;  %v3588_v33 = vunpack.c.l.bf16 %v5370_v18  ;;  %v3596_v48 = vunpack.c.l.bf16 %v5684_v6 }
 0x967   :  { %v3597_v18 = vunpack.c.h.bf16 %v5684_v6  ;;  %v4182_v6 = vld [vmem:[%s5846_s7] ss:$0 sm:$0xff] }
 0x968   :  { %4205 = vmatpush3.bf16.msra.mxu0 %v4384_v27 }
 0x969   :  { %4206 = vmatprep.subr.bf16.mxu0 %v4735_v47 }
 0x96a   :  { %3657 = vperm.xlu0 %4232, %v3571_v54   ;;  %3642 = vperm.xlu1 %4233, %v3568_v44   ;;  %v3591_v54 = vunpack.c.h.bf16 %v5433_v61  ;;  %v3599_v61 = vunpack.c.h.bf16 %v5706_v35 }
 0x96c   :  { %4207 = vmatpush3.bf16.msra.mxu0 %v4385_v26 }
 0x96d   :  { %4208 = vmatprep.subr.bf16.mxu0 %v4735_v47 }
 0x96e   :  { %3667 = vperm.xlu0 %4232, %v3573_v21   ;;  %3652 = vperm.xlu1 %4233, %v3570_v36   ;;  %v3593_v36 = vunpack.c.h.bf16 %v5913_v46 }
 0x970   :  { %4209 = vmatpush3.bf16.msra.mxu0 %v4386_v16 }
 0x971   :  { %4210 = vmatprep.subr.bf16.mxu0 %v4735_v47 }
 0x972   :  { %3677 = vperm.xlu0 %4232, %v3575_v59   ;;  %3607 = vperm.xlu1 %4233, %v3561_v11   ;;  %v3595_v59 = vunpack.c.h.bf16 %v5621_v14 }
 0x974   :  { %4211 = vmatpush3.bf16.msra.mxu0 %v4387_v60  ;;  %v3598_v60 = vunpack.c.l.bf16 %v5706_v35 }
 0x975   :  { %4212 = vmatprep.subr.bf16.mxu0 %v4735_v47 }
 0x976   :  { %3617 = vperm.xlu1 %4233, %v3563_v63  }
 0x978   :  { %4213 = vmatpush3.bf16.msra.mxu0 %v4388_v38 }
 0x979   :  { %4214 = vmatprep.subr.bf16.mxu0 %v4735_v47 }
 0x97a   :  { %3627 = vperm.xlu1 %4233, %v3565_v55  }
 0x97c   :  { %4215 = vmatpush3.bf16.msra.mxu0 %v4389_v41 }
 0x97e   :  { %3637 = vperm.xlu1 %4233, %v3567_v7  }
 0x982   :  { %3662 = vperm.xlu1 %4233, %v3572_v37  }
 0x986   :  { %3672 = vperm.xlu1 %4233, %v3574_v57  }
 0x9dd   :  { %v3603_v32 = vpop.permute.xlu0 %3602  ;;  %v3613_v1 = vpop.permute.xlu1 %3612 }
 0x9de   :  { %v3680_v29 = vmul.f32 %v3603_v32, %v3584_v10  ;;  %v3682_v13 = vmul.f32 %v3613_v1, %v3586_v30 }
 0x9e0   :  { %v3696_v22 = vadd.f32 %v3682_v13, %v3680_v29 }
 0x9e1   :  { %v3623_v31 = vpop.permute.xlu1 %3622 }
 0x9e2   :  { %v3684_v20 = vmul.f32 %v3623_v31, %v3588_v33 }
 0x9e4   :  { %v3697_v23 = vadd.f32 %v3696_v22, %v3684_v20 }
 0x9e5   :  { %v3633_v51 = vpop.permute.xlu1 %3632  ;;  %v3648_v28 = vpop.permute.xlu0 %3647 }
 0x9e6   :  { %v3686_v42 = vmul.f32 %v3633_v51, %v3590_v50  ;;  %v3689_v47 = vmul.f32 %v3648_v28, %v3593_v36 }
 0x9e8   :  { %v3698_v39 = vadd.f32 %v3697_v23, %v3686_v42 }
 0x9e9   :  { %v3643_v52 = vpop.permute.xlu1 %3642  ;;  %v3658_v4 = vpop.permute.xlu0 %3657 }
 0x9ea   :  { %v3688_v53 = vmul.f32 %v3643_v52, %v3592_v9  ;;  %v3691_v27 = vmul.f32 %v3658_v4, %v3595_v59 }
 0x9ec   :  { %v3699_v56 = vadd.f32 %v3698_v39, %v3688_v53 }
 0x9ed   :  { %v3653_v19 = vpop.permute.xlu1 %3652  ;;  %v3668_v44 = vpop.permute.xlu0 %3667 }
 0x9ee   :  { %v3690_v3 = vmul.f32 %v3653_v19, %v3594_v58  ;;  %v3693_v16 = vmul.f32 %v3668_v44, %v3597_v18 }
 0x9f0   :  { %v3700_v43 = vadd.f32 %v3699_v56, %v3690_v3 }
 0x9f1   :  { %v3608_v34 = vpop.permute.xlu1 %3607  ;;  %v3678_v7 = vpop.permute.xlu0 %3677 }
 0x9f2   :  { %v3681_v17 = vmul.f32 %v3608_v34, %v3585_v2  ;;  %v3695_v41 = vmul.f32 %v3678_v7, %v3599_v61 }
 0x9f5   :  { %v3618_v62 = vpop.permute.xlu1 %3617 }
 0x9f6   :  { %v3683_v5 = vmul.f32 %v3618_v62, %v3587_v25 }
 0x9f8   :  { %v3703_v49 = vadd.f32 %v3683_v5, %v3681_v17 }
 0x9f9   :  { %v3628_v45 = vpop.permute.xlu1 %3627 }
 0x9fa   :  { %v3685_v0 = vmul.f32 %v3628_v45, %v3589_v40 }
 0x9fc   :  { %v3704_v8 = vadd.f32 %v3703_v49, %v3685_v0 }
 0x9fd   :  { %v3638_v21 = vpop.permute.xlu1 %3637 }
 0x9fe   :  { %v3687_v15 = vmul.f32 %v3638_v21, %v3591_v54 }
 0xa00   :  { %v3705_v11 = vadd.f32 %v3704_v8, %v3687_v15 }
 0xa01   :  { %v3663_v63 = vpop.permute.xlu1 %3662 }
 0xa02   :  { %v3706_v55 = vadd.f32 %v3705_v11, %v3689_v47  ;;  %v3692_v26 = vmul.f32 %v3663_v63, %v3596_v48 }
 0xa04   :  { %v3707_v37 = vadd.f32 %v3706_v55, %v3691_v27  ;;  %v3701_v57 = vadd.f32 %v3700_v43, %v3692_v26 }
 0xa05   :  { %v3673_v38 = vpop.permute.xlu1 %3672 }
 0xa06   :  { %v3708_v14 = vadd.f32 %v3707_v37, %v3693_v16  ;;  %v3694_v24 = vmul.f32 %v3673_v38, %v3598_v60 }
 0xa08   :  { %v3702_v10 = vadd.f32 %v3701_v57, %v3694_v24  ;;  %v3709_v12 = vadd.f32 %v3708_v14, %v3695_v41 }
 0xa0a   :  { %v3710_v30 = vpack.c.bf16 %v3709_v12, %v3702_v10 }
 0xa0c   :  { %4217 = vmatmul.mubr.bf16.vlgmr.msra.gmra.mrb[56].mxu0 %v3710_v30 }
 0xadf   :  { %v3816_v32 = vpop.f32.mrb[56].mxu0 }
 0xae0   :  { %v3817_v1 = vadd.f32 %v4182_v6, %v3816_v32  ;;  %v4218_v29 = vpop.f32.mrb[57].mxu0 }
 0xae1   :  { %v3819_v13 = vpop.f32.mrb[58].mxu0 }
 0xae2   :  { %3823 = vst [vmem:[#allocation9] sm:$0xff] %v3817_v1  ;;  %v3820_v35 = vadd.f32 %v4182_v6, %v3819_v13  ;;  %v4219_v22 = vpop.f32.mrb[59].mxu0 }
 0xae4   :  { %3824 = vst [vmem:[#allocation9 + $0x8] sm:$0xff] %v3820_v35 }
 0xae5   :  { %4715 = shalt.err (!%p4712_p12)
}
 0xae6   :  { %s4716_s30 = scalar_lea.hbm %s5847_s8, 256 }
 0xae7   :  { %p4717_p13 = scmp.ne.s32.totalorder %s5847_s8, %s4716_s30  ;;  %p4720_p0 = scmp.lt.u32.totalorder %s4716_s30, %s5847_s8 }
 0xae9   :  { %p4722_p1 = pnand %p4720_p0, %p4717_p13 }
 0xaeb   :  { %4725 = shalt.err (!%p4722_p1)
}
 0xaec   :  { %s4738_s11 = smov 128   ;;  %s4739_s12 = smov 8  }
 0xaed   :  { %3836 = dma.vmem_to_hbm [thread:$0]  %s3831_s28, 256, %s5847_s8, [#allocation8], %s4738_s11, %s4738_s11, %s4739_s12  }
 0xaee   :  { %4728 = dma.done.wait [#allocation8], 256  }
 0xaef   :  { %4729 = vsyncadd [#allocation8], 4294967040 }
 0xaf0   :  { %3840 = vsyncpa [#allocation7], 1 }
 0xaf1   :  { %3841 = vsyncpa [#allocation8], 1 }

</bundles_post_ra>
